<compile_context>
chip_gen: v6e
topology: v6e:2x2x1
jax: 0.10.0
libtpu: 0.0.40
codegen_flags: <defaults>
</compile_context>

<pallas_src>
import functools

import jax
import jax.numpy as jnp
from jax.experimental import pallas as pl
from jax.experimental.pallas import tpu as pltpu

NEG_SLOPE = 0.2   # LeakyReLU slope used by Conv2dLayer
IN_EPS = 1e-5     # nn.InstanceNorm2d default eps


def _round_up(x, m):
    return (x + m - 1) // m * m


# ------------------------------ Pallas kernel --------------------------------

def _conv_fused_kernel(p_ref, w_ref, b_ref, o_ref, *, use_norm, use_act):
    """Fused conv-GEMM + bias (+ InstanceNorm) (+ LeakyReLU) for one sample.

    p_ref: (K, M)    bf16  transposed im2col patches (M = OH*OW, lane dim)
    w_ref: (Cout, K) bf16  flattened conv weight
    b_ref: (Cout, 1) f32   bias
    o_ref: (Cout, M)       output (bf16 intermediates, f32 last layer)
    """
    acc = jnp.dot(w_ref[...], p_ref[...],
                  preferred_element_type=jnp.float32)        # (Cout, M) f32
    acc = acc + b_ref[...]                                   # lane broadcast
    if use_norm:
        # InstanceNorm2d(affine=False): per (sample, channel) over spatial M,
        # biased variance, eps = 1e-5 (matches PyTorch defaults).
        mean = jnp.mean(acc, axis=-1, keepdims=True)
        var = jnp.mean(jnp.square(acc - mean), axis=-1, keepdims=True)
        acc = (acc - mean) * jax.lax.rsqrt(var + IN_EPS)
    if use_act:
        acc = jnp.where(acc >= 0, acc, NEG_SLOPE * acc)      # LeakyReLU(0.2)
    o_ref[...] = acc.astype(o_ref.dtype)


def conv_fused(patches_t, w_mat, bias, *, use_norm, use_act, out_dtype):
    """patches_t: (N, K, M) bf16, w_mat: (Cout, K) bf16, bias: (Cout, 1) f32."""
    n, k, m = patches_t.shape
    cout = w_mat.shape[0]
    kernel = functools.partial(_conv_fused_kernel,
                               use_norm=use_norm, use_act=use_act)
    out_bytes = n * cout * m * jnp.dtype(out_dtype).itemsize
    cost = pl.CostEstimate(
        flops=2 * n * cout * k * m,
        transcendentals=(n * cout) if use_norm else 0,
        bytes_accessed=patches_t.size * 2 + w_mat.size * 2 + bias.size * 4
        + out_bytes,
    )
    return pl.pallas_call(
        kernel,
        out_shape=jax.ShapeDtypeStruct((n, cout, m), out_dtype),
        grid=(n,),
        in_specs=[
            pl.BlockSpec((None, k, m), lambda b: (b, 0, 0)),   # per-sample slab
            pl.BlockSpec((cout, k), lambda b: (0, 0)),         # full weight
            pl.BlockSpec((cout, 1), lambda b: (0, 0)),         # bias
        ],
        out_specs=pl.BlockSpec((None, cout, m), lambda b: (b, 0, 0)),
        compiler_params=pltpu.CompilerParams(
            dimension_semantics=("parallel",)),
        cost_estimate=cost,
    )(patches_t, w_mat, bias)


# --------------------------- Glue (plain JAX) --------------------------------

def _im2col_t(x_nchw, kh, kw, stride, pad, k_pad):
    """im2col built directly in transposed (N, K, M) layout.

    K-order is (cin, kh, kw), matching w.reshape(Cout, Cin*KH*KW); M = OH*OW is
    the (lane-dense) last dim, so no extra transpose is needed anywhere.
    """
    x = jnp.pad(x_nchw, ((0, 0), (0, 0), (pad, pad), (pad, pad)))
    n, c, hp, wp = x.shape
    oh = (hp - kh) // stride + 1
    ow = (wp - kw) // stride + 1
    taps = []
    for i in range(kh):
        for j in range(kw):
            t = x[:, :,
                  i:i + stride * (oh - 1) + 1:stride,
                  j:j + stride * (ow - 1) + 1:stride]          # (N, C, OH, OW)
            taps.append(t.reshape(n, c, oh * ow))
    p = jnp.stack(taps, axis=2)                                # (N, C, KH*KW, M)
    p = p.reshape(n, c * kh * kw, oh * ow)                     # (N, K, M)
    if k_pad > c * kh * kw:                                    # align K (196->256)
        p = jnp.pad(p, ((0, 0), (0, k_pad - c * kh * kw), (0, 0)))
    return p, oh, ow


def conv2d_layer(x_nchw, w, b, stride, pad, use_norm, use_act, out_dtype):
    # w: PyTorch layout [Cout, Cin, KH, KW]; b: [Cout].
    cout, cin, kh, kw = w.shape
    k = cin * kh * kw
    k_pad = _round_up(k, 128)
    patches, oh, ow = _im2col_t(x_nchw.astype(jnp.bfloat16),
                                kh, kw, stride, pad, k_pad)
    w_mat = w.reshape(cout, k)
    if k_pad > k:
        w_mat = jnp.pad(w_mat, ((0, 0), (0, k_pad - k)))
    w_mat = w_mat.astype(jnp.bfloat16)
    bias = b.reshape(cout, 1).astype(jnp.float32)
    y = conv_fused(patches, w_mat, bias, use_norm=use_norm,
                   use_act=use_act, out_dtype=out_dtype)       # (N, Cout, M)
    return y.reshape(x_nchw.shape[0], cout, oh, ow)            # NCHW, no transpose


_LAYER_CFG = [
    # (stride, pad, use_norm, use_act)
    (1, 3, False, True),    # block1: 7x7
    (2, 1, True, True),     # block2
    (2, 1, True, True),     # block3
    (2, 1, True, True),     # block4
    (2, 1, True, True),     # block5
    (2, 1, False, False),   # block6
]


def patch_discriminator(img, mask, params):
    # img [N,3,H,W], mask [N,1,H,W] in NCHW (PyTorch convention).
    x = jnp.concatenate([img, mask], axis=1)
    for idx, ((w, b), (s, p, nrm, act)) in enumerate(zip(params, _LAYER_CFG)):
        out_dtype = jnp.float32 if idx == len(_LAYER_CFG) - 1 else jnp.bfloat16
        x = conv2d_layer(x, w, b, s, p, nrm, act, out_dtype)
    return x                                                   # [N,1,H/32,W/32]


def init_params(key, in_channels, latent):
    specs = [
        (latent,       in_channels, 7),
        (latent * 2,   latent,      4),
        (latent * 4,   latent * 2,  4),
        (latent * 4,   latent * 4,  4),
        (latent * 4,   latent * 4,  4),
        (1,            latent * 4,  4),
    ]
    params = []
    for cout, cin, ksz in specs:
        key, kw_, kb_ = jax.random.split(key, 3)
        w = 0.02 * jax.random.normal(kw_, (cout, cin, ksz, ksz), jnp.float32)
        b = 0.01 * jax.random.normal(kb_, (cout,), jnp.float32)
        params.append((w, b))
    return params


if __name__ == "__main__":
    key = jax.random.PRNGKey(0)
    kimg, kmask, kparam = jax.random.split(key, 3)
    # img: 3 channels, mask: 1 channel -> in_channels = 4; latent_channels = 8.
    img = jax.random.normal(kimg, (2, 3, 64, 64), jnp.float32)
    mask = jax.random.uniform(kmask, (2, 1, 64, 64), jnp.float32)
    params = init_params(kparam, in_channels=4, latent=8)

    out = jax.jit(patch_discriminator)(img, mask, params)
    jax.block_until_ready(out)
    assert out.shape == (2, 1, 2, 2), out.shape
    print("KERNEL_OK")
</pallas_src>

<mosaic_0001>
module attributes {stable_mosaic.version = 11 : i64} {
  func.func @_conv_fused_kernel(%arg0: i32, %arg1: memref<1x256x4096xbf16, #tpu.memory_space<vmem>>, %arg2: memref<8x256xbf16, #tpu.memory_space<vmem>>, %arg3: memref<8x1xf32, #tpu.memory_space<vmem>>, %arg4: memref<1x8x4096xbf16, #tpu.memory_space<vmem>>) attributes {dimension_semantics = [#tpu.dimension_semantics<parallel>], iteration_bounds = array<i64: 2>, scalar_prefetch = 0 : i64, scratch_operands = 0 : i64, tpu.core_type = #tpu.core_type<tc>, window_params = [{transform_indices = @transform_0, window_bounds = array<i64: 1, 256, 4096>}, {pipeline_mode = #tpu.pipeline_mode<synchronous>, transform_indices = @transform_1, window_bounds = array<i64: 8, 256>}, {pipeline_mode = #tpu.pipeline_mode<synchronous>, transform_indices = @transform_2, window_bounds = array<i64: 8, 1>}, {transform_indices = @transform_3, window_bounds = array<i64: 1, 8, 4096>}]} {
    %c0 = arith.constant 0 : index
    %c0_0 = arith.constant 0 : index
    %0 = vector.load %arg2[%c0, %c0_0] : memref<8x256xbf16, #tpu.memory_space<vmem>>, vector<8x256xbf16>
    %c0_1 = arith.constant 0 : index
    %c0_2 = arith.constant 0 : index
    %c0_3 = arith.constant 0 : index
    %1 = vector.load %arg1[%c0_1, %c0_2, %c0_3] : memref<1x256x4096xbf16, #tpu.memory_space<vmem>>, vector<1x256x4096xbf16>
    %2 = vector.shape_cast %1 : vector<1x256x4096xbf16> to vector<256x4096xbf16>
    %cst = arith.constant dense<0.000000e+00> : vector<8x4096xf32>
    %3 = tpu.matmul %0, %2, %cst {dimension_numbers = #tpu.dot_dimension_numbers<[1], [0], [0], [1], [0, 0, 1, 1], [], []>} : vector<8x256xbf16>, vector<256x4096xbf16>, vector<8x4096xf32> -> vector<8x4096xf32>
    %c0_4 = arith.constant 0 : index
    %c0_5 = arith.constant 0 : index
    %4 = vector.load %arg3[%c0_4, %c0_5] : memref<8x1xf32, #tpu.memory_space<vmem>>, vector<8x1xf32>
    %5 = vector.broadcast %4 : vector<8x1xf32> to vector<8x4096xf32>
    %6 = arith.addf %3, %5 : vector<8x4096xf32>
    %cst_6 = arith.constant 0.000000e+00 : f32
    %7 = vector.broadcast %cst_6 : f32 to vector<8x4096xf32>
    %8 = arith.cmpf oge, %6, %7 : vector<8x4096xf32>
    %cst_7 = arith.constant 2.000000e-01 : f32
    %9 = vector.broadcast %cst_7 : f32 to vector<8x4096xf32>
    %10 = arith.mulf %9, %6 : vector<8x4096xf32>
    %11 = arith.select %8, %6, %10 : vector<8x4096xi1>, vector<8x4096xf32>
    %12 = arith.truncf %11 : vector<8x4096xf32> to vector<8x4096xbf16>
    %c0_8 = arith.constant 0 : index
    %c0_9 = arith.constant 0 : index
    %c0_10 = arith.constant 0 : index
    %13 = vector.load %arg4[%c0_8, %c0_9, %c0_10] : memref<1x8x4096xbf16, #tpu.memory_space<vmem>>, vector<1x8x4096xbf16>
    %14 = vector.shape_cast %13 : vector<1x8x4096xbf16> to vector<8x4096xbf16>
    %15 = vector.shape_cast %12 : vector<8x4096xbf16> to vector<1x8x4096xbf16>
    tpu.vector_store %arg4[%c0_8, %c0_9, %c0_10], %15 {strides = array<i32>} : memref<1x8x4096xbf16, #tpu.memory_space<vmem>>, vector<1x8x4096xbf16>,
    return
  }
  func.func @transform_0(%arg0: i32) -> (i32, i32, i32) {
    %c0_i32 = arith.constant 0 : i32
    %c0_i32_0 = arith.constant 0 : i32
    %c0_i32_1 = arith.constant 0 : i32
    return %arg0, %c0_i32, %c0_i32_0 : i32, i32, i32
  }
  func.func @transform_1(%arg0: i32) -> (i32, i32) {
    %c0_i32 = arith.constant 0 : i32
    %c0_i32_0 = arith.constant 0 : i32
    %c0_i32_1 = arith.constant 0 : i32
    return %c0_i32, %c0_i32_0 : i32, i32
  }
  func.func @transform_2(%arg0: i32) -> (i32, i32) {
    %c0_i32 = arith.constant 0 : i32
    %c0_i32_0 = arith.constant 0 : i32
    %c0_i32_1 = arith.constant 0 : i32
    return %c0_i32, %c0_i32_0 : i32, i32
  }
  func.func @transform_3(%arg0: i32) -> (i32, i32, i32) {
    %c0_i32 = arith.constant 0 : i32
    %c0_i32_0 = arith.constant 0 : i32
    %c0_i32_1 = arith.constant 0 : i32
    return %arg0, %c0_i32, %c0_i32_0 : i32, i32, i32
  }
}

module attributes {stable_mosaic.version = 11 : i64} {
  func.func @_conv_fused_kernel(%arg0: i32, %arg1: memref<1x128x1024xbf16, #tpu.memory_space<vmem>>, %arg2: memref<16x128xbf16, #tpu.memory_space<vmem>>, %arg3: memref<16x1xf32, #tpu.memory_space<vmem>>, %arg4: memref<1x16x1024xbf16, #tpu.memory_space<vmem>>) attributes {dimension_semantics = [#tpu.dimension_semantics<parallel>], iteration_bounds = array<i64: 2>, scalar_prefetch = 0 : i64, scratch_operands = 0 : i64, tpu.core_type = #tpu.core_type<tc>, window_params = [{transform_indices = @transform_0, window_bounds = array<i64: 1, 128, 1024>}, {pipeline_mode = #tpu.pipeline_mode<synchronous>, transform_indices = @transform_1, window_bounds = array<i64: 16, 128>}, {pipeline_mode = #tpu.pipeline_mode<synchronous>, transform_indices = @transform_2, window_bounds = array<i64: 16, 1>}, {transform_indices = @transform_3, window_bounds = array<i64: 1, 16, 1024>}]} {
    %c0 = arith.constant 0 : index
    %c0_0 = arith.constant 0 : index
    %0 = vector.load %arg2[%c0, %c0_0] : memref<16x128xbf16, #tpu.memory_space<vmem>>, vector<16x128xbf16>
    %c0_1 = arith.constant 0 : index
    %c0_2 = arith.constant 0 : index
    %c0_3 = arith.constant 0 : index
    %1 = vector.load %arg1[%c0_1, %c0_2, %c0_3] : memref<1x128x1024xbf16, #tpu.memory_space<vmem>>, vector<1x128x1024xbf16>
    %2 = vector.shape_cast %1 : vector<1x128x1024xbf16> to vector<128x1024xbf16>
    %cst = arith.constant dense<0.000000e+00> : vector<16x1024xf32>
    %3 = tpu.matmul %0, %2, %cst {dimension_numbers = #tpu.dot_dimension_numbers<[1], [0], [0], [1], [0, 0, 1, 1], [], []>} : vector<16x128xbf16>, vector<128x1024xbf16>, vector<16x1024xf32> -> vector<16x1024xf32>
    %c0_4 = arith.constant 0 : index
    %c0_5 = arith.constant 0 : index
    %4 = vector.load %arg3[%c0_4, %c0_5] : memref<16x1xf32, #tpu.memory_space<vmem>>, vector<16x1xf32>
    %5 = vector.broadcast %4 : vector<16x1xf32> to vector<16x1024xf32>
    %6 = arith.addf %3, %5 : vector<16x1024xf32>
    %cst_6 = arith.constant dense<0.000000e+00> : vector<16xf32>
    %7 = vector.multi_reduction <add>, %6, %cst_6 [1] : vector<16x1024xf32> to vector<16xf32>
    %8 = vector.shape_cast %7 : vector<16xf32> to vector<16x1xf32>
    %cst_7 = arith.constant 1.024000e+03 : f32
    %9 = vector.broadcast %cst_7 : f32 to vector<16x1xf32>
    %10 = arith.divf %8, %9 : vector<16x1xf32>
    %11 = vector.broadcast %10 : vector<16x1xf32> to vector<16x1024xf32>
    %12 = arith.subf %6, %11 : vector<16x1024xf32>
    %13 = arith.mulf %12, %12 : vector<16x1024xf32>
    %cst_8 = arith.constant dense<0.000000e+00> : vector<16xf32>
    %14 = vector.multi_reduction <add>, %13, %cst_8 [1] : vector<16x1024xf32> to vector<16xf32>
    %15 = vector.shape_cast %14 : vector<16xf32> to vector<16x1xf32>
    %cst_9 = arith.constant 1.024000e+03 : f32
    %16 = vector.broadcast %cst_9 : f32 to vector<16x1xf32>
    %17 = arith.divf %15, %16 : vector<16x1xf32>
    %18 = vector.broadcast %10 : vector<16x1xf32> to vector<16x1024xf32>
    %19 = arith.subf %6, %18 : vector<16x1024xf32>
    %cst_10 = arith.constant 9.99999974E-6 : f32
    %20 = vector.broadcast %cst_10 : f32 to vector<16x1xf32>
    %21 = arith.addf %17, %20 : vector<16x1xf32>
    %22 = math.rsqrt %21 : vector<16x1xf32>
    %23 = vector.broadcast %22 : vector<16x1xf32> to vector<16x1024xf32>
    %24 = arith.mulf %19, %23 : vector<16x1024xf32>
    %cst_11 = arith.constant 0.000000e+00 : f32
    %25 = vector.broadcast %cst_11 : f32 to vector<16x1024xf32>
    %26 = arith.cmpf oge, %24, %25 : vector<16x1024xf32>
    %cst_12 = arith.constant 2.000000e-01 : f32
    %27 = vector.broadcast %cst_12 : f32 to vector<16x1024xf32>
    %28 = arith.mulf %27, %24 : vector<16x1024xf32>
    %29 = arith.select %26, %24, %28 : vector<16x1024xi1>, vector<16x1024xf32>
    %30 = arith.truncf %29 : vector<16x1024xf32> to vector<16x1024xbf16>
    %c0_13 = arith.constant 0 : index
    %c0_14 = arith.constant 0 : index
    %c0_15 = arith.constant 0 : index
    %31 = vector.load %arg4[%c0_13, %c0_14, %c0_15] : memref<1x16x1024xbf16, #tpu.memory_space<vmem>>, vector<1x16x1024xbf16>
    %32 = vector.shape_cast %31 : vector<1x16x1024xbf16> to vector<16x1024xbf16>
    %33 = vector.shape_cast %30 : vector<16x1024xbf16> to vector<1x16x1024xbf16>
    tpu.vector_store %arg4[%c0_13, %c0_14, %c0_15], %33 {strides = array<i32>} : memref<1x16x1024xbf16, #tpu.memory_space<vmem>>, vector<1x16x1024xbf16>,
    return
  }
  func.func @transform_0(%arg0: i32) -> (i32, i32, i32) {
    %c0_i32 = arith.constant 0 : i32
    %c0_i32_0 = arith.constant 0 : i32
    %c0_i32_1 = arith.constant 0 : i32
    return %arg0, %c0_i32, %c0_i32_0 : i32, i32, i32
  }
  func.func @transform_1(%arg0: i32) -> (i32, i32) {
    %c0_i32 = arith.constant 0 : i32
    %c0_i32_0 = arith.constant 0 : i32
    %c0_i32_1 = arith.constant 0 : i32
    return %c0_i32, %c0_i32_0 : i32, i32
  }
  func.func @transform_2(%arg0: i32) -> (i32, i32) {
    %c0_i32 = arith.constant 0 : i32
    %c0_i32_0 = arith.constant 0 : i32
    %c0_i32_1 = arith.constant 0 : i32
    return %c0_i32, %c0_i32_0 : i32, i32
  }
  func.func @transform_3(%arg0: i32) -> (i32, i32, i32) {
    %c0_i32 = arith.constant 0 : i32
    %c0_i32_0 = arith.constant 0 : i32
    %c0_i32_1 = arith.constant 0 : i32
    return %arg0, %c0_i32, %c0_i32_0 : i32, i32, i32
  }
}

module attributes {stable_mosaic.version = 11 : i64} {
  func.func @_conv_fused_kernel(%arg0: i32, %arg1: memref<1x256x256xbf16, #tpu.memory_space<vmem>>, %arg2: memref<32x256xbf16, #tpu.memory_space<vmem>>, %arg3: memref<32x1xf32, #tpu.memory_space<vmem>>, %arg4: memref<1x32x256xbf16, #tpu.memory_space<vmem>>) attributes {dimension_semantics = [#tpu.dimension_semantics<parallel>], iteration_bounds = array<i64: 2>, scalar_prefetch = 0 : i64, scratch_operands = 0 : i64, tpu.core_type = #tpu.core_type<tc>, window_params = [{transform_indices = @transform_0, window_bounds = array<i64: 1, 256, 256>}, {pipeline_mode = #tpu.pipeline_mode<synchronous>, transform_indices = @transform_1, window_bounds = array<i64: 32, 256>}, {pipeline_mode = #tpu.pipeline_mode<synchronous>, transform_indices = @transform_2, window_bounds = array<i64: 32, 1>}, {transform_indices = @transform_3, window_bounds = array<i64: 1, 32, 256>}]} {
    %c0 = arith.constant 0 : index
    %c0_0 = arith.constant 0 : index
    %0 = vector.load %arg2[%c0, %c0_0] : memref<32x256xbf16, #tpu.memory_space<vmem>>, vector<32x256xbf16>
    %c0_1 = arith.constant 0 : index
    %c0_2 = arith.constant 0 : index
    %c0_3 = arith.constant 0 : index
    %1 = vector.load %arg1[%c0_1, %c0_2, %c0_3] : memref<1x256x256xbf16, #tpu.memory_space<vmem>>, vector<1x256x256xbf16>
    %2 = vector.shape_cast %1 : vector<1x256x256xbf16> to vector<256x256xbf16>
    %cst = arith.constant dense<0.000000e+00> : vector<32x256xf32>
    %3 = tpu.matmul %0, %2, %cst {dimension_numbers = #tpu.dot_dimension_numbers<[1], [0], [0], [1], [0, 0, 1, 1], [], []>} : vector<32x256xbf16>, vector<256x256xbf16>, vector<32x256xf32> -> vector<32x256xf32>
    %c0_4 = arith.constant 0 : index
    %c0_5 = arith.constant 0 : index
    %4 = vector.load %arg3[%c0_4, %c0_5] : memref<32x1xf32, #tpu.memory_space<vmem>>, vector<32x1xf32>
    %5 = vector.broadcast %4 : vector<32x1xf32> to vector<32x256xf32>
    %6 = arith.addf %3, %5 : vector<32x256xf32>
    %cst_6 = arith.constant dense<0.000000e+00> : vector<32xf32>
    %7 = vector.multi_reduction <add>, %6, %cst_6 [1] : vector<32x256xf32> to vector<32xf32>
    %8 = vector.shape_cast %7 : vector<32xf32> to vector<32x1xf32>
    %cst_7 = arith.constant 2.560000e+02 : f32
    %9 = vector.broadcast %cst_7 : f32 to vector<32x1xf32>
    %10 = arith.divf %8, %9 : vector<32x1xf32>
    %11 = vector.broadcast %10 : vector<32x1xf32> to vector<32x256xf32>
    %12 = arith.subf %6, %11 : vector<32x256xf32>
    %13 = arith.mulf %12, %12 : vector<32x256xf32>
    %cst_8 = arith.constant dense<0.000000e+00> : vector<32xf32>
    %14 = vector.multi_reduction <add>, %13, %cst_8 [1] : vector<32x256xf32> to vector<32xf32>
    %15 = vector.shape_cast %14 : vector<32xf32> to vector<32x1xf32>
    %cst_9 = arith.constant 2.560000e+02 : f32
    %16 = vector.broadcast %cst_9 : f32 to vector<32x1xf32>
    %17 = arith.divf %15, %16 : vector<32x1xf32>
    %18 = vector.broadcast %10 : vector<32x1xf32> to vector<32x256xf32>
    %19 = arith.subf %6, %18 : vector<32x256xf32>
    %cst_10 = arith.constant 9.99999974E-6 : f32
    %20 = vector.broadcast %cst_10 : f32 to vector<32x1xf32>
    %21 = arith.addf %17, %20 : vector<32x1xf32>
    %22 = math.rsqrt %21 : vector<32x1xf32>
    %23 = vector.broadcast %22 : vector<32x1xf32> to vector<32x256xf32>
    %24 = arith.mulf %19, %23 : vector<32x256xf32>
    %cst_11 = arith.constant 0.000000e+00 : f32
    %25 = vector.broadcast %cst_11 : f32 to vector<32x256xf32>
    %26 = arith.cmpf oge, %24, %25 : vector<32x256xf32>
    %cst_12 = arith.constant 2.000000e-01 : f32
    %27 = vector.broadcast %cst_12 : f32 to vector<32x256xf32>
    %28 = arith.mulf %27, %24 : vector<32x256xf32>
    %29 = arith.select %26, %24, %28 : vector<32x256xi1>, vector<32x256xf32>
    %30 = arith.truncf %29 : vector<32x256xf32> to vector<32x256xbf16>
    %c0_13 = arith.constant 0 : index
    %c0_14 = arith.constant 0 : index
    %c0_15 = arith.constant 0 : index
    %31 = vector.load %arg4[%c0_13, %c0_14, %c0_15] : memref<1x32x256xbf16, #tpu.memory_space<vmem>>, vector<1x32x256xbf16>
    %32 = vector.shape_cast %31 : vector<1x32x256xbf16> to vector<32x256xbf16>
    %33 = vector.shape_cast %30 : vector<32x256xbf16> to vector<1x32x256xbf16>
    tpu.vector_store %arg4[%c0_13, %c0_14, %c0_15], %33 {strides = array<i32>} : memref<1x32x256xbf16, #tpu.memory_space<vmem>>, vector<1x32x256xbf16>,
    return
  }
  func.func @transform_0(%arg0: i32) -> (i32, i32, i32) {
    %c0_i32 = arith.constant 0 : i32
    %c0_i32_0 = arith.constant 0 : i32
    %c0_i32_1 = arith.constant 0 : i32
    return %arg0, %c0_i32, %c0_i32_0 : i32, i32, i32
  }
  func.func @transform_1(%arg0: i32) -> (i32, i32) {
    %c0_i32 = arith.constant 0 : i32
    %c0_i32_0 = arith.constant 0 : i32
    %c0_i32_1 = arith.constant 0 : i32
    return %c0_i32, %c0_i32_0 : i32, i32
  }
  func.func @transform_2(%arg0: i32) -> (i32, i32) {
    %c0_i32 = arith.constant 0 : i32
    %c0_i32_0 = arith.constant 0 : i32
    %c0_i32_1 = arith.constant 0 : i32
    return %c0_i32, %c0_i32_0 : i32, i32
  }
  func.func @transform_3(%arg0: i32) -> (i32, i32, i32) {
    %c0_i32 = arith.constant 0 : i32
    %c0_i32_0 = arith.constant 0 : i32
    %c0_i32_1 = arith.constant 0 : i32
    return %arg0, %c0_i32, %c0_i32_0 : i32, i32, i32
  }
}

module attributes {stable_mosaic.version = 11 : i64} {
  func.func @_conv_fused_kernel(%arg0: i32, %arg1: memref<1x512x64xbf16, #tpu.memory_space<vmem>>, %arg2: memref<32x512xbf16, #tpu.memory_space<vmem>>, %arg3: memref<32x1xf32, #tpu.memory_space<vmem>>, %arg4: memref<1x32x64xbf16, #tpu.memory_space<vmem>>) attributes {dimension_semantics = [#tpu.dimension_semantics<parallel>], iteration_bounds = array<i64: 2>, scalar_prefetch = 0 : i64, scratch_operands = 0 : i64, tpu.core_type = #tpu.core_type<tc>, window_params = [{transform_indices = @transform_0, window_bounds = array<i64: 1, 512, 64>}, {pipeline_mode = #tpu.pipeline_mode<synchronous>, transform_indices = @transform_1, window_bounds = array<i64: 32, 512>}, {pipeline_mode = #tpu.pipeline_mode<synchronous>, transform_indices = @transform_2, window_bounds = array<i64: 32, 1>}, {transform_indices = @transform_3, window_bounds = array<i64: 1, 32, 64>}]} {
    %c0 = arith.constant 0 : index
    %c0_0 = arith.constant 0 : index
    %0 = vector.load %arg2[%c0, %c0_0] : memref<32x512xbf16, #tpu.memory_space<vmem>>, vector<32x512xbf16>
    %c0_1 = arith.constant 0 : index
    %c0_2 = arith.constant 0 : index
    %c0_3 = arith.constant 0 : index
    %1 = vector.load %arg1[%c0_1, %c0_2, %c0_3] : memref<1x512x64xbf16, #tpu.memory_space<vmem>>, vector<1x512x64xbf16>
    %2 = vector.shape_cast %1 : vector<1x512x64xbf16> to vector<512x64xbf16>
    %cst = arith.constant dense<0.000000e+00> : vector<32x64xf32>
    %3 = tpu.matmul %0, %2, %cst {dimension_numbers = #tpu.dot_dimension_numbers<[1], [0], [0], [1], [0, 0, 1, 1], [], []>} : vector<32x512xbf16>, vector<512x64xbf16>, vector<32x64xf32> -> vector<32x64xf32>
    %c0_4 = arith.constant 0 : index
    %c0_5 = arith.constant 0 : index
    %4 = vector.load %arg3[%c0_4, %c0_5] : memref<32x1xf32, #tpu.memory_space<vmem>>, vector<32x1xf32>
    %5 = vector.broadcast %4 : vector<32x1xf32> to vector<32x64xf32>
    %6 = arith.addf %3, %5 : vector<32x64xf32>
    %cst_6 = arith.constant dense<0.000000e+00> : vector<32xf32>
    %7 = vector.multi_reduction <add>, %6, %cst_6 [1] : vector<32x64xf32> to vector<32xf32>
    %8 = vector.shape_cast %7 : vector<32xf32> to vector<32x1xf32>
    %cst_7 = arith.constant 6.400000e+01 : f32
    %9 = vector.broadcast %cst_7 : f32 to vector<32x1xf32>
    %10 = arith.divf %8, %9 : vector<32x1xf32>
    %11 = vector.broadcast %10 : vector<32x1xf32> to vector<32x64xf32>
    %12 = arith.subf %6, %11 : vector<32x64xf32>
    %13 = arith.mulf %12, %12 : vector<32x64xf32>
    %cst_8 = arith.constant dense<0.000000e+00> : vector<32xf32>
    %14 = vector.multi_reduction <add>, %13, %cst_8 [1] : vector<32x64xf32> to vector<32xf32>
    %15 = vector.shape_cast %14 : vector<32xf32> to vector<32x1xf32>
    %cst_9 = arith.constant 6.400000e+01 : f32
    %16 = vector.broadcast %cst_9 : f32 to vector<32x1xf32>
    %17 = arith.divf %15, %16 : vector<32x1xf32>
    %18 = vector.broadcast %10 : vector<32x1xf32> to vector<32x64xf32>
    %19 = arith.subf %6, %18 : vector<32x64xf32>
    %cst_10 = arith.constant 9.99999974E-6 : f32
    %20 = vector.broadcast %cst_10 : f32 to vector<32x1xf32>
    %21 = arith.addf %17, %20 : vector<32x1xf32>
    %22 = math.rsqrt %21 : vector<32x1xf32>
    %23 = vector.broadcast %22 : vector<32x1xf32> to vector<32x64xf32>
    %24 = arith.mulf %19, %23 : vector<32x64xf32>
    %cst_11 = arith.constant 0.000000e+00 : f32
    %25 = vector.broadcast %cst_11 : f32 to vector<32x64xf32>
    %26 = arith.cmpf oge, %24, %25 : vector<32x64xf32>
    %cst_12 = arith.constant 2.000000e-01 : f32
    %27 = vector.broadcast %cst_12 : f32 to vector<32x64xf32>
    %28 = arith.mulf %27, %24 : vector<32x64xf32>
    %29 = arith.select %26, %24, %28 : vector<32x64xi1>, vector<32x64xf32>
    %30 = arith.truncf %29 : vector<32x64xf32> to vector<32x64xbf16>
    %c0_13 = arith.constant 0 : index
    %c0_14 = arith.constant 0 : index
    %c0_15 = arith.constant 0 : index
    %31 = vector.load %arg4[%c0_13, %c0_14, %c0_15] : memref<1x32x64xbf16, #tpu.memory_space<vmem>>, vector<1x32x64xbf16>
    %32 = vector.shape_cast %31 : vector<1x32x64xbf16> to vector<32x64xbf16>
    %33 = vector.shape_cast %30 : vector<32x64xbf16> to vector<1x32x64xbf16>
    tpu.vector_store %arg4[%c0_13, %c0_14, %c0_15], %33 {strides = array<i32>} : memref<1x32x64xbf16, #tpu.memory_space<vmem>>, vector<1x32x64xbf16>,
    return
  }
  func.func @transform_0(%arg0: i32) -> (i32, i32, i32) {
    %c0_i32 = arith.constant 0 : i32
    %c0_i32_0 = arith.constant 0 : i32
    %c0_i32_1 = arith.constant 0 : i32
    return %arg0, %c0_i32, %c0_i32_0 : i32, i32, i32
  }
  func.func @transform_1(%arg0: i32) -> (i32, i32) {
    %c0_i32 = arith.constant 0 : i32
    %c0_i32_0 = arith.constant 0 : i32
    %c0_i32_1 = arith.constant 0 : i32
    return %c0_i32, %c0_i32_0 : i32, i32
  }
  func.func @transform_2(%arg0: i32) -> (i32, i32) {
    %c0_i32 = arith.constant 0 : i32
    %c0_i32_0 = arith.constant 0 : i32
    %c0_i32_1 = arith.constant 0 : i32
    return %c0_i32, %c0_i32_0 : i32, i32
  }
  func.func @transform_3(%arg0: i32) -> (i32, i32, i32) {
    %c0_i32 = arith.constant 0 : i32
    %c0_i32_0 = arith.constant 0 : i32
    %c0_i32_1 = arith.constant 0 : i32
    return %arg0, %c0_i32, %c0_i32_0 : i32, i32, i32
  }
}

module attributes {stable_mosaic.version = 11 : i64} {
  func.func @_conv_fused_kernel(%arg0: i32, %arg1: memref<1x512x16xbf16, #tpu.memory_space<vmem>>, %arg2: memref<32x512xbf16, #tpu.memory_space<vmem>>, %arg3: memref<32x1xf32, #tpu.memory_space<vmem>>, %arg4: memref<1x32x16xbf16, #tpu.memory_space<vmem>>) attributes {dimension_semantics = [#tpu.dimension_semantics<parallel>], iteration_bounds = array<i64: 2>, scalar_prefetch = 0 : i64, scratch_operands = 0 : i64, tpu.core_type = #tpu.core_type<tc>, window_params = [{transform_indices = @transform_0, window_bounds = array<i64: 1, 512, 16>}, {pipeline_mode = #tpu.pipeline_mode<synchronous>, transform_indices = @transform_1, window_bounds = array<i64: 32, 512>}, {pipeline_mode = #tpu.pipeline_mode<synchronous>, transform_indices = @transform_2, window_bounds = array<i64: 32, 1>}, {transform_indices = @transform_3, window_bounds = array<i64: 1, 32, 16>}]} {
    %c0 = arith.constant 0 : index
    %c0_0 = arith.constant 0 : index
    %0 = vector.load %arg2[%c0, %c0_0] : memref<32x512xbf16, #tpu.memory_space<vmem>>, vector<32x512xbf16>
    %c0_1 = arith.constant 0 : index
    %c0_2 = arith.constant 0 : index
    %c0_3 = arith.constant 0 : index
    %1 = vector.load %arg1[%c0_1, %c0_2, %c0_3] : memref<1x512x16xbf16, #tpu.memory_space<vmem>>, vector<1x512x16xbf16>
    %2 = vector.shape_cast %1 : vector<1x512x16xbf16> to vector<512x16xbf16>
    %cst = arith.constant dense<0.000000e+00> : vector<32x16xf32>
    %3 = tpu.matmul %0, %2, %cst {dimension_numbers = #tpu.dot_dimension_numbers<[1], [0], [0], [1], [0, 0, 1, 1], [], []>} : vector<32x512xbf16>, vector<512x16xbf16>, vector<32x16xf32> -> vector<32x16xf32>
    %c0_4 = arith.constant 0 : index
    %c0_5 = arith.constant 0 : index
    %4 = vector.load %arg3[%c0_4, %c0_5] : memref<32x1xf32, #tpu.memory_space<vmem>>, vector<32x1xf32>
    %5 = vector.broadcast %4 : vector<32x1xf32> to vector<32x16xf32>
    %6 = arith.addf %3, %5 : vector<32x16xf32>
    %cst_6 = arith.constant dense<0.000000e+00> : vector<32xf32>
    %7 = vector.multi_reduction <add>, %6, %cst_6 [1] : vector<32x16xf32> to vector<32xf32>
    %8 = vector.shape_cast %7 : vector<32xf32> to vector<32x1xf32>
    %cst_7 = arith.constant 1.600000e+01 : f32
    %9 = vector.broadcast %cst_7 : f32 to vector<32x1xf32>
    %10 = arith.divf %8, %9 : vector<32x1xf32>
    %11 = vector.broadcast %10 : vector<32x1xf32> to vector<32x16xf32>
    %12 = arith.subf %6, %11 : vector<32x16xf32>
    %13 = arith.mulf %12, %12 : vector<32x16xf32>
    %cst_8 = arith.constant dense<0.000000e+00> : vector<32xf32>
    %14 = vector.multi_reduction <add>, %13, %cst_8 [1] : vector<32x16xf32> to vector<32xf32>
    %15 = vector.shape_cast %14 : vector<32xf32> to vector<32x1xf32>
    %cst_9 = arith.constant 1.600000e+01 : f32
    %16 = vector.broadcast %cst_9 : f32 to vector<32x1xf32>
    %17 = arith.divf %15, %16 : vector<32x1xf32>
    %18 = vector.broadcast %10 : vector<32x1xf32> to vector<32x16xf32>
    %19 = arith.subf %6, %18 : vector<32x16xf32>
    %cst_10 = arith.constant 9.99999974E-6 : f32
    %20 = vector.broadcast %cst_10 : f32 to vector<32x1xf32>
    %21 = arith.addf %17, %20 : vector<32x1xf32>
    %22 = math.rsqrt %21 : vector<32x1xf32>
    %23 = vector.broadcast %22 : vector<32x1xf32> to vector<32x16xf32>
    %24 = arith.mulf %19, %23 : vector<32x16xf32>
    %cst_11 = arith.constant 0.000000e+00 : f32
    %25 = vector.broadcast %cst_11 : f32 to vector<32x16xf32>
    %26 = arith.cmpf oge, %24, %25 : vector<32x16xf32>
    %cst_12 = arith.constant 2.000000e-01 : f32
    %27 = vector.broadcast %cst_12 : f32 to vector<32x16xf32>
    %28 = arith.mulf %27, %24 : vector<32x16xf32>
    %29 = arith.select %26, %24, %28 : vector<32x16xi1>, vector<32x16xf32>
    %30 = arith.truncf %29 : vector<32x16xf32> to vector<32x16xbf16>
    %c0_13 = arith.constant 0 : index
    %c0_14 = arith.constant 0 : index
    %c0_15 = arith.constant 0 : index
    %31 = vector.load %arg4[%c0_13, %c0_14, %c0_15] : memref<1x32x16xbf16, #tpu.memory_space<vmem>>, vector<1x32x16xbf16>
    %32 = vector.shape_cast %31 : vector<1x32x16xbf16> to vector<32x16xbf16>
    %33 = vector.shape_cast %30 : vector<32x16xbf16> to vector<1x32x16xbf16>
    tpu.vector_store %arg4[%c0_13, %c0_14, %c0_15], %33 {strides = array<i32>} : memref<1x32x16xbf16, #tpu.memory_space<vmem>>, vector<1x32x16xbf16>,
    return
  }
  func.func @transform_0(%arg0: i32) -> (i32, i32, i32) {
    %c0_i32 = arith.constant 0 : i32
    %c0_i32_0 = arith.constant 0 : i32
    %c0_i32_1 = arith.constant 0 : i32
    return %arg0, %c0_i32, %c0_i32_0 : i32, i32, i32
  }
  func.func @transform_1(%arg0: i32) -> (i32, i32) {
    %c0_i32 = arith.constant 0 : i32
    %c0_i32_0 = arith.constant 0 : i32
    %c0_i32_1 = arith.constant 0 : i32
    return %c0_i32, %c0_i32_0 : i32, i32
  }
  func.func @transform_2(%arg0: i32) -> (i32, i32) {
    %c0_i32 = arith.constant 0 : i32
    %c0_i32_0 = arith.constant 0 : i32
    %c0_i32_1 = arith.constant 0 : i32
    return %c0_i32, %c0_i32_0 : i32, i32
  }
  func.func @transform_3(%arg0: i32) -> (i32, i32, i32) {
    %c0_i32 = arith.constant 0 : i32
    %c0_i32_0 = arith.constant 0 : i32
    %c0_i32_1 = arith.constant 0 : i32
    return %arg0, %c0_i32, %c0_i32_0 : i32, i32, i32
  }
}

module attributes {stable_mosaic.version = 11 : i64} {
  func.func @_conv_fused_kernel(%arg0: i32, %arg1: memref<1x512x4xbf16, #tpu.memory_space<vmem>>, %arg2: memref<1x512xbf16, #tpu.memory_space<vmem>>, %arg3: memref<1x1xf32, #tpu.memory_space<vmem>>, %arg4: memref<1x1x4xf32, #tpu.memory_space<vmem>>) attributes {dimension_semantics = [#tpu.dimension_semantics<parallel>], iteration_bounds = array<i64: 2>, scalar_prefetch = 0 : i64, scratch_operands = 0 : i64, tpu.core_type = #tpu.core_type<tc>, window_params = [{transform_indices = @transform_0, window_bounds = array<i64: 1, 512, 4>}, {pipeline_mode = #tpu.pipeline_mode<synchronous>, transform_indices = @transform_1, window_bounds = array<i64: 1, 512>}, {pipeline_mode = #tpu.pipeline_mode<synchronous>, transform_indices = @transform_2, window_bounds = array<i64: 1, 1>}, {transform_indices = @transform_3, window_bounds = array<i64: 1, 1, 4>}]} {
    %c0 = arith.constant 0 : index
    %c0_0 = arith.constant 0 : index
    %0 = vector.load %arg2[%c0, %c0_0] : memref<1x512xbf16, #tpu.memory_space<vmem>>, vector<1x512xbf16>
    %c0_1 = arith.constant 0 : index
    %c0_2 = arith.constant 0 : index
    %c0_3 = arith.constant 0 : index
    %1 = vector.load %arg1[%c0_1, %c0_2, %c0_3] : memref<1x512x4xbf16, #tpu.memory_space<vmem>>, vector<1x512x4xbf16>
    %2 = vector.shape_cast %1 : vector<1x512x4xbf16> to vector<512x4xbf16>
    %cst = arith.constant dense<0.000000e+00> : vector<1x4xf32>
    %3 = tpu.matmul %0, %2, %cst {dimension_numbers = #tpu.dot_dimension_numbers<[1], [0], [0], [1], [0, 0, 1, 1], [], []>} : vector<1x512xbf16>, vector<512x4xbf16>, vector<1x4xf32> -> vector<1x4xf32>
    %c0_4 = arith.constant 0 : index
    %c0_5 = arith.constant 0 : index
    %4 = vector.load %arg3[%c0_4, %c0_5] : memref<1x1xf32, #tpu.memory_space<vmem>>, vector<1x1xf32>
    %5 = vector.broadcast %4 : vector<1x1xf32> to vector<1x4xf32>
    %6 = arith.addf %3, %5 : vector<1x4xf32>
    %c0_6 = arith.constant 0 : index
    %c0_7 = arith.constant 0 : index
    %c0_8 = arith.constant 0 : index
    %7 = vector.load %arg4[%c0_6, %c0_7, %c0_8] : memref<1x1x4xf32, #tpu.memory_space<vmem>>, vector<1x1x4xf32>
    %8 = vector.shape_cast %7 : vector<1x1x4xf32> to vector<1x4xf32>
    %9 = vector.shape_cast %6 : vector<1x4xf32> to vector<1x1x4xf32>
    tpu.vector_store %arg4[%c0_6, %c0_7, %c0_8], %9 {strides = array<i32>} : memref<1x1x4xf32, #tpu.memory_space<vmem>>, vector<1x1x4xf32>,
    return
  }
  func.func @transform_0(%arg0: i32) -> (i32, i32, i32) {
    %c0_i32 = arith.constant 0 : i32
    %c0_i32_0 = arith.constant 0 : i32
    %c0_i32_1 = arith.constant 0 : i32
    return %arg0, %c0_i32, %c0_i32_0 : i32, i32, i32
  }
  func.func @transform_1(%arg0: i32) -> (i32, i32) {
    %c0_i32 = arith.constant 0 : i32
    %c0_i32_0 = arith.constant 0 : i32
    %c0_i32_1 = arith.constant 0 : i32
    return %c0_i32, %c0_i32_0 : i32, i32
  }
  func.func @transform_2(%arg0: i32) -> (i32, i32) {
    %c0_i32 = arith.constant 0 : i32
    %c0_i32_0 = arith.constant 0 : i32
    %c0_i32_1 = arith.constant 0 : i32
    return %c0_i32, %c0_i32_0 : i32, i32
  }
  func.func @transform_3(%arg0: i32) -> (i32, i32, i32) {
    %c0_i32 = arith.constant 0 : i32
    %c0_i32_0 = arith.constant 0 : i32
    %c0_i32_1 = arith.constant 0 : i32
    return %arg0, %c0_i32, %c0_i32_0 : i32, i32, i32
  }
}

</mosaic_0001>

<bundles_post_ra>
// kernel: patch_discriminator.6
= control target key start
LH: loop header
LB: loop body
LE: loop exit
PB: predicated region body
PF: predicated region fallthrough
CT: control target
= control target key end

     0   :  { %s4808_s12 = smov 0   ;;  %s5455_s0 = inlined_call_operand.vmem [shape: bf16[2,256,4096], index: 0, kind: input, shape index: {}]   ;;  %s5456_s1 = inlined_call_operand.vmem [shape: bf16[8,256], index: 1, kind: input, shape index: {}]   ;;  %s5457_s2 = inlined_call_operand.vmem [shape: f32[8,1], index: 2, kind: input, shape index: {}]   ;;  %s5458_s3 = inlined_call_operand.vmem [shape: bf16[2,8,4096], index: 3, kind: output, shape index: {}]  }
   0x1 LB: > { %s4208_s13 = sadd.s32 4294967295, %s4785_s12   ;;  %p4212_p0 = scmp.ge.s32.totalorder %s4785_s12, 1  ;;  %s4785_s12 = sphi %s4808_s12, %s13_s12  }
   0x2   : > { %p137_p1 = scmp.lt.s32.totalorder %s4785_s12, 3 }
   0x4   : > { %p138_p2 = pnand %p4212_p0, %p137_p1 }
   0x5   : > { %p161_p3 = scmp.lt.s32.totalorder (!%p138_p2), %s4208_s13, 1 }
   0x6   : > { %141 = sbr.rel (%p138_p2) target bundleno = 734 (0x2de), region = 32 }
   0xb   : > { %v4819_v0 = vld [vmem:[%s5456_s1] sm:$0xff]  ;;  %s5460_s13 = smov (!%p161_p3, %s4208_s13), 1  ;;  %v4787_v28 = vmov 0  }
   0xc   : > { %v4823_v1 = vcombine.high %v4819_v0, %v4819_v0  ;;  %s4749_s16 = sshll.u32 %s5460_s13, 12  ;;  %4776 = vset.pattern.permute.xlu0 %v4787_v28  ;;  %s4750_s22 = sshll.u32 %s5460_s13, 7 }
   0xd   : > { %s4833_s19 = scalar_lea.vmem %s5455_s0, %s4749_s16  ;;  %s5141_s25 = scalar_lea.vmem %s5458_s3, %s4750_s22 }
   0xe   : > { %3289 = vmatprep.mubr.bf16.mxu0 %v4823_v1  ;;  %3330 = vmatprep.mubr.bf16.mxu1 %v4823_v1  ;;  %v396_v2 = vld [vmem:[%s4833_s19 + $0x700] sm:$0xff]  ;;  %v397_v4 = vld [vmem:[%s4833_s19 + $0x708] sm:$0xff] }
   0xf   : > { %v412_v3 = vld [vmem:[%s4833_s19 + $0x780] sm:$0xff]  ;;  %v413_v6 = vld [vmem:[%s4833_s19 + $0x788] sm:$0xff] }
  0x10   : > { %v4444_v5 = vcombine.high %v396_v2, %v412_v3  ;;  %v4443_v7 = vcombine.low %v396_v2, %v412_v3  ;;  %v364_v8 = vld [vmem:[%s4833_s19 + $0x600] sm:$0xff]  ;;  %v4446_v10 = vcombine.high %v397_v4, %v413_v6  ;;  %v4445_v11 = vcombine.low %v397_v4, %v413_v6  ;;  %v365_v13 = vld [vmem:[%s4833_s19 + $0x608] sm:$0xff] }
  0x11   : > { %v380_v9 = vld [vmem:[%s4833_s19 + $0x680] sm:$0xff]  ;;  %v381_v14 = vld [vmem:[%s4833_s19 + $0x688] sm:$0xff] }
  0x12   : > { %v4412_v12 = vcombine.high %v364_v8, %v380_v9  ;;  %v332_v15 = vld [vmem:[%s4833_s19 + $0x500] sm:$0xff]  ;;  %3257 = vmatprep.subr.bf16.mxu0 %v4444_v5  ;;  %v4414_v16 = vcombine.high %v365_v13, %v381_v14  ;;  %v333_v18 = vld [vmem:[%s4833_s19 + $0x508] sm:$0xff]  ;;  %3298 = vmatprep.subr.bf16.mxu1 %v4446_v10  ;;  %v4411_v20 = vcombine.low %v364_v8, %v380_v9 }
  0x13   : > { %v348_v17 = vld [vmem:[%s4833_s19 + $0x580] sm:$0xff]  ;;  %v349_v19 = vld [vmem:[%s4833_s19 + $0x588] sm:$0xff]  ;;  %3258 = vmatpush1.bf16.msra.mxu0 %v4443_v7  ;;  %3299 = vmatpush1.bf16.msra.mxu1 %v4445_v11  ;;  %v4413_v21 = vcombine.low %v365_v13, %v381_v14 }
  0x14   : > { %3259 = vmatprep.subr.bf16.mxu0 %v4412_v12  ;;  %v4380_v22 = vcombine.high %v332_v15, %v348_v17  ;;  %3300 = vmatprep.subr.bf16.mxu1 %v4414_v16  ;;  %v4382_v23 = vcombine.high %v333_v18, %v349_v19  ;;  %v300_v24 = vld [vmem:[%s4833_s19 + $0x400] sm:$0xff]  ;;  %v301_v26 = vld [vmem:[%s4833_s19 + $0x408] sm:$0xff]  ;;  %v4379_v29 = vcombine.low %v332_v15, %v348_v17 }
  0x15   : > { %v316_v25 = vld [vmem:[%s4833_s19 + $0x480] sm:$0xff]  ;;  %v317_v27 = vld [vmem:[%s4833_s19 + $0x488] sm:$0xff]  ;;  %v4381_v30 = vcombine.low %v333_v18, %v349_v19 }
  0x16   : > { %v4348_v31 = vcombine.high %v300_v24, %v316_v25  ;;  %v4350_v32 = vcombine.high %v301_v26, %v317_v27  ;;  %v268_v33 = vld [vmem:[%s4833_s19 + $0x300] sm:$0xff]  ;;  %v269_v35 = vld [vmem:[%s4833_s19 + $0x308] sm:$0xff]  ;;  %v4347_v37 = vcombine.low %v300_v24, %v316_v25  ;;  %v4349_v38 = vcombine.low %v301_v26, %v317_v27 }
  0x17   : > { %3260 = vmatpush1.bf16.msra.mxu0 %v4411_v20  ;;  %3301 = vmatpush1.bf16.msra.mxu1 %v4413_v21  ;;  %v284_v34 = vld [vmem:[%s4833_s19 + $0x380] sm:$0xff]  ;;  %v285_v36 = vld [vmem:[%s4833_s19 + $0x388] sm:$0xff] }
  0x18   : > { %3261 = vmatprep.subr.bf16.mxu0 %v4380_v22  ;;  %3302 = vmatprep.subr.bf16.mxu1 %v4382_v23  ;;  %v4316_v39 = vcombine.high %v268_v33, %v284_v34  ;;  %v4318_v40 = vcombine.high %v269_v35, %v285_v36  ;;  %v236_v41 = vld [vmem:[%s4833_s19 + $0x200] sm:$0xff]  ;;  %v237_v43 = vld [vmem:[%s4833_s19 + $0x208] sm:$0xff]  ;;  %v4315_v45 = vcombine.low %v268_v33, %v284_v34 }
  0x19   : > { %v252_v42 = vld [vmem:[%s4833_s19 + $0x280] sm:$0xff]  ;;  %v253_v44 = vld [vmem:[%s4833_s19 + $0x288] sm:$0xff]  ;;  %v4317_v46 = vcombine.low %v269_v35, %v285_v36 }
  0x1a   : > { %v4284_v47 = vcombine.high %v236_v41, %v252_v42  ;;  %v4286_v48 = vcombine.high %v237_v43, %v253_v44  ;;  %v204_v49 = vld [vmem:[%s4833_s19 + $0x100] sm:$0xff]  ;;  %v205_v51 = vld [vmem:[%s4833_s19 + $0x108] sm:$0xff]  ;;  %v4283_v53 = vcombine.low %v236_v41, %v252_v42  ;;  %v4285_v54 = vcombine.low %v237_v43, %v253_v44 }
  0x1b   : > { %3262 = vmatpush1.bf16.msra.mxu0 %v4379_v29  ;;  %3303 = vmatpush1.bf16.msra.mxu1 %v4381_v30  ;;  %v220_v50 = vld [vmem:[%s4833_s19 + $0x180] sm:$0xff]  ;;  %v221_v52 = vld [vmem:[%s4833_s19 + $0x188] sm:$0xff] }
  0x1c   : > { %3263 = vmatprep.subr.bf16.mxu0 %v4348_v31  ;;  %3304 = vmatprep.subr.bf16.mxu1 %v4350_v32  ;;  %v4252_v55 = vcombine.high %v204_v49, %v220_v50  ;;  %v4254_v56 = vcombine.high %v205_v51, %v221_v52  ;;  %v172_v57 = vld [vmem:[%s4833_s19] sm:$0xff]  ;;  %v173_v59 = vld [vmem:[%s4833_s19 + $0x8] sm:$0xff]  ;;  %v4251_v61 = vcombine.low %v204_v49, %v220_v50 }
  0x1d   : > { %v188_v58 = vld [vmem:[%s4833_s19 + $0x80] sm:$0xff]  ;;  %v189_v60 = vld [vmem:[%s4833_s19 + $0x88] sm:$0xff]  ;;  %v4253_v62 = vcombine.low %v205_v51, %v221_v52 }
  0x1e   : > { %v4220_v63 = vcombine.high %v172_v57, %v188_v58  ;;  %v4222_v2 = vcombine.high %v173_v59, %v189_v60  ;;  %v652_v3 = vld [vmem:[%s4833_s19 + $0xf00] sm:$0xff]  ;;  %v653_v5 = vld [vmem:[%s4833_s19 + $0xf08] sm:$0xff]  ;;  %v4219_v7 = vcombine.low %v172_v57, %v188_v58  ;;  %v4221_v8 = vcombine.low %v173_v59, %v189_v60 }
  0x1f   : > { %3264 = vmatpush1.bf16.msra.mxu0 %v4347_v37  ;;  %3305 = vmatpush1.bf16.msra.mxu1 %v4349_v38  ;;  %v668_v4 = vld [vmem:[%s4833_s19 + $0xf80] sm:$0xff]  ;;  %v669_v6 = vld [vmem:[%s4833_s19 + $0xf88] sm:$0xff] }
  0x20   : > { %3265 = vmatprep.subr.bf16.mxu0 %v4316_v39  ;;  %3306 = vmatprep.subr.bf16.mxu1 %v4318_v40  ;;  %v4700_v9 = vcombine.high %v652_v3, %v668_v4  ;;  %v4702_v10 = vcombine.high %v653_v5, %v669_v6  ;;  %v620_v11 = vld [vmem:[%s4833_s19 + $0xe00] sm:$0xff]  ;;  %v621_v13 = vld [vmem:[%s4833_s19 + $0xe08] sm:$0xff]  ;;  %v4699_v15 = vcombine.low %v652_v3, %v668_v4 }
  0x21   : > { %v636_v12 = vld [vmem:[%s4833_s19 + $0xe80] sm:$0xff]  ;;  %v637_v14 = vld [vmem:[%s4833_s19 + $0xe88] sm:$0xff]  ;;  %v4701_v16 = vcombine.low %v653_v5, %v669_v6  ;;  %v398_v6 = vld [vmem:[%s4833_s19 + $0x710] sm:$0xff] }
  0x22   : > { %v4668_v17 = vcombine.high %v620_v11, %v636_v12  ;;  %v4670_v18 = vcombine.high %v621_v13, %v637_v14  ;;  %v588_v19 = vld [vmem:[%s4833_s19 + $0xd00] sm:$0xff]  ;;  %v589_v21 = vld [vmem:[%s4833_s19 + $0xd08] sm:$0xff]  ;;  %v4667_v23 = vcombine.low %v620_v11, %v636_v12  ;;  %v4669_v24 = vcombine.low %v621_v13, %v637_v14  ;;  %v366_v14 = vld [vmem:[%s4833_s19 + $0x610] sm:$0xff] }
  0x23   : > { %3266 = vmatpush1.bf16.msra.mxu0 %v4315_v45  ;;  %3307 = vmatpush1.bf16.msra.mxu1 %v4317_v46  ;;  %v604_v20 = vld [vmem:[%s4833_s19 + $0xd80] sm:$0xff]  ;;  %v605_v22 = vld [vmem:[%s4833_s19 + $0xd88] sm:$0xff] }
  0x24   : > { %3267 = vmatprep.subr.bf16.mxu0 %v4284_v47  ;;  %3308 = vmatprep.subr.bf16.mxu1 %v4286_v48  ;;  %v4636_v25 = vcombine.high %v588_v19, %v604_v20  ;;  %v4638_v26 = vcombine.high %v589_v21, %v605_v22  ;;  %v556_v27 = vld [vmem:[%s4833_s19 + $0xc00] sm:$0xff]  ;;  %v557_v29 = vld [vmem:[%s4833_s19 + $0xc08] sm:$0xff]  ;;  %v4635_v31 = vcombine.low %v588_v19, %v604_v20 }
  0x25   : > { %v572_v28 = vld [vmem:[%s4833_s19 + $0xc80] sm:$0xff]  ;;  %v573_v30 = vld [vmem:[%s4833_s19 + $0xc88] sm:$0xff]  ;;  %v4637_v32 = vcombine.low %v589_v21, %v605_v22 }
  0x26   : > { %v4604_v33 = vcombine.high %v556_v27, %v572_v28  ;;  %v4606_v34 = vcombine.high %v557_v29, %v573_v30  ;;  %v524_v35 = vld [vmem:[%s4833_s19 + $0xb00] sm:$0xff]  ;;  %v525_v37 = vld [vmem:[%s4833_s19 + $0xb08] sm:$0xff]  ;;  %v4603_v39 = vcombine.low %v556_v27, %v572_v28  ;;  %v4605_v40 = vcombine.low %v557_v29, %v573_v30  ;;  %v302_v30 = vld [vmem:[%s4833_s19 + $0x410] sm:$0xff] }
  0x27   : > { %3268 = vmatpush1.bf16.msra.mxu0 %v4283_v53  ;;  %3309 = vmatpush1.bf16.msra.mxu1 %v4285_v54  ;;  %v540_v36 = vld [vmem:[%s4833_s19 + $0xb80] sm:$0xff]  ;;  %v541_v38 = vld [vmem:[%s4833_s19 + $0xb88] sm:$0xff] }
  0x28   : > { %3269 = vmatprep.subr.bf16.mxu0 %v4252_v55  ;;  %3310 = vmatprep.subr.bf16.mxu1 %v4254_v56  ;;  %v4572_v41 = vcombine.high %v524_v35, %v540_v36  ;;  %v684_v42 = vld [vmem:[%s5457_s2] sm:$0xff]  ;;  %v4574_v43 = vcombine.high %v525_v37, %v541_v38  ;;  %v493_v46 = vld [vmem:[%s4833_s19 + $0xa08] sm:$0xff]  ;;  %v4571_v48 = vcombine.low %v524_v35, %v540_v36 }
  0x29   : > { %v492_v44 = vld [vmem:[%s4833_s19 + $0xa00] sm:$0xff]  ;;  %687 = vperm.xlu0 %4776, %v684_v42   ;;  %v509_v47 = vld [vmem:[%s4833_s19 + $0xa88] sm:$0xff]  ;;  %v4573_v49 = vcombine.low %v525_v37, %v541_v38  ;;  %v270_v38 = vld [vmem:[%s4833_s19 + $0x310] sm:$0xff] }
  0x2a   : > { %v508_v45 = vld [vmem:[%s4833_s19 + $0xa80] sm:$0xff]  ;;  %v4542_v51 = vcombine.high %v493_v46, %v509_v47  ;;  %v461_v54 = vld [vmem:[%s4833_s19 + $0x908] sm:$0xff]  ;;  %v4541_v57 = vcombine.low %v493_v46, %v509_v47  ;;  %v238_v46 = vld [vmem:[%s4833_s19 + $0x210] sm:$0xff] }
  0x2b   : > { %3270 = vmatpush1.bf16.msra.mxu0 %v4251_v61  ;;  %3311 = vmatpush1.bf16.msra.mxu1 %v4253_v62  ;;  %v4540_v50 = vcombine.high %v492_v44, %v508_v45  ;;  %v460_v52 = vld [vmem:[%s4833_s19 + $0x900] sm:$0xff]  ;;  %v477_v55 = vld [vmem:[%s4833_s19 + $0x988] sm:$0xff]  ;;  %v4539_v56 = vcombine.low %v492_v44, %v508_v45  ;;  %v254_v47 = vld [vmem:[%s4833_s19 + $0x290] sm:$0xff] }
  0x2c   : > { %3271 = vmatprep.subr.bf16.mxu0 %v4220_v63  ;;  %3312 = vmatprep.subr.bf16.mxu1 %v4222_v2  ;;  %v476_v53 = vld [vmem:[%s4833_s19 + $0x980] sm:$0xff]  ;;  %v4510_v59 = vcombine.high %v461_v54, %v477_v55  ;;  %v429_v62 = vld [vmem:[%s4833_s19 + $0x808] sm:$0xff]  ;;  %v4509_v3 = vcombine.low %v461_v54, %v477_v55  ;;  %v206_v54 = vld [vmem:[%s4833_s19 + $0x110] sm:$0xff] }
  0x2d   : > { %v4508_v58 = vcombine.high %v460_v52, %v476_v53  ;;  %v428_v60 = vld [vmem:[%s4833_s19 + $0x800] sm:$0xff]  ;;  %v445_v63 = vld [vmem:[%s4833_s19 + $0x888] sm:$0xff]  ;;  %v4507_v2 = vcombine.low %v460_v52, %v476_v53  ;;  %v4288_v52 = vcombine.high %v238_v46, %v254_v47  ;;  %v222_v55 = vld [vmem:[%s4833_s19 + $0x190] sm:$0xff] }
  0x2e   : > { %v444_v61 = vld [vmem:[%s4833_s19 + $0x880] sm:$0xff]  ;;  %v4478_v5 = vcombine.high %v429_v62, %v445_v63  ;;  %v4477_v11 = vcombine.low %v429_v62, %v445_v63  ;;  %v174_v62 = vld [vmem:[%s4833_s19 + $0x10] sm:$0xff] }
  0x2f   : > { %3272 = vmatpush1.bf16.msra.mxu0 %v4219_v7  ;;  %3313 = vmatpush1.bf16.msra.mxu1 %v4221_v8  ;;  %v4476_v4 = vcombine.high %v428_v60, %v444_v61  ;;  %v414_v7 = vld [vmem:[%s4833_s19 + $0x790] sm:$0xff]  ;;  %v399_v8 = vld [vmem:[%s4833_s19 + $0x718] sm:$0xff] }
  0x30   : > { %3273 = vmatprep.subr.bf16.mxu0 %v4700_v9  ;;  %3314 = vmatprep.subr.bf16.mxu1 %v4702_v10  ;;  %v415_v9 = vld [vmem:[%s4833_s19 + $0x798] sm:$0xff]  ;;  %v4475_v10 = vcombine.low %v428_v60, %v444_v61  ;;  %v4448_v12 = vcombine.high %v398_v6, %v414_v7  ;;  %v4447_v19 = vcombine.low %v398_v6, %v414_v7  ;;  %v190_v63 = vld [vmem:[%s4833_s19 + $0x90] sm:$0xff] }
  0x31   : > { %v4450_v13 = vcombine.high %v399_v8, %v415_v9  ;;  %v4449_v20 = vcombine.low %v399_v8, %v415_v9  ;;  %v4256_v60 = vcombine.high %v206_v54, %v222_v55  ;;  %v4224_v6 = vcombine.high %v174_v62, %v190_v63  ;;  %v654_v8 = vld [vmem:[%s4833_s19 + $0xf10] sm:$0xff] }
  0x32   : > { %v670_v9 = vld [vmem:[%s4833_s19 + $0xf90] sm:$0xff] }
  0x33   : > { %3274 = vmatpush2.bf16.msra.mxu0 %v4699_v15  ;;  %3315 = vmatpush2.bf16.msra.mxu1 %v4701_v16  ;;  %v382_v15 = vld [vmem:[%s4833_s19 + $0x690] sm:$0xff]  ;;  %v4910_v16 = vcombine.low %v4819_v0, %v4819_v0  ;;  %v335_v0 = vld [vmem:[%s4833_s19 + $0x518] sm:$0xff] }
  0x34   : > { %3275 = vmatprep.subr.bf16.mxu0 %v4668_v17  ;;  %3316 = vmatprep.subr.bf16.mxu1 %v4670_v18  ;;  %v367_v17 = vld [vmem:[%s4833_s19 + $0x618] sm:$0xff]  ;;  %v4416_v21 = vcombine.high %v366_v14, %v382_v15 }
  0x35   : > { %v383_v18 = vld [vmem:[%s4833_s19 + $0x698] sm:$0xff] }
  0x36   : > { %v4418_v22 = vcombine.high %v367_v17, %v383_v18  ;;  %v4417_v27 = vcombine.low %v367_v17, %v383_v18  ;;  %v622_v17 = vld [vmem:[%s4833_s19 + $0xe10] sm:$0xff] }
  0x37   : > { %3276 = vmatpush2.bf16.msra.mxu0 %v4667_v23  ;;  %3317 = vmatpush2.bf16.msra.mxu1 %v4669_v24  ;;  %v334_v23 = vld [vmem:[%s4833_s19 + $0x510] sm:$0xff] }
  0x38   : > { %3277 = vmatprep.subr.bf16.mxu0 %v4636_v25  ;;  %3318 = vmatprep.subr.bf16.mxu1 %v4638_v26  ;;  %v350_v24 = vld [vmem:[%s4833_s19 + $0x590] sm:$0xff]  ;;  %v351_v25 = vld [vmem:[%s4833_s19 + $0x598] sm:$0xff]  ;;  %v4415_v26 = vcombine.low %v366_v14, %v382_v15  ;;  %v4704_v14 = vcombine.high %v654_v8, %v670_v9 }
  0x39   : > { %v4384_v28 = vcombine.high %v334_v23, %v350_v24  ;;  %v4386_v29 = vcombine.high %v335_v0, %v351_v25  ;;  %v4385_v35 = vcombine.low %v335_v0, %v351_v25  ;;  %v638_v18 = vld [vmem:[%s4833_s19 + $0xe90] sm:$0xff] }
  0x3a   : > { %v590_v0 = vld [vmem:[%s4833_s19 + $0xd10] sm:$0xff] }
  0x3b   : > { %3278 = vmatpush2.bf16.msra.mxu0 %v4635_v31  ;;  %3319 = vmatpush2.bf16.msra.mxu1 %v4637_v32  ;;  %v318_v31 = vld [vmem:[%s4833_s19 + $0x490] sm:$0xff]  ;;  %v303_v32 = vld [vmem:[%s4833_s19 + $0x418] sm:$0xff] }
  0x3c   : > { %3279 = vmatprep.subr.bf16.mxu0 %v4604_v33  ;;  %3320 = vmatprep.subr.bf16.mxu1 %v4606_v34  ;;  %v319_v33 = vld [vmem:[%s4833_s19 + $0x498] sm:$0xff]  ;;  %v4383_v34 = vcombine.low %v334_v23, %v350_v24  ;;  %v4352_v36 = vcombine.high %v302_v30, %v318_v31  ;;  %v4351_v42 = vcombine.low %v302_v30, %v318_v31  ;;  %v606_v25 = vld [vmem:[%s4833_s19 + $0xd90] sm:$0xff] }
  0x3d   : > { %v4354_v37 = vcombine.high %v303_v32, %v319_v33  ;;  %v4672_v23 = vcombine.high %v622_v17, %v638_v18  ;;  %v4640_v30 = vcombine.high %v590_v0, %v606_v25 }
  0x3f   : > { %3280 = vmatpush2.bf16.msra.mxu0 %v4603_v39  ;;  %3321 = vmatpush2.bf16.msra.mxu1 %v4605_v40  ;;  %v286_v39 = vld [vmem:[%s4833_s19 + $0x390] sm:$0xff]  ;;  %v271_v40 = vld [vmem:[%s4833_s19 + $0x318] sm:$0xff] }
  0x40   : > { %3281 = vmatprep.subr.bf16.mxu0 %v4572_v41  ;;  %3322 = vmatprep.subr.bf16.mxu1 %v4574_v43  ;;  %v287_v41 = vld [vmem:[%s4833_s19 + $0x398] sm:$0xff]  ;;  %v4353_v43 = vcombine.low %v303_v32, %v319_v33  ;;  %v4320_v44 = vcombine.high %v270_v38, %v286_v39  ;;  %v558_v32 = vld [vmem:[%s4833_s19 + $0xc10] sm:$0xff] }
  0x41   : > { %v4322_v45 = vcombine.high %v271_v40, %v287_v41  ;;  %v574_v33 = vld [vmem:[%s4833_s19 + $0xc90] sm:$0xff] }
  0x43   : > { %3282 = vmatpush2.bf16.msra.mxu0 %v4571_v48  ;;  %3323 = vmatpush2.bf16.msra.mxu1 %v4573_v49  ;;  %v239_v48 = vld [vmem:[%s4833_s19 + $0x218] sm:$0xff] }
  0x44   : > { %3283 = vmatprep.subr.bf16.mxu0 %v4540_v50  ;;  %3324 = vmatprep.subr.bf16.mxu1 %v4542_v51  ;;  %v255_v49 = vld [vmem:[%s4833_s19 + $0x298] sm:$0xff]  ;;  %v4319_v50 = vcombine.low %v270_v38, %v286_v39  ;;  %v4321_v51 = vcombine.low %v271_v40, %v287_v41  ;;  %v4608_v38 = vcombine.high %v558_v32, %v574_v33  ;;  %v526_v40 = vld [vmem:[%s4833_s19 + $0xb10] sm:$0xff] }
  0x45   : > { %v4290_v53 = vcombine.high %v239_v48, %v255_v49  ;;  %v542_v41 = vld [vmem:[%s4833_s19 + $0xb90] sm:$0xff] }
  0x47   : > { %3284 = vmatpush2.bf16.msra.mxu0 %v4539_v56  ;;  %3325 = vmatpush2.bf16.msra.mxu1 %v4541_v57  ;;  %v207_v56 = vld [vmem:[%s4833_s19 + $0x118] sm:$0xff] }
  0x48   : > { %3285 = vmatprep.subr.bf16.mxu0 %v4508_v58  ;;  %3326 = vmatprep.subr.bf16.mxu1 %v4510_v59  ;;  %v223_v57 = vld [vmem:[%s4833_s19 + $0x198] sm:$0xff]  ;;  %v4287_v58 = vcombine.low %v238_v46, %v254_v47  ;;  %v4289_v59 = vcombine.low %v239_v48, %v255_v49  ;;  %v4576_v46 = vcombine.high %v526_v40, %v542_v41  ;;  %v494_v48 = vld [vmem:[%s4833_s19 + $0xa10] sm:$0xff] }
  0x49   : > { %v4258_v61 = vcombine.high %v207_v56, %v223_v57  ;;  %v510_v49 = vld [vmem:[%s4833_s19 + $0xa90] sm:$0xff] }
  0x4b   : > { %3286 = vmatpush2.bf16.msra.mxu0 %v4507_v2  ;;  %3327 = vmatpush2.bf16.msra.mxu1 %v4509_v3  ;;  %v175_v2 = vld [vmem:[%s4833_s19 + $0x18] sm:$0xff] }
  0x4c   : > { %3287 = vmatprep.subr.bf16.mxu0 %v4476_v4  ;;  %3328 = vmatprep.subr.bf16.mxu1 %v4478_v5  ;;  %v191_v3 = vld [vmem:[%s4833_s19 + $0x98] sm:$0xff]  ;;  %v4255_v4 = vcombine.low %v206_v54, %v222_v55  ;;  %v4257_v5 = vcombine.low %v207_v56, %v223_v57  ;;  %v4544_v54 = vcombine.high %v494_v48, %v510_v49  ;;  %v462_v56 = vld [vmem:[%s4833_s19 + $0x910] sm:$0xff] }
  0x4d   : > { %v4226_v7 = vcombine.high %v175_v2, %v191_v3  ;;  %v478_v57 = vld [vmem:[%s4833_s19 + $0x990] sm:$0xff] }
  0x4f   : > { %3288 = vmatpush2.bf16.msra.mxu0 %v4475_v10  ;;  %3329 = vmatpush2.bf16.msra.mxu1 %v4477_v11  ;;  %v655_v10 = vld [vmem:[%s4833_s19 + $0xf18] sm:$0xff] }
  0x50   : > { %3339 = vmatprep.subr.bf16.mxu0 %v4448_v12  ;;  %3380 = vmatprep.subr.bf16.mxu1 %v4450_v13  ;;  %v671_v11 = vld [vmem:[%s4833_s19 + $0xf98] sm:$0xff]  ;;  %v4223_v12 = vcombine.low %v174_v62, %v190_v63  ;;  %v4225_v13 = vcombine.low %v175_v2, %v191_v3  ;;  %v4512_v62 = vcombine.high %v462_v56, %v478_v57  ;;  %v430_v2 = vld [vmem:[%s4833_s19 + $0x810] sm:$0xff] }
  0x51   : > { %v4706_v15 = vcombine.high %v655_v10, %v671_v11  ;;  %v446_v3 = vld [vmem:[%s4833_s19 + $0x890] sm:$0xff] }
  0x52   : > { %3290 = vmatmul.mubr.bf16.vlgmr.msra.gmra.mxu0 %v4910_v16  ;;  %3331 = vmatmul.mubr.bf16.vlgmr.msra.gmra.mxu1 %v4910_v16 }
  0x53   : > { %3340 = vmatpush1.bf16.msra.mxu0 %v4447_v19  ;;  %3381 = vmatpush1.bf16.msra.mxu1 %v4449_v20  ;;  %v623_v19 = vld [vmem:[%s4833_s19 + $0xe18] sm:$0xff] }
  0x54   : > { %3341 = vmatprep.subr.bf16.mxu0 %v4416_v21  ;;  %3382 = vmatprep.subr.bf16.mxu1 %v4418_v22  ;;  %v639_v20 = vld [vmem:[%s4833_s19 + $0xe98] sm:$0xff]  ;;  %v4703_v21 = vcombine.low %v654_v8, %v670_v9  ;;  %v4705_v22 = vcombine.low %v655_v10, %v671_v11  ;;  %v4480_v8 = vcombine.high %v430_v2, %v446_v3  ;;  %v400_v10 = vld [vmem:[%s4833_s19 + $0x720] sm:$0xff] }
  0x55   : > { %3371 = vmatprep.mubr.bf16.mxu0 %v4823_v1  ;;  %3412 = vmatprep.mubr.bf16.mxu1 %v4823_v1  ;;  %v4674_v24 = vcombine.high %v623_v19, %v639_v20  ;;  %v416_v11 = vld [vmem:[%s4833_s19 + $0x7a0] sm:$0xff] }
  0x57   : > { %3342 = vmatpush1.bf16.msra.mxu0 %v4415_v26  ;;  %3383 = vmatpush1.bf16.msra.mxu1 %v4417_v27  ;;  %v591_v26 = vld [vmem:[%s4833_s19 + $0xd18] sm:$0xff] }
  0x58   : > { %3343 = vmatprep.subr.bf16.mxu0 %v4384_v28  ;;  %3384 = vmatprep.subr.bf16.mxu1 %v4386_v29  ;;  %v607_v27 = vld [vmem:[%s4833_s19 + $0xd98] sm:$0xff]  ;;  %v4671_v28 = vcombine.low %v622_v17, %v638_v18  ;;  %v4673_v29 = vcombine.low %v623_v19, %v639_v20  ;;  %v4452_v17 = vcombine.high %v400_v10, %v416_v11  ;;  %v368_v19 = vld [vmem:[%s4833_s19 + $0x620] sm:$0xff] }
  0x59   : > { %v4642_v31 = vcombine.high %v591_v26, %v607_v27  ;;  %v384_v20 = vld [vmem:[%s4833_s19 + $0x6a0] sm:$0xff] }
  0x5b   : > { %3344 = vmatpush1.bf16.msra.mxu0 %v4383_v34  ;;  %3385 = vmatpush1.bf16.msra.mxu1 %v4385_v35  ;;  %v559_v34 = vld [vmem:[%s4833_s19 + $0xc18] sm:$0xff] }
  0x5c   : > { %3345 = vmatprep.subr.bf16.mxu0 %v4352_v36  ;;  %3386 = vmatprep.subr.bf16.mxu1 %v4354_v37  ;;  %v575_v35 = vld [vmem:[%s4833_s19 + $0xc98] sm:$0xff]  ;;  %v4639_v36 = vcombine.low %v590_v0, %v606_v25  ;;  %v4641_v37 = vcombine.low %v591_v26, %v607_v27  ;;  %v4420_v0 = vcombine.high %v368_v19, %v384_v20  ;;  %v336_v26 = vld [vmem:[%s4833_s19 + $0x520] sm:$0xff] }
  0x5d   : > { %v4610_v39 = vcombine.high %v559_v34, %v575_v35  ;;  %v352_v27 = vld [vmem:[%s4833_s19 + $0x5a0] sm:$0xff] }
  0x5f   : > { %3346 = vmatpush1.bf16.msra.mxu0 %v4351_v42  ;;  %3387 = vmatpush1.bf16.msra.mxu1 %v4353_v43  ;;  %v527_v42 = vld [vmem:[%s4833_s19 + $0xb18] sm:$0xff] }
  0x60   : > { %3347 = vmatprep.subr.bf16.mxu0 %v4320_v44  ;;  %3388 = vmatprep.subr.bf16.mxu1 %v4322_v45  ;;  %v543_v43 = vld [vmem:[%s4833_s19 + $0xb98] sm:$0xff]  ;;  %v4607_v44 = vcombine.low %v558_v32, %v574_v33  ;;  %v4609_v45 = vcombine.low %v559_v34, %v575_v35  ;;  %v4388_v32 = vcombine.high %v336_v26, %v352_v27  ;;  %v304_v34 = vld [vmem:[%s4833_s19 + $0x420] sm:$0xff] }
  0x61   : > { %v4578_v47 = vcombine.high %v527_v42, %v543_v43  ;;  %v320_v35 = vld [vmem:[%s4833_s19 + $0x4a0] sm:$0xff] }
  0x63   : > { %3348 = vmatpush1.bf16.msra.mxu0 %v4319_v50  ;;  %3389 = vmatpush1.bf16.msra.mxu1 %v4321_v51  ;;  %v495_v50 = vld [vmem:[%s4833_s19 + $0xa18] sm:$0xff] }
  0x64   : > { %3349 = vmatprep.subr.bf16.mxu0 %v4288_v52  ;;  %3390 = vmatprep.subr.bf16.mxu1 %v4290_v53  ;;  %v511_v51 = vld [vmem:[%s4833_s19 + $0xa98] sm:$0xff]  ;;  %v4575_v52 = vcombine.low %v526_v40, %v542_v41  ;;  %v4577_v53 = vcombine.low %v527_v42, %v543_v43  ;;  %v4356_v40 = vcombine.high %v304_v34, %v320_v35  ;;  %v272_v42 = vld [vmem:[%s4833_s19 + $0x320] sm:$0xff] }
  0x65   : > { %v4546_v55 = vcombine.high %v495_v50, %v511_v51  ;;  %v288_v43 = vld [vmem:[%s4833_s19 + $0x3a0] sm:$0xff] }
  0x67   : > { %3350 = vmatpush1.bf16.msra.mxu0 %v4287_v58  ;;  %3391 = vmatpush1.bf16.msra.mxu1 %v4289_v59  ;;  %v463_v58 = vld [vmem:[%s4833_s19 + $0x918] sm:$0xff] }
  0x68   : > { %3351 = vmatprep.subr.bf16.mxu0 %v4256_v60  ;;  %3392 = vmatprep.subr.bf16.mxu1 %v4258_v61  ;;  %v479_v59 = vld [vmem:[%s4833_s19 + $0x998] sm:$0xff]  ;;  %v4543_v60 = vcombine.low %v494_v48, %v510_v49  ;;  %v4545_v61 = vcombine.low %v495_v50, %v511_v51  ;;  %v4324_v48 = vcombine.high %v272_v42, %v288_v43  ;;  %v240_v50 = vld [vmem:[%s4833_s19 + $0x220] sm:$0xff] }
  0x69   : > { %v4514_v63 = vcombine.high %v463_v58, %v479_v59  ;;  %v256_v51 = vld [vmem:[%s4833_s19 + $0x2a0] sm:$0xff] }
  0x6b   : > { %3352 = vmatpush1.bf16.msra.mxu0 %v4255_v4  ;;  %3393 = vmatpush1.bf16.msra.mxu1 %v4257_v5  ;;  %v431_v4 = vld [vmem:[%s4833_s19 + $0x818] sm:$0xff] }
  0x6c   : > { %3353 = vmatprep.subr.bf16.mxu0 %v4224_v6  ;;  %3394 = vmatprep.subr.bf16.mxu1 %v4226_v7  ;;  %v447_v5 = vld [vmem:[%s4833_s19 + $0x898] sm:$0xff]  ;;  %v4511_v6 = vcombine.low %v462_v56, %v478_v57  ;;  %v4513_v7 = vcombine.low %v463_v58, %v479_v59  ;;  %v4292_v56 = vcombine.high %v240_v50, %v256_v51  ;;  %v208_v58 = vld [vmem:[%s4833_s19 + $0x120] sm:$0xff] }
  0x6d   : > { %v4482_v9 = vcombine.high %v431_v4, %v447_v5  ;;  %v224_v59 = vld [vmem:[%s4833_s19 + $0x1a0] sm:$0xff] }
  0x6f   : > { %3354 = vmatpush1.bf16.msra.mxu0 %v4223_v12  ;;  %3395 = vmatpush1.bf16.msra.mxu1 %v4225_v13  ;;  %v401_v12 = vld [vmem:[%s4833_s19 + $0x728] sm:$0xff] }
  0x70   : > { %3355 = vmatprep.subr.bf16.mxu0 %v4704_v14  ;;  %3396 = vmatprep.subr.bf16.mxu1 %v4706_v15  ;;  %v417_v13 = vld [vmem:[%s4833_s19 + $0x7a8] sm:$0xff]  ;;  %v4479_v14 = vcombine.low %v430_v2, %v446_v3  ;;  %v4481_v15 = vcombine.low %v431_v4, %v447_v5  ;;  %v4260_v2 = vcombine.high %v208_v58, %v224_v59  ;;  %v176_v4 = vld [vmem:[%s4833_s19 + $0x20] sm:$0xff] }
  0x71   : > { %v4454_v18 = vcombine.high %v401_v12, %v417_v13  ;;  %v192_v5 = vld [vmem:[%s4833_s19 + $0xa0] sm:$0xff] }
  0x73   : > { %3356 = vmatpush2.bf16.msra.mxu0 %v4703_v21  ;;  %3397 = vmatpush2.bf16.msra.mxu1 %v4705_v22  ;;  %v369_v21 = vld [vmem:[%s4833_s19 + $0x628] sm:$0xff] }
  0x74   : > { %3357 = vmatprep.subr.bf16.mxu0 %v4672_v23  ;;  %3398 = vmatprep.subr.bf16.mxu1 %v4674_v24  ;;  %v385_v22 = vld [vmem:[%s4833_s19 + $0x6a8] sm:$0xff]  ;;  %v4451_v23 = vcombine.low %v400_v10, %v416_v11  ;;  %v4453_v24 = vcombine.low %v401_v12, %v417_v13  ;;  %v4228_v10 = vcombine.high %v176_v4, %v192_v5  ;;  %v656_v12 = vld [vmem:[%s4833_s19 + $0xf20] sm:$0xff] }
  0x75   : > { %v4422_v25 = vcombine.high %v369_v21, %v385_v22  ;;  %v672_v13 = vld [vmem:[%s4833_s19 + $0xfa0] sm:$0xff] }
  0x77   : > { %3358 = vmatpush2.bf16.msra.mxu0 %v4671_v28  ;;  %3399 = vmatpush2.bf16.msra.mxu1 %v4673_v29  ;;  %v337_v28 = vld [vmem:[%s4833_s19 + $0x528] sm:$0xff] }
  0x78   : > { %3359 = vmatprep.subr.bf16.mxu0 %v4640_v30  ;;  %3400 = vmatprep.subr.bf16.mxu1 %v4642_v31  ;;  %v353_v29 = vld [vmem:[%s4833_s19 + $0x5a8] sm:$0xff]  ;;  %v4419_v30 = vcombine.low %v368_v19, %v384_v20  ;;  %v4421_v31 = vcombine.low %v369_v21, %v385_v22  ;;  %v4708_v19 = vcombine.high %v656_v12, %v672_v13  ;;  %v624_v21 = vld [vmem:[%s4833_s19 + $0xe20] sm:$0xff] }
  0x79   : > { %v4390_v33 = vcombine.high %v337_v28, %v353_v29  ;;  %v640_v22 = vld [vmem:[%s4833_s19 + $0xea0] sm:$0xff] }
  0x7b   : > { %3360 = vmatpush2.bf16.msra.mxu0 %v4639_v36  ;;  %3401 = vmatpush2.bf16.msra.mxu1 %v4641_v37  ;;  %v305_v36 = vld [vmem:[%s4833_s19 + $0x428] sm:$0xff] }
  0x7c   : > { %3361 = vmatprep.subr.bf16.mxu0 %v4608_v38  ;;  %3402 = vmatprep.subr.bf16.mxu1 %v4610_v39  ;;  %v321_v37 = vld [vmem:[%s4833_s19 + $0x4a8] sm:$0xff]  ;;  %v4387_v38 = vcombine.low %v336_v26, %v352_v27  ;;  %v4389_v39 = vcombine.low %v337_v28, %v353_v29  ;;  %v4676_v26 = vcombine.high %v624_v21, %v640_v22  ;;  %v592_v28 = vld [vmem:[%s4833_s19 + $0xd20] sm:$0xff] }
  0x7d   : > { %v4358_v41 = vcombine.high %v305_v36, %v321_v37  ;;  %v608_v29 = vld [vmem:[%s4833_s19 + $0xda0] sm:$0xff] }
  0x7f   : > { %3362 = vmatpush2.bf16.msra.mxu0 %v4607_v44  ;;  %3403 = vmatpush2.bf16.msra.mxu1 %v4609_v45  ;;  %v273_v44 = vld [vmem:[%s4833_s19 + $0x328] sm:$0xff] }
  0x80   : > { %3363 = vmatprep.subr.bf16.mxu0 %v4576_v46  ;;  %3404 = vmatprep.subr.bf16.mxu1 %v4578_v47  ;;  %v289_v45 = vld [vmem:[%s4833_s19 + $0x3a8] sm:$0xff]  ;;  %v4355_v46 = vcombine.low %v304_v34, %v320_v35  ;;  %v4357_v47 = vcombine.low %v305_v36, %v321_v37  ;;  %v4644_v34 = vcombine.high %v592_v28, %v608_v29  ;;  %v560_v36 = vld [vmem:[%s4833_s19 + $0xc20] sm:$0xff] }
  0x81   : > { %v4326_v49 = vcombine.high %v273_v44, %v289_v45  ;;  %v576_v37 = vld [vmem:[%s4833_s19 + $0xca0] sm:$0xff] }
  0x83   : > { %3364 = vmatpush2.bf16.msra.mxu0 %v4575_v52  ;;  %3405 = vmatpush2.bf16.msra.mxu1 %v4577_v53  ;;  %v241_v52 = vld [vmem:[%s4833_s19 + $0x228] sm:$0xff] }
  0x84   : > { %3365 = vmatprep.subr.bf16.mxu0 %v4544_v54  ;;  %3406 = vmatprep.subr.bf16.mxu1 %v4546_v55  ;;  %v257_v53 = vld [vmem:[%s4833_s19 + $0x2a8] sm:$0xff]  ;;  %v4323_v54 = vcombine.low %v272_v42, %v288_v43  ;;  %v4325_v55 = vcombine.low %v273_v44, %v289_v45  ;;  %v4612_v42 = vcombine.high %v560_v36, %v576_v37  ;;  %v528_v44 = vld [vmem:[%s4833_s19 + $0xb20] sm:$0xff] }
  0x85   : > { %v4294_v57 = vcombine.high %v241_v52, %v257_v53  ;;  %v544_v45 = vld [vmem:[%s4833_s19 + $0xba0] sm:$0xff] }
  0x87   : > { %3366 = vmatpush2.bf16.msra.mxu0 %v4543_v60  ;;  %3407 = vmatpush2.bf16.msra.mxu1 %v4545_v61  ;;  %v209_v60 = vld [vmem:[%s4833_s19 + $0x128] sm:$0xff] }
  0x88   : > { %3367 = vmatprep.subr.bf16.mxu0 %v4512_v62  ;;  %3408 = vmatprep.subr.bf16.mxu1 %v4514_v63  ;;  %v225_v61 = vld [vmem:[%s4833_s19 + $0x1a8] sm:$0xff]  ;;  %v4291_v62 = vcombine.low %v240_v50, %v256_v51  ;;  %v4293_v63 = vcombine.low %v241_v52, %v257_v53  ;;  %v4580_v50 = vcombine.high %v528_v44, %v544_v45  ;;  %v496_v52 = vld [vmem:[%s4833_s19 + $0xa20] sm:$0xff] }
  0x89   : > { %v4262_v3 = vcombine.high %v209_v60, %v225_v61  ;;  %v512_v53 = vld [vmem:[%s4833_s19 + $0xaa0] sm:$0xff] }
  0x8b   : > { %3368 = vmatpush2.bf16.msra.mxu0 %v4511_v6  ;;  %3409 = vmatpush2.bf16.msra.mxu1 %v4513_v7  ;;  %v177_v6 = vld [vmem:[%s4833_s19 + $0x28] sm:$0xff] }
  0x8c   : > { %3369 = vmatprep.subr.bf16.mxu0 %v4480_v8  ;;  %3410 = vmatprep.subr.bf16.mxu1 %v4482_v9  ;;  %v193_v7 = vld [vmem:[%s4833_s19 + $0xa8] sm:$0xff]  ;;  %v4259_v8 = vcombine.low %v208_v58, %v224_v59  ;;  %v4261_v9 = vcombine.low %v209_v60, %v225_v61  ;;  %v4548_v58 = vcombine.high %v496_v52, %v512_v53  ;;  %v464_v60 = vld [vmem:[%s4833_s19 + $0x920] sm:$0xff] }
  0x8d   : > { %v4230_v11 = vcombine.high %v177_v6, %v193_v7  ;;  %v480_v61 = vld [vmem:[%s4833_s19 + $0x9a0] sm:$0xff] }
  0x8f   : > { %3370 = vmatpush2.bf16.msra.mxu0 %v4479_v14  ;;  %3411 = vmatpush2.bf16.msra.mxu1 %v4481_v15  ;;  %v657_v14 = vld [vmem:[%s4833_s19 + $0xf28] sm:$0xff] }
  0x90   : > { %3421 = vmatprep.subr.bf16.mxu0 %v4452_v17  ;;  %3462 = vmatprep.subr.bf16.mxu1 %v4454_v18  ;;  %v673_v15 = vld [vmem:[%s4833_s19 + $0xfa8] sm:$0xff]  ;;  %v4227_v17 = vcombine.low %v176_v4, %v192_v5  ;;  %v4229_v18 = vcombine.low %v177_v6, %v193_v7  ;;  %v4516_v4 = vcombine.high %v464_v60, %v480_v61  ;;  %v432_v6 = vld [vmem:[%s4833_s19 + $0x820] sm:$0xff] }
  0x91   : > { %v4710_v20 = vcombine.high %v657_v14, %v673_v15  ;;  %v448_v7 = vld [vmem:[%s4833_s19 + $0x8a0] sm:$0xff] }
  0x92   : > { %3372 = vmatmul.mubr.bf16.vlgmr.msra.gmra.mxu0 %v4910_v16  ;;  %3413 = vmatmul.mubr.bf16.vlgmr.msra.gmra.mxu1 %v4910_v16 }
  0x93   : > { %3422 = vmatpush1.bf16.msra.mxu0 %v4451_v23  ;;  %3463 = vmatpush1.bf16.msra.mxu1 %v4453_v24  ;;  %v625_v23 = vld [vmem:[%s4833_s19 + $0xe28] sm:$0xff] }
  0x94   : > { %3423 = vmatprep.subr.bf16.mxu0 %v4420_v0  ;;  %3464 = vmatprep.subr.bf16.mxu1 %v4422_v25  ;;  %v641_v24 = vld [vmem:[%s4833_s19 + $0xea8] sm:$0xff]  ;;  %v4707_v0 = vcombine.low %v656_v12, %v672_v13  ;;  %v4709_v25 = vcombine.low %v657_v14, %v673_v15  ;;  %v4484_v12 = vcombine.high %v432_v6, %v448_v7  ;;  %v402_v14 = vld [vmem:[%s4833_s19 + $0x730] sm:$0xff] }
  0x95   : > { %3453 = vmatprep.mubr.bf16.mxu0 %v4823_v1  ;;  %3494 = vmatprep.mubr.bf16.mxu1 %v4823_v1  ;;  %v4678_v27 = vcombine.high %v625_v23, %v641_v24  ;;  %v418_v15 = vld [vmem:[%s4833_s19 + $0x7b0] sm:$0xff] }
  0x97   : > { %3424 = vmatpush1.bf16.msra.mxu0 %v4419_v30  ;;  %3465 = vmatpush1.bf16.msra.mxu1 %v4421_v31  ;;  %v593_v30 = vld [vmem:[%s4833_s19 + $0xd28] sm:$0xff] }
  0x98   : > { %3425 = vmatprep.subr.bf16.mxu0 %v4388_v32  ;;  %3466 = vmatprep.subr.bf16.mxu1 %v4390_v33  ;;  %v609_v31 = vld [vmem:[%s4833_s19 + $0xda8] sm:$0xff]  ;;  %v4675_v32 = vcombine.low %v624_v21, %v640_v22  ;;  %v4677_v33 = vcombine.low %v625_v23, %v641_v24  ;;  %v4456_v21 = vcombine.high %v402_v14, %v418_v15  ;;  %v370_v23 = vld [vmem:[%s4833_s19 + $0x630] sm:$0xff] }
  0x99   : > { %v4646_v35 = vcombine.high %v593_v30, %v609_v31  ;;  %v386_v24 = vld [vmem:[%s4833_s19 + $0x6b0] sm:$0xff] }
  0x9b   : > { %3426 = vmatpush1.bf16.msra.mxu0 %v4387_v38  ;;  %3467 = vmatpush1.bf16.msra.mxu1 %v4389_v39  ;;  %v561_v38 = vld [vmem:[%s4833_s19 + $0xc28] sm:$0xff] }
  0x9c   : > { %3427 = vmatprep.subr.bf16.mxu0 %v4356_v40  ;;  %3468 = vmatprep.subr.bf16.mxu1 %v4358_v41  ;;  %v577_v39 = vld [vmem:[%s4833_s19 + $0xca8] sm:$0xff]  ;;  %v4643_v40 = vcombine.low %v592_v28, %v608_v29  ;;  %v4645_v41 = vcombine.low %v593_v30, %v609_v31  ;;  %v4424_v28 = vcombine.high %v370_v23, %v386_v24  ;;  %v338_v30 = vld [vmem:[%s4833_s19 + $0x530] sm:$0xff] }
  0x9d   : > { %v4614_v43 = vcombine.high %v561_v38, %v577_v39  ;;  %v354_v31 = vld [vmem:[%s4833_s19 + $0x5b0] sm:$0xff] }
  0x9f   : > { %3428 = vmatpush1.bf16.msra.mxu0 %v4355_v46  ;;  %3469 = vmatpush1.bf16.msra.mxu1 %v4357_v47  ;;  %v529_v46 = vld [vmem:[%s4833_s19 + $0xb28] sm:$0xff] }
  0xa0   : > { %3429 = vmatprep.subr.bf16.mxu0 %v4324_v48  ;;  %3470 = vmatprep.subr.bf16.mxu1 %v4326_v49  ;;  %v545_v47 = vld [vmem:[%s4833_s19 + $0xba8] sm:$0xff]  ;;  %v4611_v48 = vcombine.low %v560_v36, %v576_v37  ;;  %v4613_v49 = vcombine.low %v561_v38, %v577_v39  ;;  %v4392_v36 = vcombine.high %v338_v30, %v354_v31  ;;  %v306_v38 = vld [vmem:[%s4833_s19 + $0x430] sm:$0xff] }
  0xa1   : > { %v4582_v51 = vcombine.high %v529_v46, %v545_v47  ;;  %v322_v39 = vld [vmem:[%s4833_s19 + $0x4b0] sm:$0xff] }
  0xa3   : > { %3430 = vmatpush1.bf16.msra.mxu0 %v4323_v54  ;;  %3471 = vmatpush1.bf16.msra.mxu1 %v4325_v55  ;;  %v497_v54 = vld [vmem:[%s4833_s19 + $0xa28] sm:$0xff] }
  0xa4   : > { %3431 = vmatprep.subr.bf16.mxu0 %v4292_v56  ;;  %3472 = vmatprep.subr.bf16.mxu1 %v4294_v57  ;;  %v513_v55 = vld [vmem:[%s4833_s19 + $0xaa8] sm:$0xff]  ;;  %v4579_v56 = vcombine.low %v528_v44, %v544_v45  ;;  %v4581_v57 = vcombine.low %v529_v46, %v545_v47  ;;  %v4360_v44 = vcombine.high %v306_v38, %v322_v39  ;;  %v274_v46 = vld [vmem:[%s4833_s19 + $0x330] sm:$0xff] }
  0xa5   : > { %v4550_v59 = vcombine.high %v497_v54, %v513_v55  ;;  %v290_v47 = vld [vmem:[%s4833_s19 + $0x3b0] sm:$0xff] }
  0xa7   : > { %3432 = vmatpush1.bf16.msra.mxu0 %v4291_v62  ;;  %3473 = vmatpush1.bf16.msra.mxu1 %v4293_v63  ;;  %v465_v62 = vld [vmem:[%s4833_s19 + $0x928] sm:$0xff] }
  0xa8   : > { %3433 = vmatprep.subr.bf16.mxu0 %v4260_v2  ;;  %3474 = vmatprep.subr.bf16.mxu1 %v4262_v3  ;;  %v481_v63 = vld [vmem:[%s4833_s19 + $0x9a8] sm:$0xff]  ;;  %v4547_v2 = vcombine.low %v496_v52, %v512_v53  ;;  %v4549_v3 = vcombine.low %v497_v54, %v513_v55  ;;  %v4328_v52 = vcombine.high %v274_v46, %v290_v47  ;;  %v242_v54 = vld [vmem:[%s4833_s19 + $0x230] sm:$0xff] }
  0xa9   : > { %v4518_v5 = vcombine.high %v465_v62, %v481_v63  ;;  %v258_v55 = vld [vmem:[%s4833_s19 + $0x2b0] sm:$0xff] }
  0xab   : > { %3434 = vmatpush1.bf16.msra.mxu0 %v4259_v8  ;;  %3475 = vmatpush1.bf16.msra.mxu1 %v4261_v9  ;;  %v433_v8 = vld [vmem:[%s4833_s19 + $0x828] sm:$0xff] }
  0xac   : > { %3435 = vmatprep.subr.bf16.mxu0 %v4228_v10  ;;  %3476 = vmatprep.subr.bf16.mxu1 %v4230_v11  ;;  %v449_v9 = vld [vmem:[%s4833_s19 + $0x8a8] sm:$0xff]  ;;  %v4515_v10 = vcombine.low %v464_v60, %v480_v61  ;;  %v4517_v11 = vcombine.low %v465_v62, %v481_v63  ;;  %v4296_v60 = vcombine.high %v242_v54, %v258_v55  ;;  %v210_v62 = vld [vmem:[%s4833_s19 + $0x130] sm:$0xff] }
  0xad   : > { %v4486_v13 = vcombine.high %v433_v8, %v449_v9  ;;  %v226_v63 = vld [vmem:[%s4833_s19 + $0x1b0] sm:$0xff] }
  0xaf   : > { %3436 = vmatpush1.bf16.msra.mxu0 %v4227_v17  ;;  %3477 = vmatpush1.bf16.msra.mxu1 %v4229_v18  ;;  %v403_v17 = vld [vmem:[%s4833_s19 + $0x738] sm:$0xff] }
  0xb0   : > { %3437 = vmatprep.subr.bf16.mxu0 %v4708_v19  ;;  %3478 = vmatprep.subr.bf16.mxu1 %v4710_v20  ;;  %v419_v18 = vld [vmem:[%s4833_s19 + $0x7b8] sm:$0xff]  ;;  %v4483_v19 = vcombine.low %v432_v6, %v448_v7  ;;  %v4485_v20 = vcombine.low %v433_v8, %v449_v9  ;;  %v4264_v6 = vcombine.high %v210_v62, %v226_v63  ;;  %v178_v8 = vld [vmem:[%s4833_s19 + $0x30] sm:$0xff] }
  0xb1   : > { %v4458_v22 = vcombine.high %v403_v17, %v419_v18  ;;  %v194_v9 = vld [vmem:[%s4833_s19 + $0xb0] sm:$0xff] }
  0xb3   : > { %3438 = vmatpush2.bf16.msra.mxu0 %v4707_v0  ;;  %3479 = vmatpush2.bf16.msra.mxu1 %v4709_v25  ;;  %v371_v0 = vld [vmem:[%s4833_s19 + $0x638] sm:$0xff] }
  0xb4   : > { %3439 = vmatprep.subr.bf16.mxu0 %v4676_v26  ;;  %3480 = vmatprep.subr.bf16.mxu1 %v4678_v27  ;;  %v387_v25 = vld [vmem:[%s4833_s19 + $0x6b8] sm:$0xff]  ;;  %v4455_v26 = vcombine.low %v402_v14, %v418_v15  ;;  %v4457_v27 = vcombine.low %v403_v17, %v419_v18  ;;  %v4232_v14 = vcombine.high %v178_v8, %v194_v9  ;;  %v658_v17 = vld [vmem:[%s4833_s19 + $0xf30] sm:$0xff] }
  0xb5   : > { %v4426_v29 = vcombine.high %v371_v0, %v387_v25  ;;  %v674_v18 = vld [vmem:[%s4833_s19 + $0xfb0] sm:$0xff] }
  0xb7   : > { %3440 = vmatpush2.bf16.msra.mxu0 %v4675_v32  ;;  %3481 = vmatpush2.bf16.msra.mxu1 %v4677_v33  ;;  %v339_v32 = vld [vmem:[%s4833_s19 + $0x538] sm:$0xff] }
  0xb8   : > { %3441 = vmatprep.subr.bf16.mxu0 %v4644_v34  ;;  %3482 = vmatprep.subr.bf16.mxu1 %v4646_v35  ;;  %v355_v33 = vld [vmem:[%s4833_s19 + $0x5b8] sm:$0xff]  ;;  %v4423_v34 = vcombine.low %v370_v23, %v386_v24  ;;  %v4425_v35 = vcombine.low %v371_v0, %v387_v25  ;;  %v4712_v23 = vcombine.high %v658_v17, %v674_v18  ;;  %v626_v0 = vld [vmem:[%s4833_s19 + $0xe30] sm:$0xff] }
  0xb9   : > { %v4394_v37 = vcombine.high %v339_v32, %v355_v33  ;;  %v642_v25 = vld [vmem:[%s4833_s19 + $0xeb0] sm:$0xff] }
  0xbb   : > { %3442 = vmatpush2.bf16.msra.mxu0 %v4643_v40  ;;  %3483 = vmatpush2.bf16.msra.mxu1 %v4645_v41  ;;  %v307_v40 = vld [vmem:[%s4833_s19 + $0x438] sm:$0xff] }
  0xbc   : > { %3443 = vmatprep.subr.bf16.mxu0 %v4612_v42  ;;  %3484 = vmatprep.subr.bf16.mxu1 %v4614_v43  ;;  %v323_v41 = vld [vmem:[%s4833_s19 + $0x4b8] sm:$0xff]  ;;  %v4391_v42 = vcombine.low %v338_v30, %v354_v31  ;;  %v4393_v43 = vcombine.low %v339_v32, %v355_v33  ;;  %v4680_v30 = vcombine.high %v626_v0, %v642_v25  ;;  %v594_v32 = vld [vmem:[%s4833_s19 + $0xd30] sm:$0xff] }
  0xbd   : > { %v4362_v45 = vcombine.high %v307_v40, %v323_v41  ;;  %v610_v33 = vld [vmem:[%s4833_s19 + $0xdb0] sm:$0xff] }
  0xbf   : > { %3444 = vmatpush2.bf16.msra.mxu0 %v4611_v48  ;;  %3485 = vmatpush2.bf16.msra.mxu1 %v4613_v49  ;;  %v275_v48 = vld [vmem:[%s4833_s19 + $0x338] sm:$0xff] }
  0xc0   : > { %3445 = vmatprep.subr.bf16.mxu0 %v4580_v50  ;;  %3486 = vmatprep.subr.bf16.mxu1 %v4582_v51  ;;  %v291_v49 = vld [vmem:[%s4833_s19 + $0x3b8] sm:$0xff]  ;;  %v4359_v50 = vcombine.low %v306_v38, %v322_v39  ;;  %v4361_v51 = vcombine.low %v307_v40, %v323_v41  ;;  %v4648_v38 = vcombine.high %v594_v32, %v610_v33  ;;  %v562_v40 = vld [vmem:[%s4833_s19 + $0xc30] sm:$0xff] }
  0xc1   : > { %v4330_v53 = vcombine.high %v275_v48, %v291_v49  ;;  %v578_v41 = vld [vmem:[%s4833_s19 + $0xcb0] sm:$0xff] }
  0xc3   : > { %3446 = vmatpush2.bf16.msra.mxu0 %v4579_v56  ;;  %3487 = vmatpush2.bf16.msra.mxu1 %v4581_v57  ;;  %v243_v56 = vld [vmem:[%s4833_s19 + $0x238] sm:$0xff] }
  0xc4   : > { %3447 = vmatprep.subr.bf16.mxu0 %v4548_v58  ;;  %3488 = vmatprep.subr.bf16.mxu1 %v4550_v59  ;;  %v259_v57 = vld [vmem:[%s4833_s19 + $0x2b8] sm:$0xff]  ;;  %v4327_v58 = vcombine.low %v274_v46, %v290_v47  ;;  %v4329_v59 = vcombine.low %v275_v48, %v291_v49  ;;  %v4616_v46 = vcombine.high %v562_v40, %v578_v41  ;;  %v530_v48 = vld [vmem:[%s4833_s19 + $0xb30] sm:$0xff] }
  0xc5   : > { %v4298_v61 = vcombine.high %v243_v56, %v259_v57  ;;  %v546_v49 = vld [vmem:[%s4833_s19 + $0xbb0] sm:$0xff] }
  0xc7   : > { %3448 = vmatpush2.bf16.msra.mxu0 %v4547_v2  ;;  %3489 = vmatpush2.bf16.msra.mxu1 %v4549_v3  ;;  %v211_v2 = vld [vmem:[%s4833_s19 + $0x138] sm:$0xff] }
  0xc8   : > { %3449 = vmatprep.subr.bf16.mxu0 %v4516_v4  ;;  %3490 = vmatprep.subr.bf16.mxu1 %v4518_v5  ;;  %v227_v3 = vld [vmem:[%s4833_s19 + $0x1b8] sm:$0xff]  ;;  %v4295_v4 = vcombine.low %v242_v54, %v258_v55  ;;  %v4297_v5 = vcombine.low %v243_v56, %v259_v57  ;;  %v4584_v54 = vcombine.high %v530_v48, %v546_v49  ;;  %v498_v56 = vld [vmem:[%s4833_s19 + $0xa30] sm:$0xff] }
  0xc9   : > { %v4266_v7 = vcombine.high %v211_v2, %v227_v3  ;;  %v514_v57 = vld [vmem:[%s4833_s19 + $0xab0] sm:$0xff] }
  0xcb   : > { %3450 = vmatpush2.bf16.msra.mxu0 %v4515_v10  ;;  %3491 = vmatpush2.bf16.msra.mxu1 %v4517_v11  ;;  %v179_v10 = vld [vmem:[%s4833_s19 + $0x38] sm:$0xff] }
  0xcc   : > { %3451 = vmatprep.subr.bf16.mxu0 %v4484_v12  ;;  %3492 = vmatprep.subr.bf16.mxu1 %v4486_v13  ;;  %v195_v11 = vld [vmem:[%s4833_s19 + $0xb8] sm:$0xff]  ;;  %v4263_v12 = vcombine.low %v210_v62, %v226_v63  ;;  %v4265_v13 = vcombine.low %v211_v2, %v227_v3  ;;  %v4552_v62 = vcombine.high %v498_v56, %v514_v57  ;;  %v466_v2 = vld [vmem:[%s4833_s19 + $0x930] sm:$0xff] }
  0xcd   : > { %v4234_v15 = vcombine.high %v179_v10, %v195_v11  ;;  %v482_v3 = vld [vmem:[%s4833_s19 + $0x9b0] sm:$0xff] }
  0xcf   : > { %3452 = vmatpush2.bf16.msra.mxu0 %v4483_v19  ;;  %3493 = vmatpush2.bf16.msra.mxu1 %v4485_v20  ;;  %v659_v19 = vld [vmem:[%s4833_s19 + $0xf38] sm:$0xff] }
  0xd0   : > { %3503 = vmatprep.subr.bf16.mxu0 %v4456_v21  ;;  %3544 = vmatprep.subr.bf16.mxu1 %v4458_v22  ;;  %v675_v20 = vld [vmem:[%s4833_s19 + $0xfb8] sm:$0xff]  ;;  %v4231_v21 = vcombine.low %v178_v8, %v194_v9  ;;  %v4233_v22 = vcombine.low %v179_v10, %v195_v11  ;;  %v4520_v8 = vcombine.high %v466_v2, %v482_v3  ;;  %v434_v10 = vld [vmem:[%s4833_s19 + $0x830] sm:$0xff] }
  0xd1   : > { %v4714_v24 = vcombine.high %v659_v19, %v675_v20  ;;  %v450_v11 = vld [vmem:[%s4833_s19 + $0x8b0] sm:$0xff] }
  0xd2   : > { %3454 = vmatmul.mubr.bf16.vlgmr.msra.gmra.mxu0 %v4910_v16  ;;  %3495 = vmatmul.mubr.bf16.vlgmr.msra.gmra.mxu1 %v4910_v16 }
  0xd3   : > { %3504 = vmatpush1.bf16.msra.mxu0 %v4455_v26  ;;  %3545 = vmatpush1.bf16.msra.mxu1 %v4457_v27  ;;  %v627_v26 = vld [vmem:[%s4833_s19 + $0xe38] sm:$0xff] }
  0xd4   : > { %3505 = vmatprep.subr.bf16.mxu0 %v4424_v28  ;;  %3546 = vmatprep.subr.bf16.mxu1 %v4426_v29  ;;  %v643_v27 = vld [vmem:[%s4833_s19 + $0xeb8] sm:$0xff]  ;;  %v4711_v28 = vcombine.low %v658_v17, %v674_v18  ;;  %v4713_v29 = vcombine.low %v659_v19, %v675_v20  ;;  %v4488_v17 = vcombine.high %v434_v10, %v450_v11  ;;  %v404_v19 = vld [vmem:[%s4833_s19 + $0x740] sm:$0xff] }
  0xd5   : > { %3535 = vmatprep.mubr.bf16.mxu0 %v4823_v1  ;;  %3576 = vmatprep.mubr.bf16.mxu1 %v4823_v1  ;;  %v4682_v31 = vcombine.high %v627_v26, %v643_v27  ;;  %v420_v20 = vld [vmem:[%s4833_s19 + $0x7c0] sm:$0xff] }
  0xd7   : > { %3506 = vmatpush1.bf16.msra.mxu0 %v4423_v34  ;;  %3547 = vmatpush1.bf16.msra.mxu1 %v4425_v35  ;;  %v595_v34 = vld [vmem:[%s4833_s19 + $0xd38] sm:$0xff] }
  0xd8   : > { %3507 = vmatprep.subr.bf16.mxu0 %v4392_v36  ;;  %3548 = vmatprep.subr.bf16.mxu1 %v4394_v37  ;;  %v611_v35 = vld [vmem:[%s4833_s19 + $0xdb8] sm:$0xff]  ;;  %v4679_v36 = vcombine.low %v626_v0, %v642_v25  ;;  %v4681_v37 = vcombine.low %v627_v26, %v643_v27  ;;  %v4460_v0 = vcombine.high %v404_v19, %v420_v20  ;;  %v372_v26 = vld [vmem:[%s4833_s19 + $0x640] sm:$0xff] }
  0xd9   : > { %v4650_v39 = vcombine.high %v595_v34, %v611_v35  ;;  %v388_v27 = vld [vmem:[%s4833_s19 + $0x6c0] sm:$0xff] }
  0xdb   : > { %3508 = vmatpush1.bf16.msra.mxu0 %v4391_v42  ;;  %3549 = vmatpush1.bf16.msra.mxu1 %v4393_v43  ;;  %v563_v42 = vld [vmem:[%s4833_s19 + $0xc38] sm:$0xff] }
  0xdc   : > { %3509 = vmatprep.subr.bf16.mxu0 %v4360_v44  ;;  %3550 = vmatprep.subr.bf16.mxu1 %v4362_v45  ;;  %v579_v43 = vld [vmem:[%s4833_s19 + $0xcb8] sm:$0xff]  ;;  %v4647_v44 = vcombine.low %v594_v32, %v610_v33  ;;  %v4649_v45 = vcombine.low %v595_v34, %v611_v35  ;;  %v4428_v33 = vcombine.high %v372_v26, %v388_v27  ;;  %v340_v35 = vld [vmem:[%s4833_s19 + $0x540] sm:$0xff] }
  0xdd   : > { %v4618_v47 = vcombine.high %v563_v42, %v579_v43 }
  0xdf   : > { %3510 = vmatpush1.bf16.msra.mxu0 %v4359_v50  ;;  %3551 = vmatpush1.bf16.msra.mxu1 %v4361_v51  ;;  %v531_v50 = vld [vmem:[%s4833_s19 + $0xb38] sm:$0xff] }
  0xe0   : > { %3511 = vmatprep.subr.bf16.mxu0 %v4328_v52  ;;  %3552 = vmatprep.subr.bf16.mxu1 %v4330_v53  ;;  %v547_v51 = vld [vmem:[%s4833_s19 + $0xbb8] sm:$0xff]  ;;  %v4615_v52 = vcombine.low %v562_v40, %v578_v41  ;;  %v4617_v53 = vcombine.low %v563_v42, %v579_v43  ;;  %v4427_v42 = vcombine.low %v372_v26, %v388_v27  ;;  %v212_v27 = vld [vmem:[%s4833_s19 + $0x140] sm:$0xff] }
  0xe1   : > { %v4586_v55 = vcombine.high %v531_v50, %v547_v51 }
  0xe3   : > { %3512 = vmatpush1.bf16.msra.mxu0 %v4327_v58  ;;  %3553 = vmatpush1.bf16.msra.mxu1 %v4329_v59  ;;  %v499_v58 = vld [vmem:[%s4833_s19 + $0xa38] sm:$0xff] }
  0xe4   : > { %3513 = vmatprep.subr.bf16.mxu0 %v4296_v60  ;;  %3554 = vmatprep.subr.bf16.mxu1 %v4298_v61  ;;  %v515_v59 = vld [vmem:[%s4833_s19 + $0xab8] sm:$0xff]  ;;  %v4583_v60 = vcombine.low %v530_v48, %v546_v49  ;;  %v4585_v61 = vcombine.low %v531_v50, %v547_v51  ;;  %v308_v51 = vld [vmem:[%s4833_s19 + $0x440] sm:$0xff] }
  0xe5   : > { %v4554_v63 = vcombine.high %v499_v58, %v515_v59 }
  0xe7   : > { %3514 = vmatpush1.bf16.msra.mxu0 %v4295_v4  ;;  %3555 = vmatpush1.bf16.msra.mxu1 %v4297_v5  ;;  %v467_v4 = vld [vmem:[%s4833_s19 + $0x938] sm:$0xff] }
  0xe8   : > { %3515 = vmatprep.subr.bf16.mxu0 %v4264_v6  ;;  %3556 = vmatprep.subr.bf16.mxu1 %v4266_v7  ;;  %v483_v5 = vld [vmem:[%s4833_s19 + $0x9b8] sm:$0xff]  ;;  %v4551_v6 = vcombine.low %v498_v56, %v514_v57  ;;  %v4553_v7 = vcombine.low %v499_v58, %v515_v59  ;;  %v309_v56 = vld [vmem:[%s4833_s19 + $0x448] sm:$0xff] }
  0xe9   : > { %v4522_v9 = vcombine.high %v467_v4, %v483_v5  ;;  %v325_v57 = vld [vmem:[%s4833_s19 + $0x4c8] sm:$0xff] }
  0xeb   : > { %3516 = vmatpush1.bf16.msra.mxu0 %v4263_v12  ;;  %3557 = vmatpush1.bf16.msra.mxu1 %v4265_v13  ;;  %v435_v12 = vld [vmem:[%s4833_s19 + $0x838] sm:$0xff] }
  0xec   : > { %3517 = vmatprep.subr.bf16.mxu0 %v4232_v14  ;;  %3558 = vmatprep.subr.bf16.mxu1 %v4234_v15  ;;  %v451_v13 = vld [vmem:[%s4833_s19 + $0x8b8] sm:$0xff]  ;;  %v4519_v14 = vcombine.low %v466_v2, %v482_v3  ;;  %v4521_v15 = vcombine.low %v467_v4, %v483_v5 }
  0xed   : > { %v4490_v18 = vcombine.high %v435_v12, %v451_v13 }
  0xef   : > { %3518 = vmatpush1.bf16.msra.mxu0 %v4231_v21  ;;  %3559 = vmatpush1.bf16.msra.mxu1 %v4233_v22  ;;  %v405_v21 = vld [vmem:[%s4833_s19 + $0x748] sm:$0xff] }
  0xf0   : > { %3519 = vmatprep.subr.bf16.mxu0 %v4712_v23  ;;  %3560 = vmatprep.subr.bf16.mxu1 %v4714_v24  ;;  %v421_v22 = vld [vmem:[%s4833_s19 + $0x7c8] sm:$0xff]  ;;  %v4487_v23 = vcombine.low %v434_v10, %v450_v11  ;;  %v4489_v24 = vcombine.low %v435_v12, %v451_v13 }
  0xf1   : > { %v4462_v25 = vcombine.high %v405_v21, %v421_v22  ;;  %v4461_v32 = vcombine.low %v405_v21, %v421_v22  ;;  %v277_v12 = vld [vmem:[%s4833_s19 + $0x348] sm:$0xff]  ;;  %v260_v21 = vld [vmem:[%s4833_s19 + $0x2c0] sm:$0xff] }
  0xf2   : > { %v293_v13 = vld [vmem:[%s4833_s19 + $0x3c8] sm:$0xff] }
  0xf3   : > { %3520 = vmatpush2.bf16.msra.mxu0 %v4711_v28  ;;  %3561 = vmatpush2.bf16.msra.mxu1 %v4713_v29  ;;  %v373_v28 = vld [vmem:[%s4833_s19 + $0x648] sm:$0xff] }
  0xf4   : > { %3521 = vmatprep.subr.bf16.mxu0 %v4680_v30  ;;  %3562 = vmatprep.subr.bf16.mxu1 %v4682_v31  ;;  %v389_v29 = vld [vmem:[%s4833_s19 + $0x6c8] sm:$0xff]  ;;  %v4459_v30 = vcombine.low %v404_v19, %v420_v20  ;;  %v5118_v31 = vpop.permute.xlu0 %687  ;;  %v4334_v19 = vcombine.high %v277_v12, %v293_v13  ;;  %v244_v20 = vld [vmem:[%s4833_s19 + $0x240] sm:$0xff] }
  0xf5   : > { %v4430_v34 = vcombine.high %v373_v28, %v389_v29  ;;  %v245_v22 = vld [vmem:[%s4833_s19 + $0x248] sm:$0xff] }
  0xf7   : > { %3522 = vmatpush2.bf16.msra.mxu0 %v4679_v36  ;;  %3563 = vmatpush2.bf16.msra.mxu1 %v4681_v37  ;;  %v356_v36 = vld [vmem:[%s4833_s19 + $0x5c0] sm:$0xff] }
  0xf8   : > { %3523 = vmatprep.subr.bf16.mxu0 %v4648_v38  ;;  %3564 = vmatprep.subr.bf16.mxu1 %v4650_v39  ;;  %v341_v38 = vld [vmem:[%s4833_s19 + $0x548] sm:$0xff] }
  0xf9   : > { %v357_v39 = vld [vmem:[%s4833_s19 + $0x5c8] sm:$0xff] }
  0xfa   : > { %v4398_v50 = vcombine.high %v341_v38, %v357_v39 }
  0xfb   : > { %3524 = vmatpush2.bf16.msra.mxu0 %v4647_v44  ;;  %3565 = vmatpush2.bf16.msra.mxu1 %v4649_v45  ;;  %v4429_v45 = vcombine.low %v373_v28, %v389_v29  ;;  %v228_v28 = vld [vmem:[%s4833_s19 + $0x1c0] sm:$0xff]  ;;  %v213_v29 = vld [vmem:[%s4833_s19 + $0x148] sm:$0xff] }
  0xfc   : > { %3525 = vmatprep.subr.bf16.mxu0 %v4616_v46  ;;  %3566 = vmatprep.subr.bf16.mxu1 %v4618_v47  ;;  %v4396_v46 = vcombine.high %v340_v35, %v356_v36 }
  0xff   : > { %3526 = vmatpush2.bf16.msra.mxu0 %v4615_v52  ;;  %3567 = vmatpush2.bf16.msra.mxu1 %v4617_v53  ;;  %v324_v52 = vld [vmem:[%s4833_s19 + $0x4c0] sm:$0xff] }
 0x100   : > { %3527 = vmatprep.subr.bf16.mxu0 %v4584_v54  ;;  %3568 = vmatprep.subr.bf16.mxu1 %v4586_v55  ;;  %v4364_v2 = vcombine.high %v308_v51, %v324_v52 }
 0x103   : > { %3528 = vmatpush2.bf16.msra.mxu0 %v4583_v60  ;;  %3569 = vmatpush2.bf16.msra.mxu1 %v4585_v61  ;;  %v4395_v60 = vcombine.low %v340_v35, %v356_v36  ;;  %v180_v36 = vld [vmem:[%s4833_s19 + $0x40] sm:$0xff] }
 0x104   : > { %3529 = vmatprep.subr.bf16.mxu0 %v4552_v62  ;;  %3570 = vmatprep.subr.bf16.mxu1 %v4554_v63  ;;  %v4397_v63 = vcombine.low %v341_v38, %v357_v39  ;;  %v181_v38 = vld [vmem:[%s4833_s19 + $0x48] sm:$0xff] }
 0x105   : > { %v197_v39 = vld [vmem:[%s4833_s19 + $0xc8] sm:$0xff] }
 0x107   : > { %3530 = vmatpush2.bf16.msra.mxu0 %v4551_v6  ;;  %3571 = vmatpush2.bf16.msra.mxu1 %v4553_v7  ;;  %v4366_v6 = vcombine.high %v309_v56, %v325_v57  ;;  %v276_v7 = vld [vmem:[%s4833_s19 + $0x340] sm:$0xff] }
 0x108   : > { %3531 = vmatprep.subr.bf16.mxu0 %v4520_v8  ;;  %3572 = vmatprep.subr.bf16.mxu1 %v4522_v9  ;;  %v292_v8 = vld [vmem:[%s4833_s19 + $0x3c0] sm:$0xff] }
 0x10b   : > { %3532 = vmatpush2.bf16.msra.mxu0 %v4519_v14  ;;  %3573 = vmatpush2.bf16.msra.mxu1 %v4521_v15  ;;  %v4363_v15 = vcombine.low %v308_v51, %v324_v52  ;;  %v628_v52 = vld [vmem:[%s4833_s19 + $0xe40] sm:$0xff] }
 0x10c   : > { %3533 = vmatprep.subr.bf16.mxu0 %v4488_v17  ;;  %3574 = vmatprep.subr.bf16.mxu1 %v4490_v18  ;;  %v4365_v17 = vcombine.low %v309_v56, %v325_v57  ;;  %v4332_v18 = vcombine.high %v276_v7, %v292_v8 }
 0x10f   : > { %3534 = vmatpush2.bf16.msra.mxu0 %v4487_v23  ;;  %3575 = vmatpush2.bf16.msra.mxu1 %v4489_v24  ;;  %v261_v23 = vld [vmem:[%s4833_s19 + $0x2c8] sm:$0xff]  ;;  %v4331_v24 = vcombine.low %v276_v7, %v292_v8  ;;  %v580_v7 = vld [vmem:[%s4833_s19 + $0xcc0] sm:$0xff] }
 0x110   : > { %3585 = vmatprep.subr.bf16.mxu0 %v4460_v0  ;;  %3626 = vmatprep.subr.bf16.mxu1 %v4462_v25  ;;  %v4333_v0 = vcombine.low %v277_v12, %v293_v13  ;;  %v4300_v25 = vcombine.high %v244_v20, %v260_v21  ;;  %v4302_v26 = vcombine.high %v245_v22, %v261_v23  ;;  %v565_v8 = vld [vmem:[%s4833_s19 + $0xc48] sm:$0xff] }
 0x112   : > { %v3291_v37 = vpop.f32.mrf.mxu0  ;;  %3536 = vmatmul.mubr.bf16.vlgmr.msra.gmra.mxu0 %v4910_v16  ;;  %v3332_v41 = vpop.f32.mrf.mxu1  ;;  %3577 = vmatmul.mubr.bf16.vlgmr.msra.gmra.mxu1 %v4910_v16 }
 0x113   : > { %v3292_v40 = vadd.f32 %v3291_v37, %v5118_v31  ;;  %3586 = vmatpush1.bf16.msra.mxu0 %v4459_v30  ;;  %v3333_v43 = vadd.f32 %v3332_v41, %v5118_v31  ;;  %3627 = vmatpush1.bf16.msra.mxu1 %v4461_v32  ;;  %v229_v30 = vld [vmem:[%s4833_s19 + $0x1c8] sm:$0xff]  ;;  %v4299_v32 = vcombine.low %v244_v20, %v260_v21  ;;  %v196_v37 = vld [vmem:[%s4833_s19 + $0xc0] sm:$0xff] }
 0x114   : > { %v3293_v44 = vpop.f32.mrf.mxu0  ;;  %3587 = vmatprep.subr.bf16.mxu0 %v4428_v33  ;;  %v3334_v49 = vpop.f32.mrf.mxu1  ;;  %3628 = vmatprep.subr.bf16.mxu1 %v4430_v34  ;;  %v4301_v33 = vcombine.low %v245_v22, %v261_v23  ;;  %v4268_v34 = vcombine.high %v212_v27, %v228_v28  ;;  %v4270_v35 = vcombine.high %v213_v29, %v229_v30  ;;  %v500_v23 = vld [vmem:[%s4833_s19 + $0xa40] sm:$0xff] }
 0x115   : > { %v3945_v47 = vmul.f32 0.2, %v3292_v40  ;;  %v3294_v48 = vadd.f32 %v3293_v44, %v5118_v31  ;;  %3617 = vmatprep.mubr.bf16.mxu0 %v4823_v1  ;;  %vm3913_vm0 = vcmp.ge.f32.partialorder %v3292_v40, 0.0  ;;  %v3947_v53 = vmul.f32 0.2, %v3333_v43  ;;  %3658 = vmatprep.mubr.bf16.mxu1 %v4823_v1  ;;  %v660_v44 = vld [vmem:[%s4833_s19 + $0xf40] sm:$0xff] }
 0x116   : > { %v3335_v54 = vadd.f32 %v3334_v49, %v5118_v31  ;;  %v3295_v55 = vpop.f32.mrf.mxu0  ;;  %vm3915_vm1 = vcmp.ge.f32.partialorder %v3333_v43, 0.0  ;;  %v3336_v59 = vpop.f32.mrf.mxu1  ;;  %v4269_v41 = vcombine.low %v213_v29, %v229_v30  ;;  %v4237_v49 = vcombine.low %v181_v38, %v197_v39  ;;  %v468_v30 = vld [vmem:[%s4833_s19 + $0x940] sm:$0xff] }
 0x117   : > { %vm3914_vm2 = vcmp.ge.f32.partialorder %v3294_v48, 0.0  ;;  %v3946_v58 = vmul.f32 0.2, %v3294_v48  ;;  %3588 = vmatpush1.bf16.msra.mxu0 %v4427_v42  ;;  %3629 = vmatpush1.bf16.msra.mxu1 %v4429_v45  ;;  %v3977_v3 = vsel %vm3913_vm0, %v3292_v40, %v3945_v47  ;;  %v3979_v9 = vsel %vm3915_vm1, %v3333_v43, %v3947_v53  ;;  %v676_v45 = vld [vmem:[%s4833_s19 + $0xfc0] sm:$0xff]  ;;  %v677_v47 = vld [vmem:[%s4833_s19 + $0xfc8] sm:$0xff] }
 0x118   : > { %vm3916_vm3 = vcmp.ge.f32.partialorder %v3335_v54, 0.0  ;;  %v3948_v61 = vmul.f32 0.2, %v3335_v54  ;;  %v3296_v62 = vpop.f32.mrf.mxu0  ;;  %3589 = vmatprep.subr.bf16.mxu0 %v4396_v46  ;;  %v3337_v5 = vpop.f32.mrf.mxu1  ;;  %3630 = vmatprep.subr.bf16.mxu1 %v4398_v50  ;;  %v4267_v40 = vcombine.low %v212_v27, %v228_v28  ;;  %v4236_v42 = vcombine.high %v180_v36, %v196_v37  ;;  %v661_v46 = vld [vmem:[%s4833_s19 + $0xf48] sm:$0xff]  ;;  %v644_v53 = vld [vmem:[%s4833_s19 + $0xec0] sm:$0xff] }
 0x119   : > { %v3978_v4 = vsel %vm3914_vm2, %v3294_v48, %v3946_v58  ;;  %v4238_v43 = vcombine.high %v181_v38, %v197_v39  ;;  %v4235_v48 = vcombine.low %v180_v36, %v196_v37  ;;  %v4716_v50 = vcombine.high %v660_v44, %v676_v45  ;;  %v645_v55 = vld [vmem:[%s4833_s19 + $0xec8] sm:$0xff]  ;;  %v436_v39 = vld [vmem:[%s4833_s19 + $0x840] sm:$0xff] }
 0x11a   : > { %v4751_v10 = vpack.c.bf16 %v3978_v4, %v3977_v3  ;;  %v3980_v11 = vsel %vm3916_vm3, %v3335_v54, %v3948_v61  ;;  %v4718_v51 = vcombine.high %v661_v46, %v677_v47  ;;  %v629_v54 = vld [vmem:[%s4833_s19 + $0xe48] sm:$0xff]  ;;  %v4715_v56 = vcombine.low %v660_v44, %v676_v45  ;;  %v612_v61 = vld [vmem:[%s4833_s19 + $0xdc0] sm:$0xff] }
 0x11b   : > { %v4752_v14 = vpack.c.bf16 %v3980_v11, %v3979_v9  ;;  %3590 = vmatpush1.bf16.msra.mxu0 %v4395_v60  ;;  %3631 = vmatpush1.bf16.msra.mxu1 %v4397_v63  ;;  %v4717_v57 = vcombine.low %v661_v46, %v677_v47  ;;  %v4684_v58 = vcombine.high %v628_v52, %v644_v53  ;;  %v596_v60 = vld [vmem:[%s4833_s19 + $0xd40] sm:$0xff]  ;;  %v597_v62 = vld [vmem:[%s4833_s19 + $0xd48] sm:$0xff]  ;;  %v406_v47 = vld [vmem:[%s4833_s19 + $0x750] sm:$0xff] }
 0x11c   : > { %4137 = vst [vmem:[%s5141_s25] sm:$0xff] %v4751_v10  ;;  %3591 = vmatprep.subr.bf16.mxu0 %v4364_v2  ;;  %3632 = vmatprep.subr.bf16.mxu1 %v4366_v6  ;;  %v4686_v59 = vcombine.high %v629_v54, %v645_v55  ;;  %v613_v63 = vld [vmem:[%s4833_s19 + $0xdc8] sm:$0xff]  ;;  %v4683_v2 = vcombine.low %v628_v52, %v644_v53  ;;  %v564_v6 = vld [vmem:[%s4833_s19 + $0xc40] sm:$0xff] }
 0x11d   : > { %4138 = vst [vmem:[%s5141_s25 + $0x8] sm:$0xff] %v4752_v14  ;;  %v4685_v3 = vcombine.low %v629_v54, %v645_v55  ;;  %v4652_v4 = vcombine.high %v596_v60, %v612_v61  ;;  %v4654_v5 = vcombine.high %v597_v62, %v613_v63  ;;  %v581_v9 = vld [vmem:[%s4833_s19 + $0xcc8] sm:$0xff]  ;;  %v4651_v10 = vcombine.low %v596_v60, %v612_v61  ;;  %v532_v14 = vld [vmem:[%s4833_s19 + $0xb40] sm:$0xff]  ;;  %v374_v55 = vld [vmem:[%s4833_s19 + $0x650] sm:$0xff] }
 0x11e   : > { %v4653_v11 = vcombine.low %v597_v62, %v613_v63  ;;  %v4620_v12 = vcombine.high %v564_v6, %v580_v7  ;;  %v4622_v13 = vcombine.high %v565_v8, %v581_v9  ;;  %v4621_v20 = vcombine.low %v565_v8, %v581_v9  ;;  %v342_v63 = vld [vmem:[%s4833_s19 + $0x550] sm:$0xff] }
 0x11f   : > { %3592 = vmatpush1.bf16.msra.mxu0 %v4363_v15  ;;  %3633 = vmatpush1.bf16.msra.mxu1 %v4365_v17  ;;  %v548_v15 = vld [vmem:[%s4833_s19 + $0xbc0] sm:$0xff]  ;;  %v533_v17 = vld [vmem:[%s4833_s19 + $0xb48] sm:$0xff] }
 0x120   : > { %3593 = vmatprep.subr.bf16.mxu0 %v4332_v18  ;;  %3634 = vmatprep.subr.bf16.mxu1 %v4334_v19  ;;  %v549_v18 = vld [vmem:[%s4833_s19 + $0xbc8] sm:$0xff]  ;;  %v4619_v19 = vcombine.low %v564_v6, %v580_v7  ;;  %v4588_v21 = vcombine.high %v532_v14, %v548_v15 }
 0x121   : > { %v4590_v22 = vcombine.high %v533_v17, %v549_v18  ;;  %v4589_v27 = vcombine.low %v533_v17, %v549_v18  ;;  %v310_v18 = vld [vmem:[%s4833_s19 + $0x450] sm:$0xff] }
 0x123   : > { %3594 = vmatpush1.bf16.msra.mxu0 %v4331_v24  ;;  %3635 = vmatpush1.bf16.msra.mxu1 %v4333_v0  ;;  %v516_v24 = vld [vmem:[%s4833_s19 + $0xac0] sm:$0xff]  ;;  %v501_v0 = vld [vmem:[%s4833_s19 + $0xa48] sm:$0xff] }
 0x124   : > { %3595 = vmatprep.subr.bf16.mxu0 %v4300_v25  ;;  %3636 = vmatprep.subr.bf16.mxu1 %v4302_v26  ;;  %v517_v25 = vld [vmem:[%s4833_s19 + $0xac8] sm:$0xff]  ;;  %v4587_v26 = vcombine.low %v532_v14, %v548_v15  ;;  %v4556_v28 = vcombine.high %v500_v23, %v516_v24 }
 0x125   : > { %v4558_v29 = vcombine.high %v501_v0, %v517_v25  ;;  %v4557_v36 = vcombine.low %v501_v0, %v517_v25 }
 0x127   : > { %3596 = vmatpush1.bf16.msra.mxu0 %v4299_v32  ;;  %3637 = vmatpush1.bf16.msra.mxu1 %v4301_v33  ;;  %v484_v32 = vld [vmem:[%s4833_s19 + $0x9c0] sm:$0xff]  ;;  %v469_v33 = vld [vmem:[%s4833_s19 + $0x948] sm:$0xff] }
 0x128   : > { %3597 = vmatprep.subr.bf16.mxu0 %v4268_v34  ;;  %3638 = vmatprep.subr.bf16.mxu1 %v4270_v35  ;;  %v485_v34 = vld [vmem:[%s4833_s19 + $0x9c8] sm:$0xff]  ;;  %v4555_v35 = vcombine.low %v500_v23, %v516_v24  ;;  %v4524_v37 = vcombine.high %v468_v30, %v484_v32  ;;  %v311_v23 = vld [vmem:[%s4833_s19 + $0x458] sm:$0xff] }
 0x129   : > { %v4526_v38 = vcombine.high %v469_v33, %v485_v34  ;;  %v4525_v44 = vcombine.low %v469_v33, %v485_v34  ;;  %v327_v24 = vld [vmem:[%s4833_s19 + $0x4d8] sm:$0xff] }
 0x12b   : > { %3598 = vmatpush1.bf16.msra.mxu0 %v4267_v40  ;;  %3639 = vmatpush1.bf16.msra.mxu1 %v4269_v41  ;;  %v452_v40 = vld [vmem:[%s4833_s19 + $0x8c0] sm:$0xff]  ;;  %v437_v41 = vld [vmem:[%s4833_s19 + $0x848] sm:$0xff] }
 0x12c   : > { %3599 = vmatprep.subr.bf16.mxu0 %v4236_v42  ;;  %3640 = vmatprep.subr.bf16.mxu1 %v4238_v43  ;;  %v453_v42 = vld [vmem:[%s4833_s19 + $0x8c8] sm:$0xff]  ;;  %v4523_v43 = vcombine.low %v468_v30, %v484_v32  ;;  %v4492_v45 = vcombine.high %v436_v39, %v452_v40 }
 0x12d   : > { %v4494_v46 = vcombine.high %v437_v41, %v453_v42  ;;  %v4493_v52 = vcombine.low %v437_v41, %v453_v42  ;;  %v279_v41 = vld [vmem:[%s4833_s19 + $0x358] sm:$0xff] }
 0x12e   : > { %v295_v42 = vld [vmem:[%s4833_s19 + $0x3d8] sm:$0xff] }
 0x12f   : > { %3600 = vmatpush1.bf16.msra.mxu0 %v4235_v48  ;;  %3641 = vmatpush1.bf16.msra.mxu1 %v4237_v49  ;;  %v422_v48 = vld [vmem:[%s4833_s19 + $0x7d0] sm:$0xff]  ;;  %v407_v49 = vld [vmem:[%s4833_s19 + $0x758] sm:$0xff] }
 0x130   : > { %3601 = vmatprep.subr.bf16.mxu0 %v4716_v50  ;;  %3642 = vmatprep.subr.bf16.mxu1 %v4718_v51  ;;  %v423_v50 = vld [vmem:[%s4833_s19 + $0x7d8] sm:$0xff]  ;;  %v4491_v51 = vcombine.low %v436_v39, %v452_v40  ;;  %v4464_v53 = vcombine.high %v406_v47, %v422_v48 }
 0x131   : > { %v4466_v54 = vcombine.high %v407_v49, %v423_v50  ;;  %v4465_v60 = vcombine.low %v407_v49, %v423_v50  ;;  %v262_v49 = vld [vmem:[%s4833_s19 + $0x2d0] sm:$0xff]  ;;  %v247_v50 = vld [vmem:[%s4833_s19 + $0x258] sm:$0xff] }
 0x133   : > { %3602 = vmatpush2.bf16.msra.mxu0 %v4715_v56  ;;  %3643 = vmatpush2.bf16.msra.mxu1 %v4717_v57  ;;  %v390_v56 = vld [vmem:[%s4833_s19 + $0x6d0] sm:$0xff]  ;;  %v375_v57 = vld [vmem:[%s4833_s19 + $0x658] sm:$0xff] }
 0x134   : > { %3603 = vmatprep.subr.bf16.mxu0 %v4684_v58  ;;  %3644 = vmatprep.subr.bf16.mxu1 %v4686_v59  ;;  %v391_v58 = vld [vmem:[%s4833_s19 + $0x6d8] sm:$0xff]  ;;  %v4463_v59 = vcombine.low %v406_v47, %v422_v48  ;;  %v4432_v61 = vcombine.high %v374_v55, %v390_v56  ;;  %v4431_v8 = vcombine.low %v374_v55, %v390_v56  ;;  %v246_v48 = vld [vmem:[%s4833_s19 + $0x250] sm:$0xff] }
 0x135   : > { %v4434_v62 = vcombine.high %v375_v57, %v391_v58  ;;  %v4338_v47 = vcombine.high %v279_v41, %v295_v42  ;;  %v214_v56 = vld [vmem:[%s4833_s19 + $0x150] sm:$0xff] }
 0x137   : > { %3604 = vmatpush2.bf16.msra.mxu0 %v4683_v2  ;;  %3645 = vmatpush2.bf16.msra.mxu1 %v4685_v3  ;;  %v358_v2 = vld [vmem:[%s4833_s19 + $0x5d0] sm:$0xff] }
 0x138   : > { %3605 = vmatprep.subr.bf16.mxu0 %v4652_v4  ;;  %3646 = vmatprep.subr.bf16.mxu1 %v4654_v5  ;;  %v343_v4 = vld [vmem:[%s4833_s19 + $0x558] sm:$0xff] }
 0x139   : > { %v359_v5 = vld [vmem:[%s4833_s19 + $0x5d8] sm:$0xff] }
 0x13a   : > { %v4402_v17 = vcombine.high %v343_v4, %v359_v5 }
 0x13b   : > { %3606 = vmatpush2.bf16.msra.mxu0 %v4651_v10  ;;  %3647 = vmatpush2.bf16.msra.mxu1 %v4653_v11  ;;  %v4433_v11 = vcombine.low %v375_v57, %v391_v58  ;;  %v230_v57 = vld [vmem:[%s4833_s19 + $0x1d0] sm:$0xff]  ;;  %v215_v58 = vld [vmem:[%s4833_s19 + $0x158] sm:$0xff] }
 0x13c   : > { %3607 = vmatprep.subr.bf16.mxu0 %v4620_v12  ;;  %3648 = vmatprep.subr.bf16.mxu1 %v4622_v13  ;;  %v4400_v12 = vcombine.high %v342_v63, %v358_v2 }
 0x13f   : > { %3608 = vmatpush2.bf16.msra.mxu0 %v4619_v19  ;;  %3649 = vmatpush2.bf16.msra.mxu1 %v4621_v20  ;;  %v326_v19 = vld [vmem:[%s4833_s19 + $0x4d0] sm:$0xff] }
 0x140   : > { %3609 = vmatprep.subr.bf16.mxu0 %v4588_v21  ;;  %3650 = vmatprep.subr.bf16.mxu1 %v4590_v22  ;;  %v4368_v30 = vcombine.high %v310_v18, %v326_v19 }
 0x143   : > { %3610 = vmatpush2.bf16.msra.mxu0 %v4587_v26  ;;  %3651 = vmatpush2.bf16.msra.mxu1 %v4589_v27  ;;  %v4399_v26 = vcombine.low %v342_v63, %v358_v2  ;;  %v182_v2 = vld [vmem:[%s4833_s19 + $0x50] sm:$0xff] }
 0x144   : > { %3611 = vmatprep.subr.bf16.mxu0 %v4556_v28  ;;  %3652 = vmatprep.subr.bf16.mxu1 %v4558_v29  ;;  %v4401_v29 = vcombine.low %v343_v4, %v359_v5  ;;  %v183_v4 = vld [vmem:[%s4833_s19 + $0x58] sm:$0xff] }
 0x145   : > { %v199_v5 = vld [vmem:[%s4833_s19 + $0xd8] sm:$0xff] }
 0x147   : > { %3612 = vmatpush2.bf16.msra.mxu0 %v4555_v35  ;;  %3653 = vmatpush2.bf16.msra.mxu1 %v4557_v36  ;;  %v4370_v35 = vcombine.high %v311_v23, %v327_v24  ;;  %v278_v36 = vld [vmem:[%s4833_s19 + $0x350] sm:$0xff] }
 0x148   : > { %3613 = vmatprep.subr.bf16.mxu0 %v4524_v37  ;;  %3654 = vmatprep.subr.bf16.mxu1 %v4526_v38  ;;  %v294_v37 = vld [vmem:[%s4833_s19 + $0x3d0] sm:$0xff] }
 0x14b   : > { %3614 = vmatpush2.bf16.msra.mxu0 %v4523_v43  ;;  %3655 = vmatpush2.bf16.msra.mxu1 %v4525_v44  ;;  %v4367_v44 = vcombine.low %v310_v18, %v326_v19  ;;  %v630_v19 = vld [vmem:[%s4833_s19 + $0xe50] sm:$0xff] }
 0x14c   : > { %3615 = vmatprep.subr.bf16.mxu0 %v4492_v45  ;;  %3656 = vmatprep.subr.bf16.mxu1 %v4494_v46  ;;  %v4369_v45 = vcombine.low %v311_v23, %v327_v24  ;;  %v4336_v46 = vcombine.high %v278_v36, %v294_v37 }
 0x14f   : > { %3616 = vmatpush2.bf16.msra.mxu0 %v4491_v51  ;;  %3657 = vmatpush2.bf16.msra.mxu1 %v4493_v52  ;;  %v263_v51 = vld [vmem:[%s4833_s19 + $0x2d8] sm:$0xff]  ;;  %v4335_v52 = vcombine.low %v278_v36, %v294_v37  ;;  %v582_v36 = vld [vmem:[%s4833_s19 + $0xcd0] sm:$0xff] }
 0x150   : > { %3667 = vmatprep.subr.bf16.mxu0 %v4464_v53  ;;  %3708 = vmatprep.subr.bf16.mxu1 %v4466_v54  ;;  %v4337_v53 = vcombine.low %v279_v41, %v295_v42  ;;  %v4304_v54 = vcombine.high %v246_v48, %v262_v49  ;;  %v4306_v55 = vcombine.high %v247_v50, %v263_v51  ;;  %v567_v37 = vld [vmem:[%s4833_s19 + $0xc58] sm:$0xff] }
 0x152   : > { %v3373_v3 = vpop.f32.mrf.mxu0  ;;  %3618 = vmatmul.mubr.bf16.vlgmr.msra.gmra.mxu0 %v4910_v16  ;;  %v3414_v7 = vpop.f32.mrf.mxu1  ;;  %3659 = vmatmul.mubr.bf16.vlgmr.msra.gmra.mxu1 %v4910_v16 }
 0x153   : > { %v3374_v6 = vadd.f32 %v3373_v3, %v5118_v31  ;;  %3668 = vmatpush1.bf16.msra.mxu0 %v4463_v59  ;;  %v3415_v9 = vadd.f32 %v3414_v7, %v5118_v31  ;;  %3709 = vmatpush1.bf16.msra.mxu1 %v4465_v60  ;;  %v231_v59 = vld [vmem:[%s4833_s19 + $0x1d8] sm:$0xff]  ;;  %v4303_v60 = vcombine.low %v246_v48, %v262_v49  ;;  %v198_v3 = vld [vmem:[%s4833_s19 + $0xd0] sm:$0xff] }
 0x154   : > { %v3375_v10 = vpop.f32.mrf.mxu0  ;;  %3669 = vmatprep.subr.bf16.mxu0 %v4432_v61  ;;  %v3416_v15 = vpop.f32.mrf.mxu1  ;;  %3710 = vmatprep.subr.bf16.mxu1 %v4434_v62  ;;  %v4305_v61 = vcombine.low %v247_v50, %v263_v51  ;;  %v4272_v62 = vcombine.high %v214_v56, %v230_v57  ;;  %v4274_v63 = vcombine.high %v215_v58, %v231_v59  ;;  %v502_v51 = vld [vmem:[%s4833_s19 + $0xa50] sm:$0xff] }
 0x155   : > { %v3949_v13 = vmul.f32 0.2, %v3374_v6  ;;  %v3376_v14 = vadd.f32 %v3375_v10, %v5118_v31  ;;  %3699 = vmatprep.mubr.bf16.mxu0 %v4823_v1  ;;  %vm3917_vm4 = vcmp.ge.f32.partialorder %v3374_v6, 0.0  ;;  %v3951_v20 = vmul.f32 0.2, %v3415_v9  ;;  %3740 = vmatprep.mubr.bf16.mxu1 %v4823_v1  ;;  %v662_v10 = vld [vmem:[%s4833_s19 + $0xf50] sm:$0xff] }
 0x156   : > { %v3417_v21 = vadd.f32 %v3416_v15, %v5118_v31  ;;  %v3377_v22 = vpop.f32.mrf.mxu0  ;;  %vm3919_vm5 = vcmp.ge.f32.partialorder %v3415_v9, 0.0  ;;  %v3418_v25 = vpop.f32.mrf.mxu1  ;;  %v4273_v7 = vcombine.low %v215_v58, %v231_v59  ;;  %v4241_v15 = vcombine.low %v183_v4, %v199_v5  ;;  %v470_v59 = vld [vmem:[%s4833_s19 + $0x950] sm:$0xff] }
 0x157   : > { %vm3918_vm6 = vcmp.ge.f32.partialorder %v3376_v14, 0.0  ;;  %v3950_v0 = vmul.f32 0.2, %v3376_v14  ;;  %3670 = vmatpush1.bf16.msra.mxu0 %v4431_v8  ;;  %3711 = vmatpush1.bf16.msra.mxu1 %v4433_v11  ;;  %v3981_v32 = vsel %vm3917_vm4, %v3374_v6, %v3949_v13  ;;  %v3983_v38 = vsel %vm3919_vm5, %v3415_v9, %v3951_v20  ;;  %v678_v11 = vld [vmem:[%s4833_s19 + $0xfd0] sm:$0xff]  ;;  %v679_v13 = vld [vmem:[%s4833_s19 + $0xfd8] sm:$0xff] }
 0x158   : > { %vm3920_vm7 = vcmp.ge.f32.partialorder %v3417_v21, 0.0  ;;  %v3952_v27 = vmul.f32 0.2, %v3417_v21  ;;  %v3378_v28 = vpop.f32.mrf.mxu0  ;;  %3671 = vmatprep.subr.bf16.mxu0 %v4400_v12  ;;  %v3419_v34 = vpop.f32.mrf.mxu1  ;;  %3712 = vmatprep.subr.bf16.mxu1 %v4402_v17  ;;  %v4271_v6 = vcombine.low %v214_v56, %v230_v57  ;;  %v4240_v8 = vcombine.high %v182_v2, %v198_v3  ;;  %v663_v12 = vld [vmem:[%s4833_s19 + $0xf58] sm:$0xff]  ;;  %v646_v20 = vld [vmem:[%s4833_s19 + $0xed0] sm:$0xff] }
 0x159   : > { %v3982_v33 = vsel %vm3918_vm6, %v3376_v14, %v3950_v0  ;;  %v4242_v9 = vcombine.high %v183_v4, %v199_v5  ;;  %v4239_v14 = vcombine.low %v182_v2, %v198_v3  ;;  %v4720_v17 = vcombine.high %v662_v10, %v678_v11  ;;  %v647_v22 = vld [vmem:[%s4833_s19 + $0xed8] sm:$0xff]  ;;  %v438_v5 = vld [vmem:[%s4833_s19 + $0x850] sm:$0xff] }
 0x15a   : > { %v4753_v39 = vpack.c.bf16 %v3982_v33, %v3981_v32  ;;  %v3984_v40 = vsel %vm3920_vm7, %v3417_v21, %v3952_v27  ;;  %v4722_v18 = vcombine.high %v663_v12, %v679_v13  ;;  %v631_v21 = vld [vmem:[%s4833_s19 + $0xe58] sm:$0xff]  ;;  %v4719_v23 = vcombine.low %v662_v10, %v678_v11  ;;  %v614_v27 = vld [vmem:[%s4833_s19 + $0xdd0] sm:$0xff] }
 0x15b   : > { %v4754_v43 = vpack.c.bf16 %v3984_v40, %v3983_v38  ;;  %3672 = vmatpush1.bf16.msra.mxu0 %v4399_v26  ;;  %3713 = vmatpush1.bf16.msra.mxu1 %v4401_v29  ;;  %v4721_v24 = vcombine.low %v663_v12, %v679_v13  ;;  %v4688_v0 = vcombine.high %v630_v19, %v646_v20  ;;  %v598_v26 = vld [vmem:[%s4833_s19 + $0xd50] sm:$0xff]  ;;  %v599_v28 = vld [vmem:[%s4833_s19 + $0xd58] sm:$0xff]  ;;  %v408_v13 = vld [vmem:[%s4833_s19 + $0x760] sm:$0xff] }
 0x15c   : > { %4139 = vst [vmem:[%s5141_s25 + $0x10] sm:$0xff] %v4753_v39  ;;  %3673 = vmatprep.subr.bf16.mxu0 %v4368_v30  ;;  %3714 = vmatprep.subr.bf16.mxu1 %v4370_v35  ;;  %v4690_v25 = vcombine.high %v631_v21, %v647_v22  ;;  %v615_v29 = vld [vmem:[%s4833_s19 + $0xdd8] sm:$0xff]  ;;  %v4687_v30 = vcombine.low %v630_v19, %v646_v20  ;;  %v566_v35 = vld [vmem:[%s4833_s19 + $0xc50] sm:$0xff] }
 0x15d   : > { %4140 = vst [vmem:[%s5141_s25 + $0x18] sm:$0xff] %v4754_v43  ;;  %v4689_v32 = vcombine.low %v631_v21, %v647_v22  ;;  %v4656_v33 = vcombine.high %v598_v26, %v614_v27  ;;  %v4658_v34 = vcombine.high %v599_v28, %v615_v29  ;;  %v583_v38 = vld [vmem:[%s4833_s19 + $0xcd8] sm:$0xff]  ;;  %v4655_v39 = vcombine.low %v598_v26, %v614_v27  ;;  %v534_v43 = vld [vmem:[%s4833_s19 + $0xb50] sm:$0xff]  ;;  %v376_v22 = vld [vmem:[%s4833_s19 + $0x660] sm:$0xff] }
 0x15e   : > { %v4657_v40 = vcombine.low %v599_v28, %v615_v29  ;;  %v4624_v41 = vcombine.high %v566_v35, %v582_v36  ;;  %v4626_v42 = vcombine.high %v567_v37, %v583_v38  ;;  %v4625_v48 = vcombine.low %v567_v37, %v583_v38  ;;  %v344_v29 = vld [vmem:[%s4833_s19 + $0x560] sm:$0xff] }
 0x15f   : > { %3674 = vmatpush1.bf16.msra.mxu0 %v4367_v44  ;;  %3715 = vmatpush1.bf16.msra.mxu1 %v4369_v45  ;;  %v550_v44 = vld [vmem:[%s4833_s19 + $0xbd0] sm:$0xff]  ;;  %v535_v45 = vld [vmem:[%s4833_s19 + $0xb58] sm:$0xff] }
 0x160   : > { %3675 = vmatprep.subr.bf16.mxu0 %v4336_v46  ;;  %3716 = vmatprep.subr.bf16.mxu1 %v4338_v47  ;;  %v551_v46 = vld [vmem:[%s4833_s19 + $0xbd8] sm:$0xff]  ;;  %v4623_v47 = vcombine.low %v566_v35, %v582_v36  ;;  %v4592_v49 = vcombine.high %v534_v43, %v550_v44 }
 0x161   : > { %v4594_v50 = vcombine.high %v535_v45, %v551_v46  ;;  %v4593_v56 = vcombine.low %v535_v45, %v551_v46  ;;  %v312_v46 = vld [vmem:[%s4833_s19 + $0x460] sm:$0xff] }
 0x163   : > { %3676 = vmatpush1.bf16.msra.mxu0 %v4335_v52  ;;  %3717 = vmatpush1.bf16.msra.mxu1 %v4337_v53  ;;  %v518_v52 = vld [vmem:[%s4833_s19 + $0xad0] sm:$0xff]  ;;  %v503_v53 = vld [vmem:[%s4833_s19 + $0xa58] sm:$0xff] }
 0x164   : > { %3677 = vmatprep.subr.bf16.mxu0 %v4304_v54  ;;  %3718 = vmatprep.subr.bf16.mxu1 %v4306_v55  ;;  %v519_v54 = vld [vmem:[%s4833_s19 + $0xad8] sm:$0xff]  ;;  %v4591_v55 = vcombine.low %v534_v43, %v550_v44  ;;  %v4560_v57 = vcombine.high %v502_v51, %v518_v52 }
 0x165   : > { %v4562_v58 = vcombine.high %v503_v53, %v519_v54  ;;  %v4561_v2 = vcombine.low %v503_v53, %v519_v54 }
 0x167   : > { %3678 = vmatpush1.bf16.msra.mxu0 %v4303_v60  ;;  %3719 = vmatpush1.bf16.msra.mxu1 %v4305_v61  ;;  %v486_v60 = vld [vmem:[%s4833_s19 + $0x9d0] sm:$0xff]  ;;  %v471_v61 = vld [vmem:[%s4833_s19 + $0x958] sm:$0xff] }
 0x168   : > { %3679 = vmatprep.subr.bf16.mxu0 %v4272_v62  ;;  %3720 = vmatprep.subr.bf16.mxu1 %v4274_v63  ;;  %v487_v62 = vld [vmem:[%s4833_s19 + $0x9d8] sm:$0xff]  ;;  %v4559_v63 = vcombine.low %v502_v51, %v518_v52  ;;  %v4528_v3 = vcombine.high %v470_v59, %v486_v60  ;;  %v313_v51 = vld [vmem:[%s4833_s19 + $0x468] sm:$0xff] }
 0x169   : > { %v4530_v4 = vcombine.high %v471_v61, %v487_v62  ;;  %v4529_v10 = vcombine.low %v471_v61, %v487_v62  ;;  %v329_v52 = vld [vmem:[%s4833_s19 + $0x4e8] sm:$0xff] }
 0x16b   : > { %3680 = vmatpush1.bf16.msra.mxu0 %v4271_v6  ;;  %3721 = vmatpush1.bf16.msra.mxu1 %v4273_v7  ;;  %v454_v6 = vld [vmem:[%s4833_s19 + $0x8d0] sm:$0xff]  ;;  %v439_v7 = vld [vmem:[%s4833_s19 + $0x858] sm:$0xff] }
 0x16c   : > { %3681 = vmatprep.subr.bf16.mxu0 %v4240_v8  ;;  %3722 = vmatprep.subr.bf16.mxu1 %v4242_v9  ;;  %v455_v8 = vld [vmem:[%s4833_s19 + $0x8d8] sm:$0xff]  ;;  %v4527_v9 = vcombine.low %v470_v59, %v486_v60  ;;  %v4496_v11 = vcombine.high %v438_v5, %v454_v6 }
 0x16d   : > { %v4498_v12 = vcombine.high %v439_v7, %v455_v8  ;;  %v4497_v19 = vcombine.low %v439_v7, %v455_v8  ;;  %v281_v7 = vld [vmem:[%s4833_s19 + $0x368] sm:$0xff] }
 0x16e   : > { %v297_v8 = vld [vmem:[%s4833_s19 + $0x3e8] sm:$0xff] }
 0x16f   : > { %3682 = vmatpush1.bf16.msra.mxu0 %v4239_v14  ;;  %3723 = vmatpush1.bf16.msra.mxu1 %v4241_v15  ;;  %v424_v14 = vld [vmem:[%s4833_s19 + $0x7e0] sm:$0xff]  ;;  %v409_v15 = vld [vmem:[%s4833_s19 + $0x768] sm:$0xff] }
 0x170   : > { %3683 = vmatprep.subr.bf16.mxu0 %v4720_v17  ;;  %3724 = vmatprep.subr.bf16.mxu1 %v4722_v18  ;;  %v425_v17 = vld [vmem:[%s4833_s19 + $0x7e8] sm:$0xff]  ;;  %v4495_v18 = vcombine.low %v438_v5, %v454_v6  ;;  %v4468_v20 = vcombine.high %v408_v13, %v424_v14 }
 0x171   : > { %v4470_v21 = vcombine.high %v409_v15, %v425_v17  ;;  %v4469_v26 = vcombine.low %v409_v15, %v425_v17  ;;  %v264_v15 = vld [vmem:[%s4833_s19 + $0x2e0] sm:$0xff]  ;;  %v249_v17 = vld [vmem:[%s4833_s19 + $0x268] sm:$0xff] }
 0x173   : > { %3684 = vmatpush2.bf16.msra.mxu0 %v4719_v23  ;;  %3725 = vmatpush2.bf16.msra.mxu1 %v4721_v24  ;;  %v392_v23 = vld [vmem:[%s4833_s19 + $0x6e0] sm:$0xff]  ;;  %v377_v24 = vld [vmem:[%s4833_s19 + $0x668] sm:$0xff] }
 0x174   : > { %3685 = vmatprep.subr.bf16.mxu0 %v4688_v0  ;;  %3726 = vmatprep.subr.bf16.mxu1 %v4690_v25  ;;  %v393_v0 = vld [vmem:[%s4833_s19 + $0x6e8] sm:$0xff]  ;;  %v4467_v25 = vcombine.low %v408_v13, %v424_v14  ;;  %v4436_v27 = vcombine.high %v376_v22, %v392_v23  ;;  %v4435_v37 = vcombine.low %v376_v22, %v392_v23  ;;  %v248_v14 = vld [vmem:[%s4833_s19 + $0x260] sm:$0xff] }
 0x175   : > { %v4438_v28 = vcombine.high %v377_v24, %v393_v0  ;;  %v4342_v13 = vcombine.high %v281_v7, %v297_v8  ;;  %v216_v23 = vld [vmem:[%s4833_s19 + $0x160] sm:$0xff] }
 0x177   : > { %3686 = vmatpush2.bf16.msra.mxu0 %v4687_v30  ;;  %3727 = vmatpush2.bf16.msra.mxu1 %v4689_v32  ;;  %v360_v30 = vld [vmem:[%s4833_s19 + $0x5e0] sm:$0xff] }
 0x178   : > { %3687 = vmatprep.subr.bf16.mxu0 %v4656_v33  ;;  %3728 = vmatprep.subr.bf16.mxu1 %v4658_v34  ;;  %v345_v33 = vld [vmem:[%s4833_s19 + $0x568] sm:$0xff] }
 0x179   : > { %v361_v34 = vld [vmem:[%s4833_s19 + $0x5e8] sm:$0xff] }
 0x17a   : > { %v4406_v45 = vcombine.high %v345_v33, %v361_v34 }
 0x17b   : > { %3688 = vmatpush2.bf16.msra.mxu0 %v4655_v39  ;;  %3729 = vmatpush2.bf16.msra.mxu1 %v4657_v40  ;;  %v4437_v40 = vcombine.low %v377_v24, %v393_v0  ;;  %v232_v24 = vld [vmem:[%s4833_s19 + $0x1e0] sm:$0xff]  ;;  %v217_v0 = vld [vmem:[%s4833_s19 + $0x168] sm:$0xff] }
 0x17c   : > { %3689 = vmatprep.subr.bf16.mxu0 %v4624_v41  ;;  %3730 = vmatprep.subr.bf16.mxu1 %v4626_v42  ;;  %v4404_v41 = vcombine.high %v344_v29, %v360_v30 }
 0x17f   : > { %3690 = vmatpush2.bf16.msra.mxu0 %v4623_v47  ;;  %3731 = vmatpush2.bf16.msra.mxu1 %v4625_v48  ;;  %v328_v47 = vld [vmem:[%s4833_s19 + $0x4e0] sm:$0xff] }
 0x180   : > { %3691 = vmatprep.subr.bf16.mxu0 %v4592_v49  ;;  %3732 = vmatprep.subr.bf16.mxu1 %v4594_v50  ;;  %v4372_v59 = vcombine.high %v312_v46, %v328_v47 }
 0x183   : > { %3692 = vmatpush2.bf16.msra.mxu0 %v4591_v55  ;;  %3733 = vmatpush2.bf16.msra.mxu1 %v4593_v56  ;;  %v4403_v55 = vcombine.low %v344_v29, %v360_v30  ;;  %v184_v30 = vld [vmem:[%s4833_s19 + $0x60] sm:$0xff] }
 0x184   : > { %3693 = vmatprep.subr.bf16.mxu0 %v4560_v57  ;;  %3734 = vmatprep.subr.bf16.mxu1 %v4562_v58  ;;  %v4405_v58 = vcombine.low %v345_v33, %v361_v34  ;;  %v185_v33 = vld [vmem:[%s4833_s19 + $0x68] sm:$0xff] }
 0x185   : > { %v201_v34 = vld [vmem:[%s4833_s19 + $0xe8] sm:$0xff] }
 0x187   : > { %3694 = vmatpush2.bf16.msra.mxu0 %v4559_v63  ;;  %3735 = vmatpush2.bf16.msra.mxu1 %v4561_v2  ;;  %v4374_v63 = vcombine.high %v313_v51, %v329_v52  ;;  %v280_v2 = vld [vmem:[%s4833_s19 + $0x360] sm:$0xff] }
 0x188   : > { %3695 = vmatprep.subr.bf16.mxu0 %v4528_v3  ;;  %3736 = vmatprep.subr.bf16.mxu1 %v4530_v4  ;;  %v296_v3 = vld [vmem:[%s4833_s19 + $0x3e0] sm:$0xff] }
 0x18b   : > { %3696 = vmatpush2.bf16.msra.mxu0 %v4527_v9  ;;  %3737 = vmatpush2.bf16.msra.mxu1 %v4529_v10  ;;  %v4371_v10 = vcombine.low %v312_v46, %v328_v47  ;;  %v632_v47 = vld [vmem:[%s4833_s19 + $0xe60] sm:$0xff] }
 0x18c   : > { %3697 = vmatprep.subr.bf16.mxu0 %v4496_v11  ;;  %3738 = vmatprep.subr.bf16.mxu1 %v4498_v12  ;;  %v4373_v11 = vcombine.low %v313_v51, %v329_v52  ;;  %v4340_v12 = vcombine.high %v280_v2, %v296_v3 }
 0x18f   : > { %3698 = vmatpush2.bf16.msra.mxu0 %v4495_v18  ;;  %3739 = vmatpush2.bf16.msra.mxu1 %v4497_v19  ;;  %v265_v18 = vld [vmem:[%s4833_s19 + $0x2e8] sm:$0xff]  ;;  %v4339_v19 = vcombine.low %v280_v2, %v296_v3  ;;  %v584_v2 = vld [vmem:[%s4833_s19 + $0xce0] sm:$0xff] }
 0x190   : > { %3749 = vmatprep.subr.bf16.mxu0 %v4468_v20  ;;  %3790 = vmatprep.subr.bf16.mxu1 %v4470_v21  ;;  %v4341_v20 = vcombine.low %v281_v7, %v297_v8  ;;  %v4308_v21 = vcombine.high %v248_v14, %v264_v15  ;;  %v4310_v22 = vcombine.high %v249_v17, %v265_v18  ;;  %v569_v3 = vld [vmem:[%s4833_s19 + $0xc68] sm:$0xff] }
 0x192   : > { %v3455_v32 = vpop.f32.mrf.mxu0  ;;  %3700 = vmatmul.mubr.bf16.vlgmr.msra.gmra.mxu0 %v4910_v16  ;;  %v3496_v36 = vpop.f32.mrf.mxu1  ;;  %3741 = vmatmul.mubr.bf16.vlgmr.msra.gmra.mxu1 %v4910_v16 }
 0x193   : > { %v3456_v35 = vadd.f32 %v3455_v32, %v5118_v31  ;;  %3750 = vmatpush1.bf16.msra.mxu0 %v4467_v25  ;;  %v3497_v38 = vadd.f32 %v3496_v36, %v5118_v31  ;;  %3791 = vmatpush1.bf16.msra.mxu1 %v4469_v26  ;;  %v233_v25 = vld [vmem:[%s4833_s19 + $0x1e8] sm:$0xff]  ;;  %v4307_v26 = vcombine.low %v248_v14, %v264_v15  ;;  %v200_v32 = vld [vmem:[%s4833_s19 + $0xe0] sm:$0xff] }
 0x194   : > { %v3457_v39 = vpop.f32.mrf.mxu0  ;;  %3751 = vmatprep.subr.bf16.mxu0 %v4436_v27  ;;  %v3498_v44 = vpop.f32.mrf.mxu1  ;;  %3792 = vmatprep.subr.bf16.mxu1 %v4438_v28  ;;  %v4309_v27 = vcombine.low %v249_v17, %v265_v18  ;;  %v4276_v28 = vcombine.high %v216_v23, %v232_v24  ;;  %v4278_v29 = vcombine.high %v217_v0, %v233_v25  ;;  %v504_v18 = vld [vmem:[%s4833_s19 + $0xa60] sm:$0xff] }
 0x195   : > { %v3953_v42 = vmul.f32 0.2, %v3456_v35  ;;  %v3458_v43 = vadd.f32 %v3457_v39, %v5118_v31  ;;  %3781 = vmatprep.mubr.bf16.mxu0 %v4823_v1  ;;  %vm3921_vm8 = vcmp.ge.f32.partialorder %v3456_v35, 0.0  ;;  %v3955_v48 = vmul.f32 0.2, %v3497_v38  ;;  %3822 = vmatprep.mubr.bf16.mxu1 %v4823_v1  ;;  %v664_v39 = vld [vmem:[%s4833_s19 + $0xf60] sm:$0xff] }
 0x196   : > { %v3499_v49 = vadd.f32 %v3498_v44, %v5118_v31  ;;  %v3459_v50 = vpop.f32.mrf.mxu0  ;;  %vm3923_vm9 = vcmp.ge.f32.partialorder %v3497_v38, 0.0  ;;  %v3500_v54 = vpop.f32.mrf.mxu1  ;;  %v4277_v36 = vcombine.low %v217_v0, %v233_v25  ;;  %v4245_v44 = vcombine.low %v185_v33, %v201_v34  ;;  %v472_v25 = vld [vmem:[%s4833_s19 + $0x960] sm:$0xff] }
 0x197   : > { %vm3922_vm10 = vcmp.ge.f32.partialorder %v3458_v43, 0.0  ;;  %v3954_v53 = vmul.f32 0.2, %v3458_v43  ;;  %3752 = vmatpush1.bf16.msra.mxu0 %v4435_v37  ;;  %3793 = vmatpush1.bf16.msra.mxu1 %v4437_v40  ;;  %v3985_v60 = vsel %vm3921_vm8, %v3456_v35, %v3953_v42  ;;  %v3987_v4 = vsel %vm3923_vm9, %v3497_v38, %v3955_v48  ;;  %v680_v40 = vld [vmem:[%s4833_s19 + $0xfe0] sm:$0xff]  ;;  %v681_v42 = vld [vmem:[%s4833_s19 + $0xfe8] sm:$0xff] }
 0x198   : > { %vm3924_vm11 = vcmp.ge.f32.partialorder %v3499_v49, 0.0  ;;  %v3956_v56 = vmul.f32 0.2, %v3499_v49  ;;  %v3460_v57 = vpop.f32.mrf.mxu0  ;;  %3753 = vmatprep.subr.bf16.mxu0 %v4404_v41  ;;  %v3501_v62 = vpop.f32.mrf.mxu1  ;;  %3794 = vmatprep.subr.bf16.mxu1 %v4406_v45  ;;  %v4275_v35 = vcombine.low %v216_v23, %v232_v24  ;;  %v4244_v37 = vcombine.high %v184_v30, %v200_v32  ;;  %v665_v41 = vld [vmem:[%s4833_s19 + $0xf68] sm:$0xff]  ;;  %v648_v48 = vld [vmem:[%s4833_s19 + $0xee0] sm:$0xff] }
 0x199   : > { %v3986_v61 = vsel %vm3922_vm10, %v3458_v43, %v3954_v53  ;;  %v4246_v38 = vcombine.high %v185_v33, %v201_v34  ;;  %v4243_v43 = vcombine.low %v184_v30, %v200_v32  ;;  %v4724_v45 = vcombine.high %v664_v39, %v680_v40  ;;  %v649_v50 = vld [vmem:[%s4833_s19 + $0xee8] sm:$0xff]  ;;  %v440_v34 = vld [vmem:[%s4833_s19 + $0x860] sm:$0xff] }
 0x19a   : > { %v4755_v5 = vpack.c.bf16 %v3986_v61, %v3985_v60  ;;  %v3988_v6 = vsel %vm3924_vm11, %v3499_v49, %v3956_v56  ;;  %v4726_v46 = vcombine.high %v665_v41, %v681_v42  ;;  %v633_v49 = vld [vmem:[%s4833_s19 + $0xe68] sm:$0xff]  ;;  %v4723_v51 = vcombine.low %v664_v39, %v680_v40  ;;  %v616_v56 = vld [vmem:[%s4833_s19 + $0xde0] sm:$0xff] }
 0x19b   : > { %v4756_v9 = vpack.c.bf16 %v3988_v6, %v3987_v4  ;;  %3754 = vmatpush1.bf16.msra.mxu0 %v4403_v55  ;;  %3795 = vmatpush1.bf16.msra.mxu1 %v4405_v58  ;;  %v4725_v52 = vcombine.low %v665_v41, %v681_v42  ;;  %v4692_v53 = vcombine.high %v632_v47, %v648_v48  ;;  %v600_v55 = vld [vmem:[%s4833_s19 + $0xd60] sm:$0xff]  ;;  %v601_v57 = vld [vmem:[%s4833_s19 + $0xd68] sm:$0xff]  ;;  %v410_v42 = vld [vmem:[%s4833_s19 + $0x770] sm:$0xff] }
 0x19c   : > { %4141 = vst [vmem:[%s5141_s25 + $0x20] sm:$0xff] %v4755_v5  ;;  %3755 = vmatprep.subr.bf16.mxu0 %v4372_v59  ;;  %3796 = vmatprep.subr.bf16.mxu1 %v4374_v63  ;;  %v4694_v54 = vcombine.high %v633_v49, %v649_v50  ;;  %v617_v58 = vld [vmem:[%s4833_s19 + $0xde8] sm:$0xff]  ;;  %v4691_v59 = vcombine.low %v632_v47, %v648_v48  ;;  %v568_v63 = vld [vmem:[%s4833_s19 + $0xc60] sm:$0xff] }
 0x19d   : > { %4142 = vst [vmem:[%s5141_s25 + $0x28] sm:$0xff] %v4756_v9  ;;  %v4693_v60 = vcombine.low %v633_v49, %v649_v50  ;;  %v4660_v61 = vcombine.high %v600_v55, %v616_v56  ;;  %v4662_v62 = vcombine.high %v601_v57, %v617_v58  ;;  %v585_v4 = vld [vmem:[%s4833_s19 + $0xce8] sm:$0xff]  ;;  %v4659_v5 = vcombine.low %v600_v55, %v616_v56  ;;  %v536_v9 = vld [vmem:[%s4833_s19 + $0xb60] sm:$0xff]  ;;  %v378_v50 = vld [vmem:[%s4833_s19 + $0x670] sm:$0xff] }
 0x19e   : > { %v4661_v6 = vcombine.low %v601_v57, %v617_v58  ;;  %v4628_v7 = vcombine.high %v568_v63, %v584_v2  ;;  %v4630_v8 = vcombine.high %v569_v3, %v585_v4  ;;  %v4629_v14 = vcombine.low %v569_v3, %v585_v4  ;;  %v346_v58 = vld [vmem:[%s4833_s19 + $0x570] sm:$0xff] }
 0x19f   : > { %3756 = vmatpush1.bf16.msra.mxu0 %v4371_v10  ;;  %3797 = vmatpush1.bf16.msra.mxu1 %v4373_v11  ;;  %v552_v10 = vld [vmem:[%s4833_s19 + $0xbe0] sm:$0xff]  ;;  %v537_v11 = vld [vmem:[%s4833_s19 + $0xb68] sm:$0xff] }
 0x1a0   : > { %3757 = vmatprep.subr.bf16.mxu0 %v4340_v12  ;;  %3798 = vmatprep.subr.bf16.mxu1 %v4342_v13  ;;  %v553_v12 = vld [vmem:[%s4833_s19 + $0xbe8] sm:$0xff]  ;;  %v4627_v13 = vcombine.low %v568_v63, %v584_v2  ;;  %v4596_v15 = vcombine.high %v536_v9, %v552_v10 }
 0x1a1   : > { %v4598_v17 = vcombine.high %v537_v11, %v553_v12  ;;  %v4597_v23 = vcombine.low %v537_v11, %v553_v12  ;;  %v314_v12 = vld [vmem:[%s4833_s19 + $0x470] sm:$0xff] }
 0x1a3   : > { %3758 = vmatpush1.bf16.msra.mxu0 %v4339_v19  ;;  %3799 = vmatpush1.bf16.msra.mxu1 %v4341_v20  ;;  %v520_v19 = vld [vmem:[%s4833_s19 + $0xae0] sm:$0xff]  ;;  %v505_v20 = vld [vmem:[%s4833_s19 + $0xa68] sm:$0xff] }
 0x1a4   : > { %3759 = vmatprep.subr.bf16.mxu0 %v4308_v21  ;;  %3800 = vmatprep.subr.bf16.mxu1 %v4310_v22  ;;  %v521_v21 = vld [vmem:[%s4833_s19 + $0xae8] sm:$0xff]  ;;  %v4595_v22 = vcombine.low %v536_v9, %v552_v10  ;;  %v4564_v24 = vcombine.high %v504_v18, %v520_v19 }
 0x1a5   : > { %v4566_v0 = vcombine.high %v505_v20, %v521_v21  ;;  %v4565_v30 = vcombine.low %v505_v20, %v521_v21 }
 0x1a7   : > { %3760 = vmatpush1.bf16.msra.mxu0 %v4307_v26  ;;  %3801 = vmatpush1.bf16.msra.mxu1 %v4309_v27  ;;  %v488_v26 = vld [vmem:[%s4833_s19 + $0x9e0] sm:$0xff]  ;;  %v473_v27 = vld [vmem:[%s4833_s19 + $0x968] sm:$0xff] }
 0x1a8   : > { %3761 = vmatprep.subr.bf16.mxu0 %v4276_v28  ;;  %3802 = vmatprep.subr.bf16.mxu1 %v4278_v29  ;;  %v489_v28 = vld [vmem:[%s4833_s19 + $0x9e8] sm:$0xff]  ;;  %v4563_v29 = vcombine.low %v504_v18, %v520_v19  ;;  %v4532_v32 = vcombine.high %v472_v25, %v488_v26  ;;  %v315_v18 = vld [vmem:[%s4833_s19 + $0x478] sm:$0xff] }
 0x1a9   : > { %v4534_v33 = vcombine.high %v473_v27, %v489_v28  ;;  %v4533_v39 = vcombine.low %v473_v27, %v489_v28  ;;  %v331_v19 = vld [vmem:[%s4833_s19 + $0x4f8] sm:$0xff] }
 0x1aa   : > { %v4378_v28 = vcombine.high %v315_v18, %v331_v19 }
 0x1ab   : > { %3762 = vmatpush1.bf16.msra.mxu0 %v4275_v35  ;;  %3803 = vmatpush1.bf16.msra.mxu1 %v4277_v36  ;;  %v456_v35 = vld [vmem:[%s4833_s19 + $0x8e0] sm:$0xff]  ;;  %v441_v36 = vld [vmem:[%s4833_s19 + $0x868] sm:$0xff] }
 0x1ac   : > { %3763 = vmatprep.subr.bf16.mxu0 %v4244_v37  ;;  %3804 = vmatprep.subr.bf16.mxu1 %v4246_v38  ;;  %v457_v37 = vld [vmem:[%s4833_s19 + $0x8e8] sm:$0xff]  ;;  %v4531_v38 = vcombine.low %v472_v25, %v488_v26  ;;  %v4500_v40 = vcombine.high %v440_v34, %v456_v35 }
 0x1ad   : > { %v4502_v41 = vcombine.high %v441_v36, %v457_v37  ;;  %v4501_v47 = vcombine.low %v441_v36, %v457_v37  ;;  %v299_v36 = vld [vmem:[%s4833_s19 + $0x3f8] sm:$0xff] }
 0x1af   : > { %3764 = vmatpush1.bf16.msra.mxu0 %v4243_v43  ;;  %3805 = vmatpush1.bf16.msra.mxu1 %v4245_v44  ;;  %v426_v43 = vld [vmem:[%s4833_s19 + $0x7f0] sm:$0xff]  ;;  %v411_v44 = vld [vmem:[%s4833_s19 + $0x778] sm:$0xff] }
 0x1b0   : > { %3765 = vmatprep.subr.bf16.mxu0 %v4724_v45  ;;  %3806 = vmatprep.subr.bf16.mxu1 %v4726_v46  ;;  %v427_v45 = vld [vmem:[%s4833_s19 + $0x7f8] sm:$0xff]  ;;  %v4499_v46 = vcombine.low %v440_v34, %v456_v35  ;;  %v4472_v48 = vcombine.high %v410_v42, %v426_v43 }
 0x1b1   : > { %v4474_v49 = vcombine.high %v411_v44, %v427_v45  ;;  %v4473_v55 = vcombine.low %v411_v44, %v427_v45  ;;  %v283_v35 = vld [vmem:[%s4833_s19 + $0x378] sm:$0xff] }
 0x1b2   : > { %v251_v44 = vld [vmem:[%s4833_s19 + $0x278] sm:$0xff] }
 0x1b3   : > { %3766 = vmatpush2.bf16.msra.mxu0 %v4723_v51  ;;  %3807 = vmatpush2.bf16.msra.mxu1 %v4725_v52  ;;  %v394_v51 = vld [vmem:[%s4833_s19 + $0x6f0] sm:$0xff]  ;;  %v379_v52 = vld [vmem:[%s4833_s19 + $0x678] sm:$0xff] }
 0x1b4   : > { %3767 = vmatprep.subr.bf16.mxu0 %v4692_v53  ;;  %3808 = vmatprep.subr.bf16.mxu1 %v4694_v54  ;;  %v395_v53 = vld [vmem:[%s4833_s19 + $0x6f8] sm:$0xff]  ;;  %v4471_v54 = vcombine.low %v410_v42, %v426_v43  ;;  %v4440_v56 = vcombine.high %v378_v50, %v394_v51  ;;  %v4439_v3 = vcombine.low %v378_v50, %v394_v51  ;;  %v250_v42 = vld [vmem:[%s4833_s19 + $0x270] sm:$0xff] }
 0x1b5   : > { %v4442_v57 = vcombine.high %v379_v52, %v395_v53  ;;  %v266_v43 = vld [vmem:[%s4833_s19 + $0x2f0] sm:$0xff]  ;;  %v267_v45 = vld [vmem:[%s4833_s19 + $0x2f8] sm:$0xff] }
 0x1b6   : > { %v218_v50 = vld [vmem:[%s4833_s19 + $0x170] sm:$0xff] }
 0x1b7   : > { %3768 = vmatpush2.bf16.msra.mxu0 %v4691_v59  ;;  %3809 = vmatpush2.bf16.msra.mxu1 %v4693_v60  ;;  %v362_v59 = vld [vmem:[%s4833_s19 + $0x5f0] sm:$0xff] }
 0x1b8   : > { %3769 = vmatprep.subr.bf16.mxu0 %v4660_v61  ;;  %3810 = vmatprep.subr.bf16.mxu1 %v4662_v62  ;;  %v347_v61 = vld [vmem:[%s4833_s19 + $0x578] sm:$0xff]  ;;  %v234_v51 = vld [vmem:[%s4833_s19 + $0x1f0] sm:$0xff] }
 0x1b9   : > { %v363_v62 = vld [vmem:[%s4833_s19 + $0x5f8] sm:$0xff] }
 0x1ba   : > { %v4410_v11 = vcombine.high %v347_v61, %v363_v62 }
 0x1bb   : > { %3770 = vmatpush2.bf16.msra.mxu0 %v4659_v5  ;;  %3811 = vmatpush2.bf16.msra.mxu1 %v4661_v6  ;;  %v4441_v6 = vcombine.low %v379_v52, %v395_v53  ;;  %v219_v52 = vld [vmem:[%s4833_s19 + $0x178] sm:$0xff] }
 0x1bc   : > { %3771 = vmatprep.subr.bf16.mxu0 %v4628_v7  ;;  %3812 = vmatprep.subr.bf16.mxu1 %v4630_v8  ;;  %v4408_v7 = vcombine.high %v346_v58, %v362_v59  ;;  %v235_v53 = vld [vmem:[%s4833_s19 + $0x1f8] sm:$0xff] }
 0x1bf   : > { %3772 = vmatpush2.bf16.msra.mxu0 %v4627_v13  ;;  %3813 = vmatpush2.bf16.msra.mxu1 %v4629_v14  ;;  %v330_v13 = vld [vmem:[%s4833_s19 + $0x4f0] sm:$0xff] }
 0x1c0   : > { %3773 = vmatprep.subr.bf16.mxu0 %v4596_v15  ;;  %3814 = vmatprep.subr.bf16.mxu1 %v4598_v17  ;;  %v4376_v25 = vcombine.high %v314_v12, %v330_v13 }
 0x1c3   : > { %3774 = vmatpush2.bf16.msra.mxu0 %v4595_v22  ;;  %3815 = vmatpush2.bf16.msra.mxu1 %v4597_v23  ;;  %v4407_v22 = vcombine.low %v346_v58, %v362_v59  ;;  %v186_v58 = vld [vmem:[%s4833_s19 + $0x70] sm:$0xff] }
 0x1c4   : > { %3775 = vmatprep.subr.bf16.mxu0 %v4564_v24  ;;  %3816 = vmatprep.subr.bf16.mxu1 %v4566_v0  ;;  %v4409_v0 = vcombine.low %v347_v61, %v363_v62  ;;  %v202_v59 = vld [vmem:[%s4833_s19 + $0xf0] sm:$0xff]  ;;  %v203_v61 = vld [vmem:[%s4833_s19 + $0xf8] sm:$0xff]  ;;  %v4279_v62 = vcombine.low %v218_v50, %v234_v51 }
 0x1c7   : > { %3776 = vmatpush2.bf16.msra.mxu0 %v4563_v29  ;;  %3817 = vmatpush2.bf16.msra.mxu1 %v4565_v30  ;;  %v282_v29 = vld [vmem:[%s4833_s19 + $0x370] sm:$0xff] }
 0x1c8   : > { %3777 = vmatprep.subr.bf16.mxu0 %v4532_v32  ;;  %3818 = vmatprep.subr.bf16.mxu1 %v4534_v33  ;;  %v298_v30 = vld [vmem:[%s4833_s19 + $0x3f0] sm:$0xff] }
 0x1cb   : > { %3778 = vmatpush2.bf16.msra.mxu0 %v4531_v38  ;;  %3819 = vmatpush2.bf16.msra.mxu1 %v4533_v39  ;;  %v4375_v38 = vcombine.low %v314_v12, %v330_v13  ;;  %v4377_v39 = vcombine.low %v315_v18, %v331_v19  ;;  %v634_v12 = vld [vmem:[%s4833_s19 + $0xe70] sm:$0xff] }
 0x1cc   : > { %3779 = vmatprep.subr.bf16.mxu0 %v4500_v40  ;;  %3820 = vmatprep.subr.bf16.mxu1 %v4502_v41  ;;  %v4344_v40 = vcombine.high %v282_v29, %v298_v30  ;;  %v4346_v41 = vcombine.high %v283_v35, %v299_v36  ;;  %v650_v13 = vld [vmem:[%s4833_s19 + $0xef0] sm:$0xff] }
 0x1cd   : > { %v4696_v19 = vcombine.high %v634_v12, %v650_v13 }
 0x1cf   : > { %3780 = vmatpush2.bf16.msra.mxu0 %v4499_v46  ;;  %3821 = vmatpush2.bf16.msra.mxu1 %v4501_v47  ;;  %v4343_v46 = vcombine.low %v282_v29, %v298_v30  ;;  %v4345_v47 = vcombine.low %v283_v35, %v299_v36  ;;  %v571_v29 = vld [vmem:[%s4833_s19 + $0xc78] sm:$0xff]  ;;  %v538_v36 = vld [vmem:[%s4833_s19 + $0xb70] sm:$0xff] }
 0x1d0   : > { %3831 = vmatprep.subr.bf16.mxu0 %v4472_v48  ;;  %3872 = vmatprep.subr.bf16.mxu1 %v4474_v49  ;;  %v4312_v48 = vcombine.high %v250_v42, %v266_v43  ;;  %v4314_v49 = vcombine.high %v251_v44, %v267_v45  ;;  %v587_v30 = vld [vmem:[%s4833_s19 + $0xcf8] sm:$0xff] }
 0x1d1   : > { %v4634_v35 = vcombine.high %v571_v29, %v587_v30 }
 0x1d2   : > { %v3537_v60 = vpop.f32.mrf.mxu0  ;;  %3782 = vmatmul.mubr.bf16.vlgmr.msra.gmra.mxu0 %v4910_v16  ;;  %v3578_v2 = vpop.f32.mrf.mxu1  ;;  %3823 = vmatmul.mubr.bf16.vlgmr.msra.gmra.mxu1 %v4910_v16 }
 0x1d3   : > { %v3538_v63 = vadd.f32 %v3537_v60, %v5118_v31  ;;  %3832 = vmatpush1.bf16.msra.mxu0 %v4471_v54  ;;  %v3579_v4 = vadd.f32 %v3578_v2, %v5118_v31  ;;  %3873 = vmatpush1.bf16.msra.mxu1 %v4473_v55  ;;  %v4311_v54 = vcombine.low %v250_v42, %v266_v43  ;;  %v187_v60 = vld [vmem:[%s4833_s19 + $0x78] sm:$0xff] }
 0x1d4   : > { %v3539_v5 = vpop.f32.mrf.mxu0  ;;  %3833 = vmatprep.subr.bf16.mxu0 %v4440_v56  ;;  %v3580_v10 = vpop.f32.mrf.mxu1  ;;  %3874 = vmatprep.subr.bf16.mxu1 %v4442_v57  ;;  %v4313_v55 = vcombine.low %v251_v44, %v267_v45  ;;  %v4280_v56 = vcombine.high %v218_v50, %v234_v51  ;;  %v4282_v57 = vcombine.high %v219_v52, %v235_v53  ;;  %v506_v44 = vld [vmem:[%s4833_s19 + $0xa70] sm:$0xff] }
 0x1d5   : > { %v3957_v8 = vmul.f32 0.2, %v3538_v63  ;;  %v3540_v9 = vadd.f32 %v3539_v5, %v5118_v31  ;;  %3863 = vmatprep.mubr.bf16.mxu0 %v4823_v1  ;;  %vm3925_vm12 = vcmp.ge.f32.partialorder %v3538_v63, 0.0  ;;  %v3959_v14 = vmul.f32 0.2, %v3579_v4  ;;  %3904 = vmatprep.mubr.bf16.mxu1 %v4823_v1  ;;  %v682_v5 = vld [vmem:[%s4833_s19 + $0xff0] sm:$0xff] }
 0x1d6   : > { %v3581_v15 = vadd.f32 %v3580_v10, %v5118_v31  ;;  %v3541_v17 = vpop.f32.mrf.mxu0  ;;  %vm3927_vm13 = vcmp.ge.f32.partialorder %v3579_v4, 0.0  ;;  %v3582_v21 = vpop.f32.mrf.mxu1  ;;  %v4248_v2 = vcombine.high %v186_v58, %v202_v59  ;;  %v522_v45 = vld [vmem:[%s4833_s19 + $0xaf0] sm:$0xff] }
 0x1d7   : > { %vm3926_vm14 = vcmp.ge.f32.partialorder %v3540_v9, 0.0  ;;  %v3958_v20 = vmul.f32 0.2, %v3540_v9  ;;  %3834 = vmatpush1.bf16.msra.mxu0 %v4439_v3  ;;  %3875 = vmatpush1.bf16.msra.mxu1 %v4441_v6  ;;  %v3989_v1 = vsel %vm3925_vm12, %v3538_v63, %v3957_v8  ;;  %v3991_v32 = vsel %vm3927_vm13, %v3579_v4, %v3959_v14  ;;  %v666_v4 = vld [vmem:[%s4833_s19 + $0xf70] sm:$0xff]  ;;  %v667_v6 = vld [vmem:[%s4833_s19 + $0xf78] sm:$0xff] }
 0x1d8   : > { %vm3928_vm15 = vcmp.ge.f32.partialorder %v3581_v15, 0.0  ;;  %v3960_v23 = vmul.f32 0.2, %v3581_v15  ;;  %v3542_v24 = vpop.f32.mrf.mxu0  ;;  %3835 = vmatprep.subr.bf16.mxu0 %v4408_v7  ;;  %v3583_v27 = vpop.f32.mrf.mxu1  ;;  %3876 = vmatprep.subr.bf16.mxu1 %v4410_v11  ;;  %v4281_v63 = vcombine.low %v219_v52, %v235_v53  ;;  %v4250_v3 = vcombine.high %v187_v60, %v203_v61  ;;  %v683_v7 = vld [vmem:[%s4833_s19 + $0xff8] sm:$0xff]  ;;  %v602_v21 = vld [vmem:[%s4833_s19 + $0xd70] sm:$0xff] }
 0x1d9   : > { %v3990_v26 = vsel %vm3926_vm14, %v3540_v9, %v3958_v20  ;;  %v4247_v8 = vcombine.low %v186_v58, %v202_v59  ;;  %v4249_v9 = vcombine.low %v187_v60, %v203_v61  ;;  %v4728_v10 = vcombine.high %v666_v4, %v682_v5  ;;  %v635_v14 = vld [vmem:[%s4833_s19 + $0xe78] sm:$0xff]  ;;  %v570_v27 = vld [vmem:[%s4833_s19 + $0xc70] sm:$0xff] }
 0x1da   : > { %v4757_v33 = vpack.c.bf16 %v3990_v26, %v3989_v1  ;;  %v3992_v34 = vsel %vm3928_vm15, %v3581_v15, %v3960_v23  ;;  %v4730_v11 = vcombine.high %v667_v6, %v683_v7  ;;  %v651_v15 = vld [vmem:[%s4833_s19 + $0xef8] sm:$0xff]  ;;  %v4727_v17 = vcombine.low %v666_v4, %v682_v5  ;;  %v474_v52 = vld [vmem:[%s4833_s19 + $0x970] sm:$0xff] }
 0x1db   : > { %v4758_v37 = vpack.c.bf16 %v3992_v34, %v3991_v32  ;;  %3836 = vmatpush1.bf16.msra.mxu0 %v4407_v22  ;;  %3877 = vmatpush1.bf16.msra.mxu1 %v4409_v0  ;;  %v4729_v18 = vcombine.low %v667_v6, %v683_v7  ;;  %v4698_v20 = vcombine.high %v635_v14, %v651_v15  ;;  %v618_v22 = vld [vmem:[%s4833_s19 + $0xdf0] sm:$0xff]  ;;  %v603_v23 = vld [vmem:[%s4833_s19 + $0xd78] sm:$0xff] }
 0x1dc   : > { %4143 = vst [vmem:[%s5141_s25 + $0x30] sm:$0xff] %v4757_v33  ;;  %3837 = vmatprep.subr.bf16.mxu0 %v4376_v25  ;;  %3878 = vmatprep.subr.bf16.mxu1 %v4378_v28  ;;  %v619_v24 = vld [vmem:[%s4833_s19 + $0xdf8] sm:$0xff]  ;;  %v4695_v0 = vcombine.low %v634_v12, %v650_v13  ;;  %v4697_v25 = vcombine.low %v635_v14, %v651_v15  ;;  %v586_v28 = vld [vmem:[%s4833_s19 + $0xcf0] sm:$0xff] }
 0x1dd   : > { %4144 = vst [vmem:[%s5141_s25 + $0x38] sm:$0xff] %v4758_v37  ;;  %v4664_v1 = vcombine.high %v602_v21, %v618_v22  ;;  %v4666_v26 = vcombine.high %v603_v23, %v619_v24  ;;  %v4663_v32 = vcombine.low %v602_v21, %v618_v22  ;;  %v4665_v33 = vcombine.low %v603_v23, %v619_v24  ;;  %v554_v37 = vld [vmem:[%s4833_s19 + $0xbf0] sm:$0xff] }
 0x1de   : > { %v4632_v34 = vcombine.high %v570_v27, %v586_v28  ;;  %v4600_v42 = vcombine.high %v538_v36, %v554_v37  ;;  %v4568_v50 = vcombine.high %v506_v44, %v522_v45  ;;  %v490_v53 = vld [vmem:[%s4833_s19 + $0x9f0] sm:$0xff] }
 0x1df   : > { %3838 = vmatpush1.bf16.msra.mxu0 %v4375_v38  ;;  %3879 = vmatpush1.bf16.msra.mxu1 %v4377_v39  ;;  %v539_v38 = vld [vmem:[%s4833_s19 + $0xb78] sm:$0xff]  ;;  %v4536_v58 = vcombine.high %v474_v52, %v490_v53  ;;  %v442_v60 = vld [vmem:[%s4833_s19 + $0x870] sm:$0xff] }
 0x1e0   : > { %3839 = vmatprep.subr.bf16.mxu0 %v4344_v40  ;;  %3880 = vmatprep.subr.bf16.mxu1 %v4346_v41  ;;  %v555_v39 = vld [vmem:[%s4833_s19 + $0xbf8] sm:$0xff]  ;;  %v4631_v40 = vcombine.low %v570_v27, %v586_v28  ;;  %v4633_v41 = vcombine.low %v571_v29, %v587_v30  ;;  %v458_v61 = vld [vmem:[%s4833_s19 + $0x8f0] sm:$0xff] }
 0x1e1   : > { %v4602_v43 = vcombine.high %v539_v38, %v555_v39  ;;  %v4504_v4 = vcombine.high %v442_v60, %v458_v61  ;;  %v4503_v6 = vcombine.low %v442_v60, %v458_v61 }
 0x1e3   : > { %3840 = vmatpush1.bf16.msra.mxu0 %v4343_v46  ;;  %3881 = vmatpush1.bf16.msra.mxu1 %v4345_v47  ;;  %v507_v46 = vld [vmem:[%s4833_s19 + $0xa78] sm:$0xff] }
 0x1e4   : > { %3841 = vmatprep.subr.bf16.mxu0 %v4312_v48  ;;  %3882 = vmatprep.subr.bf16.mxu1 %v4314_v49  ;;  %v523_v47 = vld [vmem:[%s4833_s19 + $0xaf8] sm:$0xff]  ;;  %v4599_v48 = vcombine.low %v538_v36, %v554_v37  ;;  %v4601_v49 = vcombine.low %v539_v38, %v555_v39 }
 0x1e5   : > { %v4570_v51 = vcombine.high %v507_v46, %v523_v47 }
 0x1e7   : > { %3842 = vmatpush1.bf16.msra.mxu0 %v4311_v54  ;;  %3883 = vmatpush1.bf16.msra.mxu1 %v4313_v55  ;;  %v475_v54 = vld [vmem:[%s4833_s19 + $0x978] sm:$0xff] }
 0x1e8   : > { %3843 = vmatprep.subr.bf16.mxu0 %v4280_v56  ;;  %3884 = vmatprep.subr.bf16.mxu1 %v4282_v57  ;;  %v491_v55 = vld [vmem:[%s4833_s19 + $0x9f8] sm:$0xff]  ;;  %v4567_v56 = vcombine.low %v506_v44, %v522_v45  ;;  %v4569_v57 = vcombine.low %v507_v46, %v523_v47 }
 0x1e9   : > { %v4538_v59 = vcombine.high %v475_v54, %v491_v55 }
 0x1eb   : > { %3844 = vmatpush1.bf16.msra.mxu0 %v4279_v62  ;;  %3885 = vmatpush1.bf16.msra.mxu1 %v4281_v63  ;;  %v443_v62 = vld [vmem:[%s4833_s19 + $0x878] sm:$0xff] }
 0x1ec   : > { %3845 = vmatprep.subr.bf16.mxu0 %v4248_v2  ;;  %3886 = vmatprep.subr.bf16.mxu1 %v4250_v3  ;;  %v459_v63 = vld [vmem:[%s4833_s19 + $0x8f8] sm:$0xff]  ;;  %v4535_v2 = vcombine.low %v474_v52, %v490_v53  ;;  %v4537_v3 = vcombine.low %v475_v54, %v491_v55 }
 0x1ed   : > { %v4506_v5 = vcombine.high %v443_v62, %v459_v63  ;;  %v4505_v7 = vcombine.low %v443_v62, %v459_v63 }
 0x1ef   : > { %3846 = vmatpush1.bf16.msra.mxu0 %v4247_v8  ;;  %3887 = vmatpush1.bf16.msra.mxu1 %v4249_v9 }
 0x1f0   : > { %3847 = vmatprep.subr.bf16.mxu0 %v4728_v10  ;;  %3888 = vmatprep.subr.bf16.mxu1 %v4730_v11 }
 0x1f3   : > { %3848 = vmatpush2.bf16.msra.mxu0 %v4727_v17  ;;  %3889 = vmatpush2.bf16.msra.mxu1 %v4729_v18 }
 0x1f4   : > { %3849 = vmatprep.subr.bf16.mxu0 %v4696_v19  ;;  %3890 = vmatprep.subr.bf16.mxu1 %v4698_v20 }
 0x1f7   : > { %3850 = vmatpush2.bf16.msra.mxu0 %v4695_v0  ;;  %3891 = vmatpush2.bf16.msra.mxu1 %v4697_v25 }
 0x1f8   : > { %3851 = vmatprep.subr.bf16.mxu0 %v4664_v1  ;;  %3892 = vmatprep.subr.bf16.mxu1 %v4666_v26 }
 0x1fb   : > { %3852 = vmatpush2.bf16.msra.mxu0 %v4663_v32  ;;  %3893 = vmatpush2.bf16.msra.mxu1 %v4665_v33 }
 0x1fc   : > { %3853 = vmatprep.subr.bf16.mxu0 %v4632_v34  ;;  %3894 = vmatprep.subr.bf16.mxu1 %v4634_v35 }
 0x1ff   : > { %3854 = vmatpush2.bf16.msra.mxu0 %v4631_v40  ;;  %3895 = vmatpush2.bf16.msra.mxu1 %v4633_v41 }
 0x200   : > { %3855 = vmatprep.subr.bf16.mxu0 %v4600_v42  ;;  %3896 = vmatprep.subr.bf16.mxu1 %v4602_v43 }
 0x203   : > { %3856 = vmatpush2.bf16.msra.mxu0 %v4599_v48  ;;  %3897 = vmatpush2.bf16.msra.mxu1 %v4601_v49 }
 0x204   : > { %3857 = vmatprep.subr.bf16.mxu0 %v4568_v50  ;;  %3898 = vmatprep.subr.bf16.mxu1 %v4570_v51 }
 0x207   : > { %3858 = vmatpush2.bf16.msra.mxu0 %v4567_v56  ;;  %3899 = vmatpush2.bf16.msra.mxu1 %v4569_v57 }
 0x208   : > { %3859 = vmatprep.subr.bf16.mxu0 %v4536_v58  ;;  %3900 = vmatprep.subr.bf16.mxu1 %v4538_v59 }
 0x20b   : > { %3860 = vmatpush2.bf16.msra.mxu0 %v4535_v2  ;;  %3901 = vmatpush2.bf16.msra.mxu1 %v4537_v3 }
 0x20c   : > { %3861 = vmatprep.subr.bf16.mxu0 %v4504_v4  ;;  %3902 = vmatprep.subr.bf16.mxu1 %v4506_v5 }
 0x20f   : > { %3862 = vmatpush2.bf16.msra.mxu0 %v4503_v6  ;;  %3903 = vmatpush2.bf16.msra.mxu1 %v4505_v7 }
 0x212   : > { %v3619_v8 = vpop.f32.mrf.mxu0  ;;  %3864 = vmatmul.mubr.bf16.vlgmr.msra.gmra.mxu0 %v4910_v16  ;;  %v3660_v10 = vpop.f32.mrf.mxu1  ;;  %3905 = vmatmul.mubr.bf16.vlgmr.msra.gmra.mxu1 %v4910_v16 }
 0x213   : > { %v3620_v9 = vadd.f32 %v3619_v8, %v5118_v31  ;;  %v3661_v11 = vadd.f32 %v3660_v10, %v5118_v31 }
 0x214   : > { %v3621_v12 = vpop.f32.mrf.mxu0  ;;  %v3662_v15 = vpop.f32.mrf.mxu1 }
 0x215   : > { %v3961_v13 = vmul.f32 0.2, %v3620_v9  ;;  %v3622_v14 = vadd.f32 %v3621_v12, %v5118_v31  ;;  %vm3929_vm0 = vcmp.ge.f32.partialorder %v3620_v9, 0.0  ;;  %v3963_v17 = vmul.f32 0.2, %v3661_v11 }
 0x216   : > { %v3663_v18 = vadd.f32 %v3662_v15, %v5118_v31  ;;  %v3623_v19 = vpop.f32.mrf.mxu0  ;;  %vm3931_vm1 = vcmp.ge.f32.partialorder %v3661_v11, 0.0  ;;  %v3664_v21 = vpop.f32.mrf.mxu1 }
 0x217   : > { %vm3930_vm2 = vcmp.ge.f32.partialorder %v3622_v14, 0.0  ;;  %v3962_v20 = vmul.f32 0.2, %v3622_v14  ;;  %v3993_v23 = vsel %vm3929_vm0, %v3620_v9, %v3961_v13  ;;  %v3995_v25 = vsel %vm3931_vm1, %v3661_v11, %v3963_v17 }
 0x218   : > { %vm3932_vm3 = vcmp.ge.f32.partialorder %v3663_v18, 0.0  ;;  %v3964_v16 = vmul.f32 0.2, %v3663_v18  ;;  %v3624_v22 = vpop.f32.mrf.mxu0  ;;  %v3665_v0 = vpop.f32.mrf.mxu1 }
 0x219   : > { %v3994_v24 = vsel %vm3930_vm2, %v3622_v14, %v3962_v20 }
 0x21a   : > { %v4759_v1 = vpack.c.bf16 %v3994_v24, %v3993_v23  ;;  %v3996_v26 = vsel %vm3932_vm3, %v3663_v18, %v3964_v16 }
 0x21b   : > { %v4760_v27 = vpack.c.bf16 %v3996_v26, %v3995_v25 }
 0x21c   : > { %4145 = vst [vmem:[%s5141_s25 + $0x40] sm:$0xff] %v4759_v1 }
 0x21d   : > { %4146 = vst [vmem:[%s5141_s25 + $0x48] sm:$0xff] %v4760_v27 }
 0x252   : > { %v3701_v28 = vpop.f32.mrf.mxu0  ;;  %v3742_v30 = vpop.f32.mrf.mxu1 }
 0x253   : > { %v3702_v29 = vadd.f32 %v3701_v28, %v5118_v31  ;;  %v3743_v32 = vadd.f32 %v3742_v30, %v5118_v31 }
 0x254   : > { %v3703_v33 = vpop.f32.mrf.mxu0  ;;  %v3744_v36 = vpop.f32.mrf.mxu1 }
 0x255   : > { %v3965_v34 = vmul.f32 0.2, %v3702_v29  ;;  %v3704_v35 = vadd.f32 %v3703_v33, %v5118_v31  ;;  %vm3933_vm4 = vcmp.ge.f32.partialorder %v3702_v29, 0.0  ;;  %v3967_v37 = vmul.f32 0.2, %v3743_v32 }
 0x256   : > { %v3745_v38 = vadd.f32 %v3744_v36, %v5118_v31  ;;  %v3705_v39 = vpop.f32.mrf.mxu0  ;;  %vm3935_vm5 = vcmp.ge.f32.partialorder %v3743_v32, 0.0  ;;  %v3746_v41 = vpop.f32.mrf.mxu1 }
 0x257   : > { %vm3934_vm6 = vcmp.ge.f32.partialorder %v3704_v35, 0.0  ;;  %v3966_v40 = vmul.f32 0.2, %v3704_v35  ;;  %v3997_v44 = vsel %vm3933_vm4, %v3702_v29, %v3965_v34  ;;  %v3999_v47 = vsel %vm3935_vm5, %v3743_v32, %v3967_v37 }
 0x258   : > { %vm3936_vm7 = vcmp.ge.f32.partialorder %v3745_v38, 0.0  ;;  %v3968_v42 = vmul.f32 0.2, %v3745_v38  ;;  %v3706_v43 = vpop.f32.mrf.mxu0  ;;  %v3747_v46 = vpop.f32.mrf.mxu1 }
 0x259   : > { %v3998_v45 = vsel %vm3934_vm6, %v3704_v35, %v3966_v40 }
 0x25a   : > { %v4761_v48 = vpack.c.bf16 %v3998_v45, %v3997_v44  ;;  %v4000_v49 = vsel %vm3936_vm7, %v3745_v38, %v3968_v42 }
 0x25b   : > { %v4762_v50 = vpack.c.bf16 %v4000_v49, %v3999_v47 }
 0x25c   : > { %4147 = vst [vmem:[%s5141_s25 + $0x50] sm:$0xff] %v4761_v48 }
 0x25d   : > { %4148 = vst [vmem:[%s5141_s25 + $0x58] sm:$0xff] %v4762_v50 }
 0x292   : > { %v3783_v51 = vpop.f32.mrf.mxu0  ;;  %v3824_v53 = vpop.f32.mrf.mxu1 }
 0x293   : > { %v3784_v52 = vadd.f32 %v3783_v51, %v5118_v31  ;;  %v3825_v54 = vadd.f32 %v3824_v53, %v5118_v31 }
 0x294   : > { %v3785_v55 = vpop.f32.mrf.mxu0  ;;  %v3826_v58 = vpop.f32.mrf.mxu1 }
 0x295   : > { %v3969_v56 = vmul.f32 0.2, %v3784_v52  ;;  %v3786_v57 = vadd.f32 %v3785_v55, %v5118_v31  ;;  %vm3937_vm8 = vcmp.ge.f32.partialorder %v3784_v52, 0.0  ;;  %v3971_v59 = vmul.f32 0.2, %v3825_v54 }
 0x296   : > { %v3827_v60 = vadd.f32 %v3826_v58, %v5118_v31  ;;  %v3787_v61 = vpop.f32.mrf.mxu0  ;;  %vm3939_vm9 = vcmp.ge.f32.partialorder %v3825_v54, 0.0  ;;  %v3828_v63 = vpop.f32.mrf.mxu1 }
 0x297   : > { %vm3938_vm10 = vcmp.ge.f32.partialorder %v3786_v57, 0.0  ;;  %v3970_v62 = vmul.f32 0.2, %v3786_v57  ;;  %v4001_v4 = vsel %vm3937_vm8, %v3784_v52, %v3969_v56  ;;  %v4003_v7 = vsel %vm3939_vm9, %v3825_v54, %v3971_v59 }
 0x298   : > { %vm3940_vm11 = vcmp.ge.f32.partialorder %v3827_v60, 0.0  ;;  %v3972_v2 = vmul.f32 0.2, %v3827_v60  ;;  %v3788_v3 = vpop.f32.mrf.mxu0  ;;  %v3829_v6 = vpop.f32.mrf.mxu1 }
 0x299   : > { %v4002_v5 = vsel %vm3938_vm10, %v3786_v57, %v3970_v62 }
 0x29a   : > { %v4763_v8 = vpack.c.bf16 %v4002_v5, %v4001_v4  ;;  %v4004_v9 = vsel %vm3940_vm11, %v3827_v60, %v3972_v2 }
 0x29b   : > { %v4764_v10 = vpack.c.bf16 %v4004_v9, %v4003_v7 }
 0x29c   : > { %4149 = vst [vmem:[%s5141_s25 + $0x60] sm:$0xff] %v4763_v8 }
 0x29d   : > { %4150 = vst [vmem:[%s5141_s25 + $0x68] sm:$0xff] %v4764_v10 }
 0x2d2   : > { %v3865_v11 = vpop.f32.mrf.mxu0  ;;  %v3906_v13 = vpop.f32.mrf.mxu1 }
 0x2d3   : > { %v3866_v12 = vadd.f32 %v3865_v11, %v5118_v31  ;;  %v3907_v14 = vadd.f32 %v3906_v13, %v5118_v31 }
 0x2d4   : > { %v3867_v15 = vpop.f32.mrf.mxu0  ;;  %v3908_v19 = vpop.f32.mrf.mxu1 }
 0x2d5   : > { %v3973_v17 = vmul.f32 0.2, %v3866_v12  ;;  %v3868_v18 = vadd.f32 %v3867_v15, %v5118_v31  ;;  %vm3941_vm12 = vcmp.ge.f32.partialorder %v3866_v12, 0.0  ;;  %v3975_v20 = vmul.f32 0.2, %v3907_v14 }
 0x2d6   : > { %v3909_v21 = vadd.f32 %v3908_v19, %v5118_v31  ;;  %v3869_v16 = vpop.f32.mrf.mxu0  ;;  %vm3943_vm13 = vcmp.ge.f32.partialorder %v3907_v14, 0.0  ;;  %v3910_v23 = vpop.f32.mrf.mxu1 }
 0x2d7   : > { %vm3942_vm14 = vcmp.ge.f32.partialorder %v3868_v18, 0.0  ;;  %v3974_v22 = vmul.f32 0.2, %v3868_v18  ;;  %v4005_v25 = vsel %vm3941_vm12, %v3866_v12, %v3973_v17  ;;  %v4007_v27 = vsel %vm3943_vm13, %v3907_v14, %v3975_v20 }
 0x2d8   : > { %vm3944_vm15 = vcmp.ge.f32.partialorder %v3909_v21, 0.0  ;;  %v3976_v24 = vmul.f32 0.2, %v3909_v21  ;;  %v3870_v0 = vpop.f32.mrf.mxu0  ;;  %v3911_v26 = vpop.f32.mrf.mxu1 }
 0x2d9   : > { %v4006_v1 = vsel %vm3942_vm14, %v3868_v18, %v3974_v22 }
 0x2da   : > { %v4765_v28 = vpack.c.bf16 %v4006_v1, %v4005_v25  ;;  %v4008_v29 = vsel %vm3944_vm15, %v3909_v21, %v3976_v24 }
 0x2db   : > { %v4766_v30 = vpack.c.bf16 %v4008_v29, %v4007_v27 }
 0x2dc   : > { %4151 = vst [vmem:[%s5141_s25 + $0x70] sm:$0xff] %v4765_v28 }
 0x2dd   : > { %4152 = vst [vmem:[%s5141_s25 + $0x78] sm:$0xff] %v4766_v30 }
 0x2de PF: > { %s13_s12 = sadd.s32 1, %s4785_s12  }
 0x2df   : > { %p10_p4 = scmp.ge.s32.totalorder %s13_s12, 4  }
 0x2e1   :  { %12 = sbr.rel (!%p10_p4) target bundleno = 1 (0x1), region = 62 }

// kernel: patch_discriminator.7
= control target key start
LH: loop header
LB: loop body
LE: loop exit
PB: predicated region body
PF: predicated region fallthrough
CT: control target
= control target key end

     0   :  { %s1138_s12 = smov 0   ;;  %s1311_s0 = inlined_call_operand.vmem [shape: bf16[2,128,1024], index: 0, kind: input, shape index: {}]   ;;  %s1312_s1 = inlined_call_operand.vmem [shape: bf16[16,128], index: 1, kind: input, shape index: {}]   ;;  %s1313_s2 = inlined_call_operand.vmem [shape: f32[16,1], index: 2, kind: input, shape index: {}]   ;;  %s1314_s3 = inlined_call_operand.vmem [shape: bf16[2,16,1024], index: 3, kind: output, shape index: {}]  }
   0x1 LB: > { %s1000_s13 = sadd.s32 4294967295, %s1115_s12   ;;  %p1004_p0 = scmp.ge.s32.totalorder %s1115_s12, 1  ;;  %s1115_s12 = sphi %s1138_s12, %s13_s12  }
   0x2   : > { %p137_p1 = scmp.lt.s32.totalorder %s1115_s12, 3 }
   0x4   : > { %p138_p2 = pnand %p1004_p0, %p137_p1 }
   0x5   : > { %p161_p3 = scmp.lt.s32.totalorder (!%p138_p2), %s1000_s13, 1 }
   0x6   : > { %141 = sbr.rel (%p138_p2) target bundleno = 620 (0x26c), region = 32 }
   0xb   : > { %v1117_v0 = vmov 0   ;;  %v238_v1 = vld [vmem:[%s1313_s2] sm:$0xff]  ;;  %s1316_s13 = smov (!%p161_p3, %s1000_s13), 1  ;;  %v239_v2 = vld [vmem:[%s1313_s2 + $0x8] sm:$0xff] }
   0xc   : > { %608 = vmatprep.mubr.bf16.mxu0 %v1117_v0  ;;  %651 = vmatprep.mubr.bf16.mxu1 %v1117_v0  ;;  %s1084_s16 = sshll.u32 %s1316_s13, 9  ;;  %s1085_s24 = sshll.u32 %s1316_s13, 6 }
   0xd   : > { %1103 = vset.pattern.permute.xlu0 %v1117_v0  ;;  %s1161_s21 = scalar_lea.vmem %s1311_s0, %s1084_s16  ;;  %s1277_s27 = scalar_lea.vmem %s1314_s3, %s1085_s24 }
   0xe   : > { %242 = vperm.xlu0 %1103, %v238_v1   ;;  %v230_v3 = vld [vmem:[%s1161_s21 + $0x1c0] sm:$0xff]  ;;  %v231_v5 = vld [vmem:[%s1161_s21 + $0x1c8] sm:$0xff] }
   0xf   : > { %v234_v4 = vld [vmem:[%s1161_s21 + $0x1e0] sm:$0xff]  ;;  %v235_v7 = vld [vmem:[%s1161_s21 + $0x1e8] sm:$0xff] }
  0x10   : > { %v1067_v6 = vcombine.high %v230_v3, %v234_v4  ;;  %v1066_v8 = vcombine.low %v230_v3, %v234_v4  ;;  %v222_v9 = vld [vmem:[%s1161_s21 + $0x180] sm:$0xff]  ;;  %v1069_v11 = vcombine.high %v231_v5, %v235_v7  ;;  %v1068_v12 = vcombine.low %v231_v5, %v235_v7  ;;  %v223_v14 = vld [vmem:[%s1161_s21 + $0x188] sm:$0xff]  ;;  %v236_v3 = vld [vmem:[%s1161_s21 + $0x1f0] sm:$0xff] }
  0x11   : > { %v226_v10 = vld [vmem:[%s1161_s21 + $0x1a0] sm:$0xff]  ;;  %v227_v15 = vld [vmem:[%s1161_s21 + $0x1a8] sm:$0xff]  ;;  %v233_v4 = vld [vmem:[%s1161_s21 + $0x1d8] sm:$0xff] }
  0x12   : > { %247 = vperm.xlu0 %1103, %v239_v2   ;;  %v1059_v13 = vcombine.high %v222_v9, %v226_v10  ;;  %v214_v16 = vld [vmem:[%s1161_s21 + $0x140] sm:$0xff]  ;;  %576 = vmatprep.subr.bf16.mxu0 %v1067_v6  ;;  %v1061_v17 = vcombine.high %v223_v14, %v227_v15  ;;  %v215_v19 = vld [vmem:[%s1161_s21 + $0x148] sm:$0xff]  ;;  %v1058_v21 = vcombine.low %v222_v9, %v226_v10  ;;  %v232_v2 = vld [vmem:[%s1161_s21 + $0x1d0] sm:$0xff] }
  0x13   : > { %v218_v18 = vld [vmem:[%s1161_s21 + $0x160] sm:$0xff]  ;;  %v219_v20 = vld [vmem:[%s1161_s21 + $0x168] sm:$0xff]  ;;  %619 = vmatprep.subr.bf16.mxu1 %v1069_v11  ;;  %577 = vmatpush1.bf16.msra.mxu0 %v1066_v8  ;;  %v1060_v22 = vcombine.low %v223_v14, %v227_v15  ;;  %v237_v5 = vld [vmem:[%s1161_s21 + $0x1f8] sm:$0xff]  ;;  %v1071_v8 = vcombine.high %v232_v2, %v236_v3  ;;  %v1070_v15 = vcombine.low %v232_v2, %v236_v3 }
  0x14   : > { %620 = vmatpush1.bf16.msra.mxu1 %v1068_v12  ;;  %578 = vmatprep.subr.bf16.mxu0 %v1059_v13  ;;  %v1051_v23 = vcombine.high %v214_v16, %v218_v18  ;;  %v1053_v24 = vcombine.high %v215_v19, %v219_v20  ;;  %v206_v25 = vld [vmem:[%s1161_s21 + $0x100] sm:$0xff]  ;;  %v207_v27 = vld [vmem:[%s1161_s21 + $0x108] sm:$0xff]  ;;  %v1050_v29 = vcombine.low %v214_v16, %v218_v18  ;;  %v224_v10 = vld [vmem:[%s1161_s21 + $0x190] sm:$0xff] }
  0x15   : > { %621 = vmatprep.subr.bf16.mxu1 %v1061_v17  ;;  %v210_v26 = vld [vmem:[%s1161_s21 + $0x120] sm:$0xff]  ;;  %v211_v28 = vld [vmem:[%s1161_s21 + $0x128] sm:$0xff]  ;;  %v1052_v30 = vcombine.low %v215_v19, %v219_v20  ;;  %v1073_v9 = vcombine.high %v233_v4, %v237_v5  ;;  %v228_v11 = vld [vmem:[%s1161_s21 + $0x1b0] sm:$0xff]  ;;  %v1072_v16 = vcombine.low %v233_v4, %v237_v5 }
  0x16   : > { %v1043_v31 = vcombine.high %v206_v25, %v210_v26  ;;  %v1045_v32 = vcombine.high %v207_v27, %v211_v28  ;;  %v198_v33 = vld [vmem:[%s1161_s21 + $0xc0] sm:$0xff]  ;;  %v199_v35 = vld [vmem:[%s1161_s21 + $0xc8] sm:$0xff]  ;;  %v1042_v37 = vcombine.low %v206_v25, %v210_v26  ;;  %v1044_v38 = vcombine.low %v207_v27, %v211_v28  ;;  %v225_v13 = vld [vmem:[%s1161_s21 + $0x198] sm:$0xff] }
  0x17   : > { %579 = vmatpush1.bf16.msra.mxu0 %v1058_v21  ;;  %v202_v34 = vld [vmem:[%s1161_s21 + $0xe0] sm:$0xff]  ;;  %v203_v36 = vld [vmem:[%s1161_s21 + $0xe8] sm:$0xff]  ;;  %v229_v14 = vld [vmem:[%s1161_s21 + $0x1b8] sm:$0xff]  ;;  %v1063_v17 = vcombine.high %v224_v10, %v228_v11 }
  0x18   : > { %622 = vmatpush1.bf16.msra.mxu1 %v1060_v22  ;;  %580 = vmatprep.subr.bf16.mxu0 %v1051_v23  ;;  %v1035_v39 = vcombine.high %v198_v33, %v202_v34  ;;  %v1037_v40 = vcombine.high %v199_v35, %v203_v36  ;;  %v190_v41 = vld [vmem:[%s1161_s21 + $0x80] sm:$0xff]  ;;  %v191_v43 = vld [vmem:[%s1161_s21 + $0x88] sm:$0xff]  ;;  %v1034_v45 = vcombine.low %v198_v33, %v202_v34  ;;  %v216_v19 = vld [vmem:[%s1161_s21 + $0x150] sm:$0xff] }
  0x19   : > { %623 = vmatprep.subr.bf16.mxu1 %v1053_v24  ;;  %v194_v42 = vld [vmem:[%s1161_s21 + $0xa0] sm:$0xff]  ;;  %v195_v44 = vld [vmem:[%s1161_s21 + $0xa8] sm:$0xff]  ;;  %v1036_v46 = vcombine.low %v199_v35, %v203_v36  ;;  %v1065_v18 = vcombine.high %v225_v13, %v229_v14  ;;  %v220_v20 = vld [vmem:[%s1161_s21 + $0x170] sm:$0xff]  ;;  %v1062_v23 = vcombine.low %v224_v10, %v228_v11  ;;  %v1064_v24 = vcombine.low %v225_v13, %v229_v14 }
  0x1a   : > { %v1027_v47 = vcombine.high %v190_v41, %v194_v42  ;;  %v1029_v48 = vcombine.high %v191_v43, %v195_v44  ;;  %v182_v49 = vld [vmem:[%s1161_s21 + $0x40] sm:$0xff]  ;;  %v183_v51 = vld [vmem:[%s1161_s21 + $0x48] sm:$0xff]  ;;  %v1026_v53 = vcombine.low %v190_v41, %v194_v42  ;;  %v1028_v54 = vcombine.low %v191_v43, %v195_v44  ;;  %v217_v21 = vld [vmem:[%s1161_s21 + $0x158] sm:$0xff] }
  0x1b   : > { %581 = vmatpush1.bf16.msra.mxu0 %v1050_v29  ;;  %v186_v50 = vld [vmem:[%s1161_s21 + $0x60] sm:$0xff]  ;;  %v187_v52 = vld [vmem:[%s1161_s21 + $0x68] sm:$0xff]  ;;  %v221_v22 = vld [vmem:[%s1161_s21 + $0x178] sm:$0xff]  ;;  %v1055_v25 = vcombine.high %v216_v19, %v220_v20 }
  0x1c   : > { %624 = vmatpush1.bf16.msra.mxu1 %v1052_v30  ;;  %582 = vmatprep.subr.bf16.mxu0 %v1043_v31  ;;  %v1019_v55 = vcombine.high %v182_v49, %v186_v50  ;;  %v1021_v56 = vcombine.high %v183_v51, %v187_v52  ;;  %v174_v57 = vld [vmem:[%s1161_s21] sm:$0xff]  ;;  %v175_v59 = vld [vmem:[%s1161_s21 + $0x8] sm:$0xff]  ;;  %v1018_v61 = vcombine.low %v182_v49, %v186_v50  ;;  %v208_v27 = vld [vmem:[%s1161_s21 + $0x110] sm:$0xff] }
  0x1d   : > { %625 = vmatprep.subr.bf16.mxu1 %v1045_v32  ;;  %v178_v58 = vld [vmem:[%s1161_s21 + $0x20] sm:$0xff]  ;;  %v179_v60 = vld [vmem:[%s1161_s21 + $0x28] sm:$0xff]  ;;  %v1020_v62 = vcombine.low %v183_v51, %v187_v52  ;;  %v1057_v26 = vcombine.high %v217_v21, %v221_v22  ;;  %v212_v28 = vld [vmem:[%s1161_s21 + $0x130] sm:$0xff]  ;;  %v1054_v31 = vcombine.low %v216_v19, %v220_v20  ;;  %v1056_v32 = vcombine.low %v217_v21, %v221_v22 }
  0x1e   : > { %v1011_v63 = vcombine.high %v174_v57, %v178_v58  ;;  %v1013_v1 = vcombine.high %v175_v59, %v179_v60  ;;  %v1010_v6 = vcombine.low %v174_v57, %v178_v58  ;;  %v1012_v7 = vcombine.low %v175_v59, %v179_v60  ;;  %v1204_v12 = vld [vmem:[%s1312_s1] sm:$0xff]   ;;  %v209_v29 = vld [vmem:[%s1161_s21 + $0x118] sm:$0xff]  ;;  %v200_v35 = vld [vmem:[%s1161_s21 + $0xd0] sm:$0xff] }
  0x1f   : > { %583 = vmatpush1.bf16.msra.mxu0 %v1042_v37  ;;  %v213_v30 = vld [vmem:[%s1161_s21 + $0x138] sm:$0xff]  ;;  %v1047_v33 = vcombine.high %v208_v27, %v212_v28  ;;  %v204_v36 = vld [vmem:[%s1161_s21 + $0xf0] sm:$0xff] }
  0x20   : > { %626 = vmatpush1.bf16.msra.mxu1 %v1044_v38  ;;  %584 = vmatprep.subr.bf16.mxu0 %v1035_v39  ;;  %v1049_v34 = vcombine.high %v209_v29, %v213_v30  ;;  %v201_v37 = vld [vmem:[%s1161_s21 + $0xd8] sm:$0xff]  ;;  %v1046_v39 = vcombine.low %v208_v27, %v212_v28  ;;  %v192_v42 = vld [vmem:[%s1161_s21 + $0x90] sm:$0xff] }
  0x21   : > { %627 = vmatprep.subr.bf16.mxu1 %v1037_v40  ;;  %v205_v38 = vld [vmem:[%s1161_s21 + $0xf8] sm:$0xff]  ;;  %v1039_v40 = vcombine.high %v200_v35, %v204_v36  ;;  %v196_v43 = vld [vmem:[%s1161_s21 + $0xb0] sm:$0xff] }
  0x22   : > { %v1041_v41 = vcombine.high %v201_v37, %v205_v38  ;;  %v193_v44 = vld [vmem:[%s1161_s21 + $0x98] sm:$0xff]  ;;  %v184_v50 = vld [vmem:[%s1161_s21 + $0x50] sm:$0xff] }
  0x23   : > { %585 = vmatpush1.bf16.msra.mxu0 %v1034_v45  ;;  %v197_v45 = vld [vmem:[%s1161_s21 + $0xb8] sm:$0xff]  ;;  %v188_v51 = vld [vmem:[%s1161_s21 + $0x70] sm:$0xff] }
  0x24   : > { %628 = vmatpush1.bf16.msra.mxu1 %v1036_v46  ;;  %586 = vmatprep.subr.bf16.mxu0 %v1027_v47  ;;  %v1038_v46 = vcombine.low %v200_v35, %v204_v36  ;;  %v1040_v47 = vcombine.low %v201_v37, %v205_v38  ;;  %v1033_v49 = vcombine.high %v193_v44, %v197_v45  ;;  %v185_v52 = vld [vmem:[%s1161_s21 + $0x58] sm:$0xff]  ;;  %v176_v58 = vld [vmem:[%s1161_s21 + $0x10] sm:$0xff] }
  0x25   : > { %629 = vmatprep.subr.bf16.mxu1 %v1029_v48  ;;  %v1031_v48 = vcombine.high %v192_v42, %v196_v43  ;;  %v180_v59 = vld [vmem:[%s1161_s21 + $0x30] sm:$0xff]  ;;  %v177_v60 = vld [vmem:[%s1161_s21 + $0x18] sm:$0xff] }
  0x26   : > { %v1014_v3 = vcombine.low %v176_v58, %v180_v59 }
  0x27   : > { %587 = vmatpush1.bf16.msra.mxu0 %v1026_v53  ;;  %v189_v53 = vld [vmem:[%s1161_s21 + $0x78] sm:$0xff] }
  0x28   : > { %630 = vmatpush1.bf16.msra.mxu1 %v1028_v54  ;;  %588 = vmatprep.subr.bf16.mxu0 %v1019_v55  ;;  %v1030_v54 = vcombine.low %v192_v42, %v196_v43  ;;  %v1032_v55 = vcombine.low %v193_v44, %v197_v45  ;;  %v1025_v57 = vcombine.high %v185_v52, %v189_v53 }
  0x29   : > { %631 = vmatprep.subr.bf16.mxu1 %v1021_v56  ;;  %v1023_v56 = vcombine.high %v184_v50, %v188_v51 }
  0x2b   : > { %589 = vmatpush1.bf16.msra.mxu0 %v1018_v61  ;;  %v181_v61 = vld [vmem:[%s1161_s21 + $0x38] sm:$0xff] }
  0x2c   : > { %632 = vmatpush1.bf16.msra.mxu1 %v1020_v62  ;;  %590 = vmatprep.subr.bf16.mxu0 %v1011_v63  ;;  %v1022_v62 = vcombine.low %v184_v50, %v188_v51  ;;  %v1024_v63 = vcombine.low %v185_v52, %v189_v53  ;;  %v1017_v2 = vcombine.high %v177_v60, %v181_v61 }
  0x2d   : > { %633 = vmatprep.subr.bf16.mxu1 %v1013_v1  ;;  %v1015_v1 = vcombine.high %v176_v58, %v180_v59  ;;  %v1016_v4 = vcombine.low %v177_v60, %v181_v61 }
  0x2f   : > { %591 = vmatpush1.bf16.msra.mxu0 %v1010_v6 }
  0x30   : > { %634 = vmatpush1.bf16.msra.mxu1 %v1012_v7  ;;  %662 = vmatprep.subr.bf16.mxu0 %v1071_v8 }
  0x31   : > { %705 = vmatprep.subr.bf16.mxu1 %v1073_v9 }
  0x32   : > { %609 = vmatmul.mubr.bf16.vlgmr.msra.gmra.mxu0 %v1204_v12 }
  0x33   : > { %652 = vmatmul.mubr.bf16.vlgmr.msra.gmra.mxu1 %v1204_v12  ;;  %663 = vmatpush1.bf16.msra.mxu0 %v1070_v15 }
  0x34   : > { %706 = vmatpush1.bf16.msra.mxu1 %v1072_v16  ;;  %664 = vmatprep.subr.bf16.mxu0 %v1063_v17 }
  0x35   : > { %707 = vmatprep.subr.bf16.mxu1 %v1065_v18  ;;  %694 = vmatprep.mubr.bf16.mxu0 %v1117_v0 }
  0x36   : > { %737 = vmatprep.mubr.bf16.mxu1 %v1117_v0  ;;  %v1048_v0 = vcombine.low %v209_v29, %v213_v30 }
  0x37   : > { %665 = vmatpush1.bf16.msra.mxu0 %v1062_v23 }
  0x38   : > { %708 = vmatpush1.bf16.msra.mxu1 %v1064_v24  ;;  %666 = vmatprep.subr.bf16.mxu0 %v1055_v25 }
  0x39   : > { %709 = vmatprep.subr.bf16.mxu1 %v1057_v26 }
  0x3b   : > { %667 = vmatpush1.bf16.msra.mxu0 %v1054_v31 }
  0x3c   : > { %710 = vmatpush1.bf16.msra.mxu1 %v1056_v32  ;;  %668 = vmatprep.subr.bf16.mxu0 %v1047_v33 }
  0x3d   : > { %711 = vmatprep.subr.bf16.mxu1 %v1049_v34 }
  0x3f   : > { %669 = vmatpush1.bf16.msra.mxu0 %v1046_v39 }
  0x40   : > { %712 = vmatpush1.bf16.msra.mxu1 %v1048_v0  ;;  %670 = vmatprep.subr.bf16.mxu0 %v1039_v40 }
  0x41   : > { %713 = vmatprep.subr.bf16.mxu1 %v1041_v41 }
  0x43   : > { %671 = vmatpush1.bf16.msra.mxu0 %v1038_v46 }
  0x44   : > { %714 = vmatpush1.bf16.msra.mxu1 %v1040_v47  ;;  %672 = vmatprep.subr.bf16.mxu0 %v1031_v48 }
  0x45   : > { %715 = vmatprep.subr.bf16.mxu1 %v1033_v49 }
  0x47   : > { %673 = vmatpush1.bf16.msra.mxu0 %v1030_v54 }
  0x48   : > { %716 = vmatpush1.bf16.msra.mxu1 %v1032_v55  ;;  %674 = vmatprep.subr.bf16.mxu0 %v1023_v56 }
  0x49   : > { %717 = vmatprep.subr.bf16.mxu1 %v1025_v57 }
  0x4b   : > { %675 = vmatpush1.bf16.msra.mxu0 %v1022_v62 }
  0x4c   : > { %718 = vmatpush1.bf16.msra.mxu1 %v1024_v63  ;;  %676 = vmatprep.subr.bf16.mxu0 %v1015_v1 }
  0x4d   : > { %719 = vmatprep.subr.bf16.mxu1 %v1017_v2 }
  0x4f   : > { %677 = vmatpush1.bf16.msra.mxu0 %v1014_v3 }
  0x50   : > { %720 = vmatpush1.bf16.msra.mxu1 %v1016_v4 }
  0x52   : > { %695 = vmatmul.mubr.bf16.vlgmr.msra.gmra.mxu0 %v1204_v12 }
  0x53   : > { %738 = vmatmul.mubr.bf16.vlgmr.msra.gmra.mxu1 %v1204_v12 }
  0x89   : > { %v243_v7 = vpop.permute.xlu0 %242 }
  0x8d   : > { %v248_v15 = vpop.permute.xlu0 %247 }
  0xf2   : > { %v610_v5 = vpop.f32.mrf.mxu0 }
  0xf3   : > { %v653_v9 = vpop.f32.mrf.mxu1  ;;  %v611_v10 = vadd.f32 %v610_v5, %v243_v7 }
  0xf4   : > { %v612_v6 = vpop.f32.mrf.mxu0  ;;  %v654_v16 = vadd.f32 %v653_v9, %v243_v7 }
  0xf5   : > { %v613_v11 = vadd.f32 %v612_v6, %v243_v7  ;;  %v655_v14 = vpop.f32.mrf.mxu1 }
  0xf6   : > { %v614_v8 = vpop.f32.mrf.mxu0  ;;  %v656_v21 = vadd.f32 %v655_v14, %v243_v7 }
  0xf7   : > { %v748_v17 = vadd.f32 %v613_v11, %v611_v10  ;;  %v615_v19 = vadd.f32 %v614_v8, %v248_v15  ;;  %v657_v20 = vpop.f32.mrf.mxu1 }
  0xf8   : > { %v616_v13 = vpop.f32.mrf.mxu0  ;;  %v658_v24 = vadd.f32 %v657_v20, %v248_v15 }
  0xf9   : > { %v617_v18 = vadd.f32 %v616_v13, %v248_v15  ;;  %v749_v22 = vadd.f32 %v748_v17, %v654_v16  ;;  %v659_v12 = vpop.f32.mrf.mxu1 }
  0xfa   : > { %v660_v31 = vadd.f32 %v659_v12, %v248_v15 }
  0xfb   : > { %v757_v23 = vadd.f32 %v617_v18, %v615_v19  ;;  %v750_v26 = vadd.f32 %v749_v22, %v656_v21 }
  0xfd   : > { %v758_v27 = vadd.f32 %v757_v23, %v658_v24 }
  0xff   : > { %v759_v36 = vadd.f32 %v758_v27, %v660_v31 }
 0x112   : > { %v696_v25 = vpop.f32.mrf.mxu0 }
 0x113   : > { %v697_v28 = vadd.f32 %v696_v25, %v243_v7  ;;  %v739_v29 = vpop.f32.mrf.mxu1 }
 0x114   : > { %v698_v30 = vpop.f32.mrf.mxu0  ;;  %v740_v37 = vadd.f32 %v739_v29, %v243_v7 }
 0x115   : > { %v751_v32 = vadd.f32 %v750_v26, %v697_v28  ;;  %v699_v33 = vadd.f32 %v698_v30, %v243_v7  ;;  %v741_v34 = vpop.f32.mrf.mxu1 }
 0x116   : > { %v700_v35 = vpop.f32.mrf.mxu0  ;;  %v742_v41 = vadd.f32 %v741_v34, %v243_v7 }
 0x117   : > { %v752_v38 = vadd.f32 %v751_v32, %v699_v33  ;;  %v701_v39 = vadd.f32 %v700_v35, %v248_v15  ;;  %v743_v0 = vpop.f32.mrf.mxu1 }
 0x118   : > { %v702_v40 = vpop.f32.mrf.mxu0  ;;  %v744_v46 = vadd.f32 %v743_v0, %v248_v15 }
 0x119   : > { %v760_v42 = vadd.f32 %v759_v36, %v701_v39  ;;  %v703_v43 = vadd.f32 %v702_v40, %v248_v15  ;;  %v753_v44 = vadd.f32 %v752_v38, %v740_v37  ;;  %v745_v45 = vpop.f32.mrf.mxu1 }
 0x11a   : > { %v746_v49 = vadd.f32 %v745_v45, %v248_v15 }
 0x11b   : > { %v761_v47 = vadd.f32 %v760_v42, %v703_v43  ;;  %v754_v48 = vadd.f32 %v753_v44, %v742_v41 }
 0x11d   : > { %755 = vadd.xlane.f32.xlu1 %v754_v48  ;;  %v762_v50 = vadd.f32 %v761_v47, %v744_v46 }
 0x11f   : > { %v763_v51 = vadd.f32 %v762_v50, %v746_v49 }
 0x121   : > { %764 = vadd.xlane.f32.xlu1 %v763_v51 }
 0x1a6   : > { %v756_v52 = vpop.xlane.xlu1 %755 }
 0x1a7   : > { %v767_v53 = vmul.f32 0.0009765625, %v756_v52 }
 0x1a9   : > { %v769_v54 = vsub.f32 %v611_v10, %v767_v53  ;;  %v770_v55 = vsub.f32 %v613_v11, %v767_v53  ;;  %v771_v56 = vsub.f32 %v654_v16, %v767_v53  ;;  %v772_v59 = vsub.f32 %v656_v21, %v767_v53 }
 0x1aa   : > { %v765_v57 = vpop.xlane.xlu1 %764  ;;  %v773_v62 = vsub.f32 %v697_v28, %v767_v53  ;;  %v774_v5 = vsub.f32 %v699_v33, %v767_v53  ;;  %v775_v11 = vsub.f32 %v740_v37, %v767_v53 }
 0x1ab   : > { %v768_v58 = vmul.f32 0.0009765625, %v765_v57  ;;  %v785_v60 = vmul.f32 %v769_v54, %v769_v54  ;;  %v786_v61 = vmul.f32 %v770_v55, %v770_v55  ;;  %v787_v63 = vmul.f32 %v771_v56, %v771_v56 }
 0x1ac   : > { %v788_v6 = vmul.f32 %v772_v59, %v772_v59  ;;  %v789_v13 = vmul.f32 %v773_v62, %v773_v62 }
 0x1ad   : > { %v801_v1 = vadd.f32 %v786_v61, %v785_v60  ;;  %v1238_v2 = vsub.f32 %v615_v19, %v768_v58  ;;  %v1240_v3 = vsub.f32 %v617_v18, %v768_v58  ;;  %v1242_v4 = vsub.f32 %v658_v24, %v768_v58 }
 0x1ae   : > { %v1246_v9 = vsub.f32 %v660_v31, %v768_v58  ;;  %v1250_v15 = vsub.f32 %v701_v39, %v768_v58  ;;  %v776_v18 = vsub.f32 %v742_v41, %v767_v53  ;;  %v790_v19 = vmul.f32 %v774_v5, %v774_v5 }
 0x1af   : > { %v802_v7 = vadd.f32 %v801_v1, %v787_v63  ;;  %v793_v8 = vmul.f32 %v1238_v2, %v1238_v2  ;;  %v794_v10 = vmul.f32 %v1240_v3, %v1240_v3  ;;  %v795_v16 = vmul.f32 %v1242_v4, %v1242_v4 }
 0x1b0   : > { %v1254_v21 = vsub.f32 %v703_v43, %v768_v58  ;;  %v796_v22 = vmul.f32 %v1246_v9, %v1246_v9  ;;  %v791_v24 = vmul.f32 %v775_v11, %v775_v11  ;;  %v1258_v25 = vsub.f32 %v744_v46, %v768_v58 }
 0x1b1   : > { %v803_v14 = vadd.f32 %v802_v7, %v788_v6  ;;  %v810_v17 = vadd.f32 %v794_v10, %v793_v8  ;;  %v797_v26 = vmul.f32 %v1250_v15, %v1250_v15  ;;  %v792_v28 = vmul.f32 %v776_v18, %v776_v18 }
 0x1b2   : > { %v1262_v30 = vsub.f32 %v746_v49, %v768_v58  ;;  %v798_v31 = vmul.f32 %v1254_v21, %v1254_v21  ;;  %v799_v34 = vmul.f32 %v1258_v25, %v1258_v25 }
 0x1b3   : > { %v804_v20 = vadd.f32 %v803_v14, %v789_v13  ;;  %v811_v23 = vadd.f32 %v810_v17, %v795_v16 }
 0x1b4   : > { %v800_v36 = vmul.f32 %v1262_v30, %v1262_v30 }
 0x1b5   : > { %v805_v12 = vadd.f32 %v804_v20, %v790_v19  ;;  %v812_v27 = vadd.f32 %v811_v23, %v796_v22 }
 0x1b7   : > { %v806_v29 = vadd.f32 %v805_v12, %v791_v24  ;;  %v813_v32 = vadd.f32 %v812_v27, %v797_v26 }
 0x1b9   : > { %v807_v33 = vadd.f32 %v806_v29, %v792_v28  ;;  %v814_v35 = vadd.f32 %v813_v32, %v798_v31 }
 0x1bb   : > { %808 = vadd.xlane.f32.xlu0 %v807_v33  ;;  %v815_v37 = vadd.f32 %v814_v35, %v799_v34 }
 0x1bd   : > { %v816_v38 = vadd.f32 %v815_v37, %v800_v36 }
 0x1bf   : > { %817 = vadd.xlane.f32.xlu1 %v816_v38 }
 0x244   : > { %v809_v39 = vpop.xlane.xlu0 %808 }
 0x245   : > { %v819_v0 = vmul.f32 0.0009765625, %v809_v39 }
 0x247   : > { %v821_v40 = vadd.f32 1e-05, %v819_v0 }
 0x248   : > { %v818_v41 = vpop.xlane.xlu1 %817 }
 0x249   : > { %1105 = vrsqrt.f32 %v821_v40  ;;  %v820_v42 = vmul.f32 0.0009765625, %v818_v41 }
 0x24b   : > { %v822_v43 = vadd.f32 1e-05, %v820_v42 }
 0x24d   : > { %1107 = vrsqrt.f32 %v822_v43 }
 0x256   : > { %v1106_v44 = vpop.eup %1105 }
 0x257   : > { %v825_v45 = vmul.f32 %v1106_v44, %v769_v54  ;;  %v826_v46 = vmul.f32 %v1106_v44, %v770_v55  ;;  %v827_v47 = vmul.f32 %v1106_v44, %v771_v56  ;;  %v828_v48 = vmul.f32 %v1106_v44, %v772_v59 }
 0x258   : > { %v829_v49 = vmul.f32 %v1106_v44, %v773_v62  ;;  %v830_v50 = vmul.f32 %v1106_v44, %v774_v5  ;;  %v831_v51 = vmul.f32 %v1106_v44, %v775_v11  ;;  %v832_v52 = vmul.f32 %v1106_v44, %v776_v18 }
 0x259   : > { %vm841_vm0 = vcmp.ge.f32.partialorder %v825_v45, 0.0  ;;  %vm842_vm1 = vcmp.ge.f32.partialorder %v826_v46, 0.0  ;;  %vm843_vm2 = vcmp.ge.f32.partialorder %v827_v47, 0.0  ;;  %vm844_vm3 = vcmp.ge.f32.partialorder %v828_v48, 0.0 }
 0x25a   : > { %vm845_vm4 = vcmp.ge.f32.partialorder %v829_v49, 0.0  ;;  %vm846_vm5 = vcmp.ge.f32.partialorder %v830_v50, 0.0  ;;  %vm847_vm6 = vcmp.ge.f32.partialorder %v831_v51, 0.0  ;;  %vm848_vm7 = vcmp.ge.f32.partialorder %v832_v52, 0.0  ;;  %v1108_v53 = vpop.eup %1107 }
 0x25b   : > { %v857_v57 = vmul.f32 0.2, %v825_v45  ;;  %v858_v58 = vmul.f32 0.2, %v826_v46  ;;  %v859_v54 = vmul.f32 0.2, %v827_v47  ;;  %v833_v60 = vmul.f32 %v1108_v53, %v1238_v2 }
 0x25c   : > { %v860_v55 = vmul.f32 0.2, %v828_v48  ;;  %v861_v56 = vmul.f32 0.2, %v829_v49  ;;  %v862_v59 = vmul.f32 0.2, %v830_v50  ;;  %v834_v17 = vmul.f32 %v1108_v53, %v1240_v3 }
 0x25d   : > { %v863_v61 = vmul.f32 0.2, %v831_v51  ;;  %v864_v62 = vmul.f32 0.2, %v832_v52  ;;  %v873_v63 = vsel %vm841_vm0, %v825_v45, %v857_v57  ;;  %v874_v1 = vsel %vm842_vm1, %v826_v46, %v858_v58 }
 0x25e   : > { %v875_v5 = vsel %vm843_vm2, %v827_v47, %v859_v54  ;;  %v876_v6 = vsel %vm844_vm3, %v828_v48, %v860_v55  ;;  %v877_v7 = vsel %vm845_vm4, %v829_v49, %v861_v56  ;;  %v878_v2 = vsel %vm846_vm5, %v830_v50, %v862_v59 }
 0x25f   : > { %v879_v8 = vsel %vm847_vm6, %v831_v51, %v863_v61  ;;  %v880_v10 = vsel %vm848_vm7, %v832_v52, %v864_v62  ;;  %v1086_v11 = vpack.c.bf16 %v874_v1, %v873_v63  ;;  %v1087_v13 = vpack.c.bf16 %v876_v6, %v875_v5 }
 0x260   : > { %v1088_v14 = vpack.c.bf16 %v878_v2, %v877_v7  ;;  %v1089_v16 = vpack.c.bf16 %v880_v10, %v879_v8  ;;  %v835_v18 = vmul.f32 %v1108_v53, %v1242_v4  ;;  %v836_v19 = vmul.f32 %v1108_v53, %v1246_v9 }
 0x261   : > { %937 = vst [vmem:[%s1277_s27] sm:$0xff] %v1086_v11  ;;  %938 = vst [vmem:[%s1277_s27 + $0x8] sm:$0xff] %v1087_v13  ;;  %v837_v20 = vmul.f32 %v1108_v53, %v1250_v15  ;;  %v838_v22 = vmul.f32 %v1108_v53, %v1254_v21  ;;  %v839_v23 = vmul.f32 %v1108_v53, %v1258_v25  ;;  %vm849_vm8 = vcmp.ge.f32.partialorder %v833_v60, 0.0 }
 0x262   : > { %939 = vst [vmem:[%s1277_s27 + $0x10] sm:$0xff] %v1088_v14  ;;  %940 = vst [vmem:[%s1277_s27 + $0x18] sm:$0xff] %v1089_v16  ;;  %v840_v24 = vmul.f32 %v1108_v53, %v1262_v30  ;;  %vm850_vm9 = vcmp.ge.f32.partialorder %v834_v17, 0.0  ;;  %vm851_vm10 = vcmp.ge.f32.partialorder %v835_v18, 0.0  ;;  %vm852_vm11 = vcmp.ge.f32.partialorder %v836_v19, 0.0 }
 0x263   : > { %vm853_vm12 = vcmp.ge.f32.partialorder %v837_v20, 0.0  ;;  %vm854_vm13 = vcmp.ge.f32.partialorder %v838_v22, 0.0  ;;  %vm855_vm14 = vcmp.ge.f32.partialorder %v839_v23, 0.0  ;;  %v865_v3 = vmul.f32 0.2, %v833_v60 }
 0x264   : > { %vm856_vm15 = vcmp.ge.f32.partialorder %v840_v24, 0.0  ;;  %v866_v4 = vmul.f32 0.2, %v834_v17  ;;  %v867_v9 = vmul.f32 0.2, %v835_v18 }
 0x265   : > { %v868_v15 = vmul.f32 0.2, %v836_v19  ;;  %v869_v12 = vmul.f32 0.2, %v837_v20  ;;  %v870_v21 = vmul.f32 0.2, %v838_v22  ;;  %v881_v27 = vsel %vm849_vm8, %v833_v60, %v865_v3 }
 0x266   : > { %v871_v25 = vmul.f32 0.2, %v839_v23  ;;  %v872_v26 = vmul.f32 0.2, %v840_v24  ;;  %v882_v28 = vsel %vm850_vm9, %v834_v17, %v866_v4  ;;  %v883_v29 = vsel %vm851_vm10, %v835_v18, %v867_v9 }
 0x267   : > { %v884_v30 = vsel %vm852_vm11, %v836_v19, %v868_v15  ;;  %v885_v31 = vsel %vm853_vm12, %v837_v20, %v869_v12  ;;  %v886_v32 = vsel %vm854_vm13, %v838_v22, %v870_v21  ;;  %v1090_v35 = vpack.c.bf16 %v882_v28, %v881_v27 }
 0x268   : > { %v887_v33 = vsel %vm855_vm14, %v839_v23, %v871_v25  ;;  %v888_v34 = vsel %vm856_vm15, %v840_v24, %v872_v26  ;;  %v1091_v36 = vpack.c.bf16 %v884_v30, %v883_v29  ;;  %v1092_v37 = vpack.c.bf16 %v886_v32, %v885_v31 }
 0x269   : > { %v1093_v38 = vpack.c.bf16 %v888_v34, %v887_v33  ;;  %941 = vst [vmem:[%s1277_s27 + $0x20] sm:$0xff] %v1090_v35 }
 0x26a   : > { %942 = vst [vmem:[%s1277_s27 + $0x28] sm:$0xff] %v1091_v36  ;;  %943 = vst [vmem:[%s1277_s27 + $0x30] sm:$0xff] %v1092_v37 }
 0x26b   : > { %944 = vst [vmem:[%s1277_s27 + $0x38] sm:$0xff] %v1093_v38 }
 0x26c PF: > { %s13_s12 = sadd.s32 1, %s1115_s12  }
 0x26d   : > { %p10_p4 = scmp.ge.s32.totalorder %s13_s12, 4  }
 0x26f   :  { %12 = sbr.rel (!%p10_p4) target bundleno = 1 (0x1), region = 62 }

// kernel: patch_discriminator.8
= control target key start
LH: loop header
LB: loop body
LE: loop exit
PB: predicated region body
PF: predicated region fallthrough
CT: control target
= control target key end

     0   :  { %s827_s12 = smov 0   ;;  %s912_s0 = inlined_call_operand.vmem [shape: bf16[2,256,256], index: 0, kind: input, shape index: {}]   ;;  %s913_s1 = inlined_call_operand.vmem [shape: bf16[32,256], index: 1, kind: input, shape index: {}]   ;;  %s914_s2 = inlined_call_operand.vmem [shape: f32[32,1], index: 2, kind: input, shape index: {}]   ;;  %s915_s3 = inlined_call_operand.vmem [shape: bf16[2,32,256], index: 3, kind: output, shape index: {}]  }
   0x1 LB: > { %s636_s13 = sadd.s32 4294967295, %s804_s12   ;;  %p640_p0 = scmp.ge.s32.totalorder %s804_s12, 1  ;;  %s804_s12 = sphi %s827_s12, %s13_s12  }
   0x2   : > { %p137_p1 = scmp.lt.s32.totalorder %s804_s12, 3 }
   0x4   : > { %p138_p2 = pnand %p640_p0, %p137_p1 }
   0x5   : > { %p161_p3 = scmp.lt.s32.totalorder (!%p138_p2), %s636_s13, 1 }
   0x6   : > { %141 = sbr.rel (%p138_p2) target bundleno = 597 (0x255), region = 32 }
   0xb   : > { %v786_v0 = vld [vmem:[%s913_s1 + $0x4] ss:$8 sps:$4 sm:$0xff]   ;;  %v806_v1 = vmov 0   ;;  %s917_s13 = smov (!%p161_p3, %s636_s13), 1  ;;  %v789_v2 = vld [vmem:[%s913_s1 + $0x14] ss:$8 sps:$4 sm:$0xff]  }
   0xc   : > { %734 = vset.pattern.permute.xlu0 %v806_v1  ;;  %735 = vset.pattern.permute.xlu1 %v806_v1  ;;  %v207_v3 = vld [vmem:[%s914_s2] sm:$0xff]  ;;  %v209_v4 = vld [vmem:[%s914_s2 + $0x10] sm:$0xff]  ;;  %s687_s22 = sshll.u32 %s917_s13, 8  ;;  %v208_v5 = vld [vmem:[%s914_s2 + $0x8] sm:$0xff]  ;;  %s688_s7 = sshll.u32 %s917_s13, 5 }
   0xd   : > { %443 = vmatprep.mubr.bf16.mxu0 %v786_v0  ;;  %213 = vperm.xlu0 %734, %v207_v3   ;;  %s856_s27 = scalar_lea.vmem %s912_s0, %s687_s22  ;;  %v210_v9 = vld [vmem:[%s914_s2 + $0x18] sm:$0xff]  ;;  %v784_v39 = vld [vmem:[%s913_s1] ss:$8 sps:$4 sm:$0xff]   ;;  %s903_s10 = scalar_lea.vmem %s915_s3, %s688_s7 }
   0xe   : > { %453 = vmatprep.mubr.bf16.mxu1 %v789_v2  ;;  %223 = vperm.xlu1 %735, %v209_v4   ;;  %v736_v6 = vld [vmem:[%s856_s27 + $0x74] ss:$8 sps:$4 sm:$0xff]   ;;  %v738_v7 = vld [vmem:[%s856_s27 + $0x70] ss:$8 sps:$4 sm:$0xff]   ;;  %v739_v8 = vld [vmem:[%s856_s27 + $0x64] ss:$8 sps:$4 sm:$0xff]  }
   0xf   : > { %411 = vmatprep.subr.bf16.mxu0 %v736_v6  ;;  %693 = vmatprep.subr.bf16.mxu1 %v736_v6  ;;  %v741_v10 = vld [vmem:[%s856_s27 + $0x60] ss:$8 sps:$4 sm:$0xff]   ;;  %v742_v11 = vld [vmem:[%s856_s27 + $0x54] ss:$8 sps:$4 sm:$0xff]   ;;  %v744_v12 = vld [vmem:[%s856_s27 + $0x50] ss:$8 sps:$4 sm:$0xff]  }
  0x10   : > { %412 = vmatpush1.bf16.msra.mxu0 %v738_v7  ;;  %709 = vmatpush1.bf16.msra.mxu1 %v738_v7  ;;  %v745_v13 = vld [vmem:[%s856_s27 + $0x44] ss:$8 sps:$4 sm:$0xff]   ;;  %v747_v14 = vld [vmem:[%s856_s27 + $0x40] ss:$8 sps:$4 sm:$0xff]   ;;  %v748_v15 = vld [vmem:[%s856_s27 + $0x34] ss:$8 sps:$4 sm:$0xff]  }
  0x11   : > { %218 = vperm.xlu0 %734, %v208_v5   ;;  %413 = vmatprep.subr.bf16.mxu0 %v739_v8  ;;  %v750_v16 = vld [vmem:[%s856_s27 + $0x30] ss:$8 sps:$4 sm:$0xff]   ;;  %v751_v17 = vld [vmem:[%s856_s27 + $0x24] ss:$8 sps:$4 sm:$0xff]   ;;  %v753_v18 = vld [vmem:[%s856_s27 + $0x20] ss:$8 sps:$4 sm:$0xff]  }
  0x12   : > { %694 = vmatprep.subr.bf16.mxu1 %v739_v8  ;;  %228 = vperm.xlu1 %735, %v210_v9   ;;  %v754_v19 = vld [vmem:[%s856_s27 + $0x14] ss:$8 sps:$4 sm:$0xff]   ;;  %v756_v20 = vld [vmem:[%s856_s27 + $0x10] ss:$8 sps:$4 sm:$0xff]   ;;  %v757_v21 = vld [vmem:[%s856_s27 + $0x4] ss:$8 sps:$4 sm:$0xff]  }
  0x13   : > { %v759_v22 = vld [vmem:[%s856_s27] ss:$8 sps:$4 sm:$0xff]   ;;  %v760_v23 = vld [vmem:[%s856_s27 + $0xf4] ss:$8 sps:$4 sm:$0xff]   ;;  %v762_v24 = vld [vmem:[%s856_s27 + $0xf0] ss:$8 sps:$4 sm:$0xff]  }
  0x14   : > { %414 = vmatpush1.bf16.msra.mxu0 %v741_v10  ;;  %710 = vmatpush1.bf16.msra.mxu1 %v741_v10  ;;  %v763_v25 = vld [vmem:[%s856_s27 + $0xe4] ss:$8 sps:$4 sm:$0xff]   ;;  %v765_v26 = vld [vmem:[%s856_s27 + $0xe0] ss:$8 sps:$4 sm:$0xff]   ;;  %v766_v27 = vld [vmem:[%s856_s27 + $0xd4] ss:$8 sps:$4 sm:$0xff]  }
  0x15   : > { %415 = vmatprep.subr.bf16.mxu0 %v742_v11  ;;  %695 = vmatprep.subr.bf16.mxu1 %v742_v11  ;;  %v768_v28 = vld [vmem:[%s856_s27 + $0xd0] ss:$8 sps:$4 sm:$0xff]   ;;  %v769_v29 = vld [vmem:[%s856_s27 + $0xc4] ss:$8 sps:$4 sm:$0xff]   ;;  %v771_v30 = vld [vmem:[%s856_s27 + $0xc0] ss:$8 sps:$4 sm:$0xff]  }
  0x16   : > { %v772_v31 = vld [vmem:[%s856_s27 + $0xb4] ss:$8 sps:$4 sm:$0xff]   ;;  %v774_v32 = vld [vmem:[%s856_s27 + $0xb0] ss:$8 sps:$4 sm:$0xff]   ;;  %v775_v33 = vld [vmem:[%s856_s27 + $0xa4] ss:$8 sps:$4 sm:$0xff]  }
  0x17   : > { %v777_v34 = vld [vmem:[%s856_s27 + $0xa0] ss:$8 sps:$4 sm:$0xff]   ;;  %v778_v35 = vld [vmem:[%s856_s27 + $0x94] ss:$8 sps:$4 sm:$0xff]   ;;  %v780_v36 = vld [vmem:[%s856_s27 + $0x90] ss:$8 sps:$4 sm:$0xff]  }
  0x18   : > { %416 = vmatpush1.bf16.msra.mxu0 %v744_v12  ;;  %711 = vmatpush1.bf16.msra.mxu1 %v744_v12  ;;  %v781_v37 = vld [vmem:[%s856_s27 + $0x84] ss:$8 sps:$4 sm:$0xff]   ;;  %v783_v38 = vld [vmem:[%s856_s27 + $0x80] ss:$8 sps:$4 sm:$0xff]   ;;  %v787_v40 = vld [vmem:[%s913_s1 + $0x10] ss:$8 sps:$4 sm:$0xff]  }
  0x19   : > { %417 = vmatprep.subr.bf16.mxu0 %v745_v13  ;;  %696 = vmatprep.subr.bf16.mxu1 %v745_v13 }
  0x1c   : > { %418 = vmatpush1.bf16.msra.mxu0 %v747_v14  ;;  %712 = vmatpush1.bf16.msra.mxu1 %v747_v14 }
  0x1d   : > { %419 = vmatprep.subr.bf16.mxu0 %v748_v15  ;;  %697 = vmatprep.subr.bf16.mxu1 %v748_v15 }
  0x20   : > { %420 = vmatpush1.bf16.msra.mxu0 %v750_v16  ;;  %713 = vmatpush1.bf16.msra.mxu1 %v750_v16 }
  0x21   : > { %421 = vmatprep.subr.bf16.mxu0 %v751_v17  ;;  %698 = vmatprep.subr.bf16.mxu1 %v751_v17 }
  0x24   : > { %422 = vmatpush1.bf16.msra.mxu0 %v753_v18  ;;  %714 = vmatpush1.bf16.msra.mxu1 %v753_v18 }
  0x25   : > { %423 = vmatprep.subr.bf16.mxu0 %v754_v19  ;;  %699 = vmatprep.subr.bf16.mxu1 %v754_v19 }
  0x28   : > { %424 = vmatpush1.bf16.msra.mxu0 %v756_v20  ;;  %715 = vmatpush1.bf16.msra.mxu1 %v756_v20 }
  0x29   : > { %425 = vmatprep.subr.bf16.mxu0 %v757_v21  ;;  %700 = vmatprep.subr.bf16.mxu1 %v757_v21 }
  0x2c   : > { %426 = vmatpush1.bf16.msra.mxu0 %v759_v22  ;;  %716 = vmatpush1.bf16.msra.mxu1 %v759_v22 }
  0x2d   : > { %427 = vmatprep.subr.bf16.mxu0 %v760_v23  ;;  %701 = vmatprep.subr.bf16.mxu1 %v760_v23 }
  0x30   : > { %428 = vmatpush2.bf16.msra.mxu0 %v762_v24  ;;  %717 = vmatpush2.bf16.msra.mxu1 %v762_v24 }
  0x31   : > { %429 = vmatprep.subr.bf16.mxu0 %v763_v25  ;;  %702 = vmatprep.subr.bf16.mxu1 %v763_v25 }
  0x34   : > { %430 = vmatpush2.bf16.msra.mxu0 %v765_v26  ;;  %718 = vmatpush2.bf16.msra.mxu1 %v765_v26 }
  0x35   : > { %431 = vmatprep.subr.bf16.mxu0 %v766_v27  ;;  %703 = vmatprep.subr.bf16.mxu1 %v766_v27 }
  0x38   : > { %432 = vmatpush2.bf16.msra.mxu0 %v768_v28  ;;  %719 = vmatpush2.bf16.msra.mxu1 %v768_v28 }
  0x39   : > { %433 = vmatprep.subr.bf16.mxu0 %v769_v29  ;;  %704 = vmatprep.subr.bf16.mxu1 %v769_v29 }
  0x3c   : > { %434 = vmatpush2.bf16.msra.mxu0 %v771_v30  ;;  %720 = vmatpush2.bf16.msra.mxu1 %v771_v30 }
  0x3d   : > { %435 = vmatprep.subr.bf16.mxu0 %v772_v31  ;;  %705 = vmatprep.subr.bf16.mxu1 %v772_v31 }
  0x40   : > { %436 = vmatpush2.bf16.msra.mxu0 %v774_v32  ;;  %721 = vmatpush2.bf16.msra.mxu1 %v774_v32 }
  0x41   : > { %437 = vmatprep.subr.bf16.mxu0 %v775_v33  ;;  %706 = vmatprep.subr.bf16.mxu1 %v775_v33 }
  0x44   : > { %438 = vmatpush2.bf16.msra.mxu0 %v777_v34  ;;  %722 = vmatpush2.bf16.msra.mxu1 %v777_v34 }
  0x45   : > { %439 = vmatprep.subr.bf16.mxu0 %v778_v35  ;;  %707 = vmatprep.subr.bf16.mxu1 %v778_v35 }
  0x48   : > { %440 = vmatpush2.bf16.msra.mxu0 %v780_v36  ;;  %723 = vmatpush2.bf16.msra.mxu1 %v780_v36 }
  0x49   : > { %441 = vmatprep.subr.bf16.mxu0 %v781_v37  ;;  %708 = vmatprep.subr.bf16.mxu1 %v781_v37 }
  0x4c   : > { %442 = vmatpush2.bf16.msra.mxu0 %v783_v38  ;;  %724 = vmatpush2.bf16.msra.mxu1 %v783_v38 }
  0x4f   : > { %444 = vmatmul.mubr.bf16.vlgmr.msra.gmra.mxu0 %v784_v39  ;;  %454 = vmatmul.mubr.bf16.vlgmr.msra.gmra.mxu1 %v787_v40 }
  0x88   : > { %v214_v41 = vpop.permute.xlu0 %213 }
  0x89   : > { %v224_v44 = vpop.permute.xlu1 %223 }
  0x8c   : > { %v219_v52 = vpop.permute.xlu0 %218 }
  0x8d   : > { %v229_v59 = vpop.permute.xlu1 %228 }
 0x10f   : > { %v445_v42 = vpop.f32.mrf.mxu0  ;;  %v455_v43 = vpop.f32.mrf.mxu1 }
 0x110   : > { %v446_v47 = vadd.f32 %v445_v42, %v214_v41  ;;  %v456_v51 = vadd.f32 %v455_v43, %v224_v44 }
 0x111   : > { %v447_v45 = vpop.f32.mrf.mxu0  ;;  %v457_v46 = vpop.f32.mrf.mxu1 }
 0x112   : > { %v448_v48 = vadd.f32 %v447_v45, %v214_v41  ;;  %v458_v53 = vadd.f32 %v457_v46, %v224_v44 }
 0x113   : > { %v449_v49 = vpop.f32.mrf.mxu0  ;;  %v459_v50 = vpop.f32.mrf.mxu1 }
 0x114   : > { %v464_v54 = vadd.f32 %v448_v48, %v446_v47  ;;  %v450_v57 = vadd.f32 %v449_v49, %v219_v52  ;;  %v470_v62 = vadd.f32 %v458_v53, %v456_v51  ;;  %v460_v63 = vadd.f32 %v459_v50, %v229_v59 }
 0x115   : > { %v451_v55 = vpop.f32.mrf.mxu0  ;;  %v461_v56 = vpop.f32.mrf.mxu1 }
 0x116   : > { %v452_v58 = vadd.f32 %v451_v55, %v219_v52  ;;  %465 = vadd.xlane.f32.xlu0 %v464_v54  ;;  %v462_v60 = vadd.f32 %v461_v56, %v229_v59 }
 0x118   : > { %v467_v61 = vadd.f32 %v452_v58, %v450_v57  ;;  %v473_v0 = vadd.f32 %v462_v60, %v460_v63 }
 0x11a   : > { %468 = vadd.xlane.f32.xlu1 %v467_v61  ;;  %471 = vadd.xlane.f32.xlu0 %v470_v62 }
 0x11e   : > { %474 = vadd.xlane.f32.xlu0 %v473_v0 }
 0x19f   : > { %v466_v1 = vpop.xlane.xlu0 %465 }
 0x1a0   : > { %v477_v2 = vmul.f32 0.00390625, %v466_v1 }
 0x1a2   : > { %v481_v3 = vsub.f32 %v446_v47, %v477_v2  ;;  %v482_v4 = vsub.f32 %v448_v48, %v477_v2 }
 0x1a3   : > { %v469_v5 = vpop.xlane.xlu1 %468  ;;  %v472_v6 = vpop.xlane.xlu0 %471 }
 0x1a4   : > { %v478_v7 = vmul.f32 0.00390625, %v469_v5  ;;  %v479_v8 = vmul.f32 0.00390625, %v472_v6  ;;  %v489_v9 = vmul.f32 %v481_v3, %v481_v3  ;;  %v490_v10 = vmul.f32 %v482_v4, %v482_v4 }
 0x1a6   : > { %v483_v11 = vsub.f32 %v450_v57, %v478_v7  ;;  %v484_v12 = vsub.f32 %v452_v58, %v478_v7  ;;  %v485_v13 = vsub.f32 %v456_v51, %v479_v8  ;;  %v486_v14 = vsub.f32 %v458_v53, %v479_v8 }
 0x1a7   : > { %v475_v15 = vpop.xlane.xlu0 %474  ;;  %v497_v16 = vadd.f32 %v490_v10, %v489_v9 }
 0x1a8   : > { %v480_v17 = vmul.f32 0.00390625, %v475_v15  ;;  %v491_v18 = vmul.f32 %v483_v11, %v483_v11  ;;  %v492_v19 = vmul.f32 %v484_v12, %v484_v12  ;;  %v493_v20 = vmul.f32 %v485_v13, %v485_v13 }
 0x1a9   : > { %498 = vadd.xlane.f32.xlu1 %v497_v16  ;;  %v494_v21 = vmul.f32 %v486_v14, %v486_v14 }
 0x1aa   : > { %v487_v22 = vsub.f32 %v460_v63, %v480_v17  ;;  %v488_v23 = vsub.f32 %v462_v60, %v480_v17  ;;  %v500_v24 = vadd.f32 %v492_v19, %v491_v18 }
 0x1ab   : > { %v503_v25 = vadd.f32 %v494_v21, %v493_v20 }
 0x1ac   : > { %501 = vadd.xlane.f32.xlu0 %v500_v24  ;;  %v495_v26 = vmul.f32 %v487_v22, %v487_v22  ;;  %v496_v27 = vmul.f32 %v488_v23, %v488_v23 }
 0x1ad   : > { %504 = vadd.xlane.f32.xlu1 %v503_v25 }
 0x1ae   : > { %v506_v28 = vadd.f32 %v496_v27, %v495_v26 }
 0x1b0   : > { %507 = vadd.xlane.f32.xlu0 %v506_v28 }
 0x232   : > { %v499_v29 = vpop.xlane.xlu1 %498 }
 0x233   : > { %v509_v30 = vmul.f32 0.00390625, %v499_v29 }
 0x235   : > { %v513_v31 = vadd.f32 1e-05, %v509_v30  ;;  %v502_v32 = vpop.xlane.xlu0 %501 }
 0x236   : > { %v505_v33 = vpop.xlane.xlu1 %504  ;;  %v510_v34 = vmul.f32 0.00390625, %v502_v32 }
 0x237   : > { %790 = vrsqrt.f32 %v513_v31  ;;  %v511_v35 = vmul.f32 0.00390625, %v505_v33 }
 0x238   : > { %v514_v36 = vadd.f32 1e-05, %v510_v34 }
 0x239   : > { %v515_v37 = vadd.f32 1e-05, %v511_v35  ;;  %v508_v38 = vpop.xlane.xlu0 %507 }
 0x23a   : > { %792 = vrsqrt.f32 %v514_v36  ;;  %v512_v39 = vmul.f32 0.00390625, %v508_v38 }
 0x23b   : > { %794 = vrsqrt.f32 %v515_v37 }
 0x23c   : > { %v516_v40 = vadd.f32 1e-05, %v512_v39 }
 0x23e   : > { %796 = vrsqrt.f32 %v516_v40 }
 0x244   : > { %v791_v41 = vpop.eup %790 }
 0x245   : > { %v521_v42 = vmul.f32 %v791_v41, %v481_v3  ;;  %v522_v43 = vmul.f32 %v791_v41, %v482_v4 }
 0x247   : > { %v793_v44 = vpop.eup %792  ;;  %vm529_vm0 = vcmp.ge.f32.partialorder %v521_v42, 0.0  ;;  %vm530_vm1 = vcmp.ge.f32.partialorder %v522_v43, 0.0  ;;  %v537_v45 = vmul.f32 0.2, %v521_v42  ;;  %v538_v46 = vmul.f32 0.2, %v522_v43 }
 0x248   : > { %v795_v47 = vpop.eup %794  ;;  %v523_v48 = vmul.f32 %v793_v44, %v483_v11  ;;  %v524_v49 = vmul.f32 %v793_v44, %v484_v12 }
 0x249   : > { %v545_v50 = vsel %vm529_vm0, %v521_v42, %v537_v45  ;;  %v546_v51 = vsel %vm530_vm1, %v522_v43, %v538_v46  ;;  %v525_v52 = vmul.f32 %v795_v47, %v485_v13  ;;  %v526_v53 = vmul.f32 %v795_v47, %v486_v14 }
 0x24a   : > { %v689_v54 = vpack.c.bf16 %v546_v51, %v545_v50  ;;  %vm531_vm2 = vcmp.ge.f32.partialorder %v523_v48, 0.0  ;;  %vm532_vm3 = vcmp.ge.f32.partialorder %v524_v49, 0.0  ;;  %v539_v55 = vmul.f32 0.2, %v523_v48 }
 0x24b   : > { %v797_v56 = vpop.eup %796  ;;  %vm533_vm4 = vcmp.ge.f32.partialorder %v525_v52, 0.0  ;;  %vm534_vm5 = vcmp.ge.f32.partialorder %v526_v53, 0.0  ;;  %v541_v57 = vmul.f32 0.2, %v525_v52  ;;  %v542_v58 = vmul.f32 0.2, %v526_v53 }
 0x24c   : > { %577 = vst [vmem:[%s903_s10] sm:$0xff] %v689_v54  ;;  %v540_v59 = vmul.f32 0.2, %v524_v49  ;;  %v547_v60 = vsel %vm531_vm2, %v523_v48, %v539_v55  ;;  %v527_v61 = vmul.f32 %v797_v56, %v487_v22  ;;  %v528_v62 = vmul.f32 %v797_v56, %v488_v23 }
 0x24d   : > { %v549_v63 = vsel %vm533_vm4, %v525_v52, %v541_v57  ;;  %v550_v0 = vsel %vm534_vm5, %v526_v53, %v542_v58 }
 0x24e   : > { %v691_v1 = vpack.c.bf16 %v550_v0, %v549_v63  ;;  %v548_v2 = vsel %vm532_vm3, %v524_v49, %v540_v59  ;;  %vm535_vm6 = vcmp.ge.f32.partialorder %v527_v61, 0.0  ;;  %vm536_vm7 = vcmp.ge.f32.partialorder %v528_v62, 0.0 }
 0x24f   : > { %v690_v3 = vpack.c.bf16 %v548_v2, %v547_v60  ;;  %v543_v4 = vmul.f32 0.2, %v527_v61  ;;  %v544_v5 = vmul.f32 0.2, %v528_v62 }
 0x250   : > { %579 = vst [vmem:[%s903_s10 + $0x10] sm:$0xff] %v691_v1 }
 0x251   : > { %578 = vst [vmem:[%s903_s10 + $0x8] sm:$0xff] %v690_v3  ;;  %v551_v6 = vsel %vm535_vm6, %v527_v61, %v543_v4  ;;  %v552_v7 = vsel %vm536_vm7, %v528_v62, %v544_v5 }
 0x252   : > { %v692_v8 = vpack.c.bf16 %v552_v7, %v551_v6 }
 0x254   : > { %580 = vst [vmem:[%s903_s10 + $0x18] sm:$0xff] %v692_v8 }
 0x255 PF: > { %s13_s12 = sadd.s32 1, %s804_s12  }
 0x256   : > { %p10_p4 = scmp.ge.s32.totalorder %s13_s12, 4  }
 0x258   :  { %12 = sbr.rel (!%p10_p4) target bundleno = 1 (0x1), region = 62 }

// kernel: patch_discriminator.9
= control target key start
LH: loop header
LB: loop body
LE: loop exit
PB: predicated region body
PF: predicated region fallthrough
CT: control target
= control target key end

     0   :  { %s949_s12 = smov 0   ;;  %s1052_s0 = inlined_call_operand.vmem [shape: bf16[2,512,64], index: 0, kind: input, shape index: {}]   ;;  %s1053_s1 = inlined_call_operand.vmem [shape: bf16[32,512], index: 1, kind: input, shape index: {}]   ;;  %s1054_s2 = inlined_call_operand.vmem [shape: f32[32,1], index: 2, kind: input, shape index: {}]   ;;  %s1055_s3 = inlined_call_operand.vmem [shape: bf16[2,32,64], index: 3, kind: output, shape index: {}]  }
   0x1 LB: > { %s740_s13 = sadd.s32 4294967295, %s926_s12   ;;  %p744_p0 = scmp.ge.s32.totalorder %s926_s12, 1  ;;  %s926_s12 = sphi %s949_s12, %s13_s12  }
   0x2   : > { %p137_p1 = scmp.lt.s32.totalorder %s926_s12, 3 }
   0x4   : > { %p138_p2 = pnand %p744_p0, %p137_p1 }
   0x5   : > { %p161_p3 = scmp.lt.s32.totalorder (!%p138_p2), %s740_s13, 1 }
   0x6   : > { %141 = sbr.rel (%p138_p2) target bundleno = 571 (0x23b), region = 32 }
   0xb   : > { %v902_v0 = vld [vmem:[%s1053_s1 + $0x4] ss:$16 sps:$4 sm:$0xff]   ;;  %v928_v1 = vmov 0   ;;  %s1057_s13 = smov (!%p161_p3, %s740_s13), 1  ;;  %v905_v2 = vld [vmem:[%s1053_s1 + $0xc] ss:$16 sps:$4 sm:$0xff]  }
   0xc   : > { %866 = vset.pattern.permute.xlu0 %v928_v1  ;;  %867 = vset.pattern.permute.xlu1 %v928_v1  ;;  %s795_s18 = sshll.u32 %s1057_s13, 8  ;;  %v244_v3 = vld [vmem:[%s1054_s2] sm:$0xff]  ;;  %v246_v4 = vld [vmem:[%s1054_s2 + $0x10] sm:$0xff]  ;;  %v903_v37 = vld [vmem:[%s1053_s1 + $0x8] ss:$16 sps:$4 sm:$0xff]   ;;  %vm598_vm0 = vcmask 523264  }
   0xd   : > { %532 = vmatprep.mubr.bf16.mxu0 %v902_v0  ;;  %581 = vmatprep.mubr.bf16.mxu1 %v905_v2  ;;  %s969_s21 = scalar_lea.vmem %s1052_s0, %s795_s18  ;;  %v900_v35 = vld [vmem:[%s1053_s1] ss:$16 sps:$4 sm:$0xff]   ;;  %v906_v39 = vld [vmem:[%s1053_s1 + $0x24] ss:$16 sps:$4 sm:$0xff]   ;;  %v245_v40 = vld [vmem:[%s1054_s2 + $0x8] sm:$0xff]  ;;  %s796_s17 = sshll.u32 %s1057_s13, 4 }
   0xe   : > { %v868_v5 = vld [vmem:[%s969_s21 + $0x78] sm:$0xff]   ;;  %250 = vperm.xlu0 %866, %v244_v3   ;;  %260 = vperm.xlu1 %867, %v246_v4   ;;  %v872_v9 = vld [vmem:[%s969_s21 + $0x70] sm:$0xff]   ;;  %v876_v13 = vld [vmem:[%s969_s21 + $0x68] sm:$0xff]   ;;  %s170_s20 = scalar_lea.vmem %s1055_s3, %s796_s17  ;;  %vm680_vm2 = vcmask 519168  }
   0xf   : > { %v869_v6 = vld [vmem:[%s969_s21 + $0xf8] sm:$0xff]   ;;  %801 = vmatprep.subr.bf16.mxu0 %v868_v5  ;;  %v873_v10 = vld [vmem:[%s969_s21 + $0xf0] sm:$0xff]   ;;  %v877_v14 = vld [vmem:[%s969_s21 + $0xe8] sm:$0xff]  }
  0x10   : > { %v870_v7 = vld [vmem:[%s969_s21 + $0x38] sm:$0xff]   ;;  %829 = vmatprep.subr.bf16.mxu1 %v869_v6  ;;  %v874_v11 = vld [vmem:[%s969_s21 + $0x30] sm:$0xff]   ;;  %v878_v15 = vld [vmem:[%s969_s21 + $0x28] sm:$0xff]  }
  0x11   : > { %v871_v8 = vld [vmem:[%s969_s21 + $0xb8] sm:$0xff]   ;;  %802 = vmatpush3.bf16.msra.mxu0 %v870_v7  ;;  %v875_v12 = vld [vmem:[%s969_s21 + $0xb0] sm:$0xff]   ;;  %v879_v16 = vld [vmem:[%s969_s21 + $0xa8] sm:$0xff]  }
  0x12   : > { %830 = vmatpush3.bf16.msra.mxu1 %v871_v8  ;;  %803 = vmatprep.subr.bf16.mxu0 %v872_v9  ;;  %v880_v17 = vld [vmem:[%s969_s21 + $0x60] sm:$0xff]   ;;  %v884_v21 = vld [vmem:[%s969_s21 + $0x58] sm:$0xff]   ;;  %v888_v25 = vld [vmem:[%s969_s21 + $0x50] sm:$0xff]  }
  0x13   : > { %831 = vmatprep.subr.bf16.mxu1 %v873_v10  ;;  %v881_v18 = vld [vmem:[%s969_s21 + $0xe0] sm:$0xff]   ;;  %v885_v22 = vld [vmem:[%s969_s21 + $0xd8] sm:$0xff]   ;;  %v889_v26 = vld [vmem:[%s969_s21 + $0xd0] sm:$0xff]   ;;  %255 = vperm.xlu0 %866, %v245_v40  }
  0x14   : > { %v882_v19 = vld [vmem:[%s969_s21 + $0x20] sm:$0xff]   ;;  %v886_v23 = vld [vmem:[%s969_s21 + $0x18] sm:$0xff]   ;;  %v890_v27 = vld [vmem:[%s969_s21 + $0x10] sm:$0xff]  }
  0x15   : > { %804 = vmatpush3.bf16.msra.mxu0 %v874_v11  ;;  %v883_v20 = vld [vmem:[%s969_s21 + $0xa0] sm:$0xff]   ;;  %v887_v24 = vld [vmem:[%s969_s21 + $0x98] sm:$0xff]   ;;  %v891_v28 = vld [vmem:[%s969_s21 + $0x90] sm:$0xff]  }
  0x16   : > { %832 = vmatpush3.bf16.msra.mxu1 %v875_v12  ;;  %805 = vmatprep.subr.bf16.mxu0 %v876_v13  ;;  %v892_v29 = vld [vmem:[%s969_s21 + $0x48] sm:$0xff]   ;;  %v896_v33 = vld [vmem:[%s969_s21 + $0x40] sm:$0xff]   ;;  %v247_v41 = vld [vmem:[%s1054_s2 + $0x18] sm:$0xff] }
  0x17   : > { %833 = vmatprep.subr.bf16.mxu1 %v877_v14  ;;  %v893_v30 = vld [vmem:[%s969_s21 + $0xc8] sm:$0xff]   ;;  %v897_v34 = vld [vmem:[%s969_s21 + $0xc0] sm:$0xff]   ;;  %265 = vperm.xlu1 %867, %v247_v41  }
  0x18   : > { %v894_v31 = vld [vmem:[%s969_s21 + $0x8] sm:$0xff]   ;;  %v898_v36 = vld [vmem:[%s969_s21] sm:$0xff]  }
  0x19   : > { %806 = vmatpush3.bf16.msra.mxu0 %v878_v15  ;;  %v895_v32 = vld [vmem:[%s969_s21 + $0x88] sm:$0xff]   ;;  %v899_v38 = vld [vmem:[%s969_s21 + $0x80] sm:$0xff]  }
  0x1a   : > { %834 = vmatpush3.bf16.msra.mxu1 %v879_v16  ;;  %807 = vmatprep.subr.bf16.mxu0 %v880_v17  ;;  %v908_v42 = vld [vmem:[%s1053_s1 + $0x2c] ss:$16 sps:$4 sm:$0xff]   ;;  %v910_v43 = vld [vmem:[%s1053_s1 + $0x20] ss:$16 sps:$4 sm:$0xff]   ;;  %v911_v44 = vld [vmem:[%s1053_s1 + $0x28] ss:$16 sps:$4 sm:$0xff]  }
  0x1b   : > { %835 = vmatprep.subr.bf16.mxu1 %v881_v18 }
  0x1d   : > { %808 = vmatpush3.bf16.msra.mxu0 %v882_v19 }
  0x1e   : > { %836 = vmatpush3.bf16.msra.mxu1 %v883_v20  ;;  %809 = vmatprep.subr.bf16.mxu0 %v884_v21 }
  0x1f   : > { %837 = vmatprep.subr.bf16.mxu1 %v885_v22 }
  0x21   : > { %810 = vmatpush3.bf16.msra.mxu0 %v886_v23 }
  0x22   : > { %838 = vmatpush3.bf16.msra.mxu1 %v887_v24  ;;  %811 = vmatprep.subr.bf16.mxu0 %v888_v25 }
  0x23   : > { %839 = vmatprep.subr.bf16.mxu1 %v889_v26 }
  0x25   : > { %812 = vmatpush3.bf16.msra.mxu0 %v890_v27 }
  0x26   : > { %840 = vmatpush3.bf16.msra.mxu1 %v891_v28  ;;  %813 = vmatprep.subr.bf16.mxu0 %v892_v29 }
  0x27   : > { %841 = vmatprep.subr.bf16.mxu1 %v893_v30 }
  0x29   : > { %814 = vmatpush3.bf16.msra.mxu0 %v894_v31 }
  0x2a   : > { %842 = vmatpush3.bf16.msra.mxu1 %v895_v32  ;;  %815 = vmatprep.subr.bf16.mxu0 %v896_v33 }
  0x2b   : > { %843 = vmatprep.subr.bf16.mxu1 %v897_v34 }
  0x2d   : > { %816 = vmatpush3.bf16.msra.mxu0 %v898_v36 }
  0x2e   : > { %844 = vmatpush3.bf16.msra.mxu1 %v899_v38 }
  0x30   : > { %533 = vmatmul.mubr.bf16.vlgmr.msra.gmra.mxu0 %v900_v35 }
  0x31   : > { %582 = vmatmul.mubr.bf16.vlgmr.msra.gmra.mxu1 %v903_v37  ;;  %540 = vmatprep.mubr.bf16.mxu0 %v906_v39 }
  0x32   : > { %589 = vmatprep.mubr.bf16.mxu1 %v908_v42 }
  0x38   : > { %541 = vmatmul.mubr.bf16.gmra.mxu0 %v910_v43 }
  0x39   : > { %590 = vmatmul.mubr.bf16.gmra.mxu1 %v911_v44 }
  0x89   : > { %v251_v46 = vpop.permute.xlu0 %250  ;;  %v261_v1 = vpop.permute.xlu1 %260 }
  0x8e   : > { %v256_v56 = vpop.permute.xlu0 %255 }
  0x92   : > { %v266_v15 = vpop.permute.xlu1 %265 }
  0xf0   : > { %v817_v45 = vpop.f32.mrf.mxu0 }
  0xf1   : > { %v845_v47 = vpop.f32.mrf.mxu1 }
  0xf2   : > { %v818_v48 = vpop.f32.mrf.mxu0 }
  0xf3   : > { %v819_v49 = vadd.f32 %v818_v48, %v817_v45  ;;  %v846_v50 = vpop.f32.mrf.mxu1 }
  0xf4   : > { %v820_v51 = vpop.f32.mrf.mxu0  ;;  %v847_v52 = vadd.f32 %v846_v50, %v845_v47 }
  0xf5   : > { %v535_v53 = vadd.f32 %v819_v49, %v251_v46  ;;  %v848_v54 = vpop.f32.mrf.mxu1 }
  0xf6   : > { %v821_v55 = vpop.f32.mrf.mxu0 }
  0xf7   : > { %v822_v57 = vadd.f32 %v821_v55, %v820_v51  ;;  %v849_v58 = vpop.f32.mrf.mxu1  ;;  %v584_v59 = vadd.f32 %v847_v52, %v535_v53 }
  0xf8   : > { %v823_v60 = vpop.f32.mrf.mxu0  ;;  %v850_v61 = vadd.f32 %v849_v58, %v848_v54 }
  0xf9   : > { %v538_v62 = vadd.f32 %v822_v57, %v256_v56  ;;  %v851_v63 = vpop.f32.mrf.mxu1  ;;  %v599_v0 = vsel %vm598_vm0, %v584_v59, 0.0 }
  0xfa   : > { %v824_v2 = vpop.f32.mrf.mxu0  ;;  %600 = vadd.xlane.f32.xlu0 %v599_v0 }
  0xfb   : > { %v825_v3 = vadd.f32 %v824_v2, %v823_v60  ;;  %v852_v4 = vpop.f32.mrf.mxu1  ;;  %v587_v5 = vadd.f32 %v850_v61, %v538_v62 }
  0xfc   : > { %v826_v6 = vpop.f32.mrf.mxu0  ;;  %v853_v8 = vadd.f32 %v852_v4, %v851_v63 }
  0xfd   : > { %v543_v7 = vadd.f32 %v825_v3, %v261_v1  ;;  %v854_v9 = vpop.f32.mrf.mxu1  ;;  %v602_v10 = vsel %vm598_vm0, %v587_v5, 0.0 }
  0xfe   : > { %v827_v11 = vpop.f32.mrf.mxu0  ;;  %603 = vadd.xlane.f32.xlu1 %v602_v10 }
  0xff   : > { %v828_v12 = vadd.f32 %v827_v11, %v826_v6  ;;  %v855_v13 = vpop.f32.mrf.mxu1  ;;  %v592_v14 = vadd.f32 %v853_v8, %v543_v7 }
 0x100   : > { %v856_v17 = vadd.f32 %v855_v13, %v854_v9 }
 0x101   : > { %v546_v16 = vadd.f32 %v828_v12, %v266_v15  ;;  %v605_v18 = vsel %vm598_vm0, %v592_v14, 0.0 }
 0x102   : > { %606 = vadd.xlane.f32.xlu0 %v605_v18 }
 0x103   : > { %v595_v19 = vadd.f32 %v856_v17, %v546_v16 }
 0x105   : > { %v608_v20 = vsel %vm598_vm0, %v595_v19, 0.0 }
 0x106   : > { %609 = vadd.xlane.f32.xlu0 %v608_v20 }
 0x183   : > { %v601_v21 = vpop.xlane.xlu0 %600 }
 0x184   : > { %v612_v22 = vmul.f32 0.015625, %v601_v21 }
 0x186   : > { %v616_v23 = vsub.f32 %v584_v59, %v612_v22 }
 0x187   : > { %v604_v24 = vpop.xlane.xlu1 %603 }
 0x188   : > { %v613_v25 = vmul.f32 0.015625, %v604_v24  ;;  %v620_v26 = vmul.f32 %v616_v23, %v616_v23 }
 0x18a   : > { %v617_v27 = vsub.f32 %v587_v5, %v613_v25  ;;  %v624_v28 = vsel %vm598_vm0, %v620_v26, 0.0 }
 0x18b   : > { %625 = vadd.xlane.f32.xlu1 %v624_v28  ;;  %v607_v29 = vpop.xlane.xlu0 %606 }
 0x18c   : > { %v614_v30 = vmul.f32 0.015625, %v607_v29  ;;  %v621_v31 = vmul.f32 %v617_v27, %v617_v27 }
 0x18e   : > { %v618_v32 = vsub.f32 %v592_v14, %v614_v30  ;;  %v627_v33 = vsel %vm598_vm0, %v621_v31, 0.0 }
 0x18f   : > { %628 = vadd.xlane.f32.xlu0 %v627_v33  ;;  %v610_v34 = vpop.xlane.xlu0 %609 }
 0x190   : > { %v615_v35 = vmul.f32 0.015625, %v610_v34  ;;  %v622_v36 = vmul.f32 %v618_v32, %v618_v32 }
 0x192   : > { %v619_v37 = vsub.f32 %v595_v19, %v615_v35  ;;  %v630_v38 = vsel %vm598_vm0, %v622_v36, 0.0 }
 0x193   : > { %631 = vadd.xlane.f32.xlu1 %v630_v38 }
 0x194   : > { %v623_v39 = vmul.f32 %v619_v37, %v619_v37 }
 0x196   : > { %v633_v40 = vsel %vm598_vm0, %v623_v39, 0.0 }
 0x197   : > { %634 = vadd.xlane.f32.xlu0 %v633_v40 }
 0x214   : > { %v626_v41 = vpop.xlane.xlu1 %625 }
 0x215   : > { %v636_v42 = vmul.f32 0.015625, %v626_v41 }
 0x217   : > { %v640_v43 = vadd.f32 1e-05, %v636_v42 }
 0x218   : > { %v629_v44 = vpop.xlane.xlu0 %628 }
 0x219   : > { %912 = vrsqrt.f32 %v640_v43  ;;  %v637_v45 = vmul.f32 0.015625, %v629_v44 }
 0x21b   : > { %v641_v46 = vadd.f32 1e-05, %v637_v45 }
 0x21c   : > { %v632_v47 = vpop.xlane.xlu1 %631 }
 0x21d   : > { %914 = vrsqrt.f32 %v641_v46  ;;  %v638_v48 = vmul.f32 0.015625, %v632_v47 }
 0x21f   : > { %v642_v49 = vadd.f32 1e-05, %v638_v48 }
 0x220   : > { %v635_v50 = vpop.xlane.xlu0 %634 }
 0x221   : > { %916 = vrsqrt.f32 %v642_v49  ;;  %v639_v51 = vmul.f32 0.015625, %v635_v50 }
 0x223   : > { %v643_v52 = vadd.f32 1e-05, %v639_v51 }
 0x225   : > { %918 = vrsqrt.f32 %v643_v52 }
 0x226   : > { %v913_v53 = vpop.eup %912 }
 0x227   : > { %v648_v54 = vmul.f32 %v913_v53, %v616_v23 }
 0x229   : > { %vm652_vm1 = vcmp.ge.f32.partialorder %v648_v54, 0.0  ;;  %v656_v55 = vmul.f32 0.2, %v648_v54 }
 0x22a   : > { %v915_v56 = vpop.eup %914 }
 0x22b   : > { %v660_v57 = vsel %vm652_vm1, %v648_v54, %v656_v55  ;;  %v649_v58 = vmul.f32 %v915_v56, %v617_v27 }
 0x22c   : > { %v797_v59 = vpack.c.bf16 %v660_v57, %v660_v57 }
 0x22d   : > { %vm653_vm3 = vcmp.ge.f32.partialorder %v649_v58, 0.0  ;;  %v657_v60 = vmul.f32 0.2, %v649_v58 }
 0x22e   : > { %v917_v61 = vpop.eup %916  ;;  %681 = vst.msk [vmem:[%s170_s20] sm:$0xf] %vm680_vm2, %v797_v59 }
 0x22f   : > { %v661_v62 = vsel %vm653_vm3, %v649_v58, %v657_v60  ;;  %v650_v63 = vmul.f32 %v917_v61, %v618_v32 }
 0x230   : > { %v798_v0 = vpack.c.bf16 %v661_v62, %v661_v62 }
 0x231   : > { %vm654_vm4 = vcmp.ge.f32.partialorder %v650_v63, 0.0  ;;  %v658_v1 = vmul.f32 0.2, %v650_v63 }
 0x232   : > { %v919_v2 = vpop.eup %918  ;;  %682 = vst.msk [vmem:[%s170_s20 + $0x4] sm:$0xf] %vm680_vm2, %v798_v0 }
 0x233   : > { %v662_v3 = vsel %vm654_vm4, %v650_v63, %v658_v1  ;;  %v651_v4 = vmul.f32 %v919_v2, %v619_v37 }
 0x234   : > { %v799_v5 = vpack.c.bf16 %v662_v3, %v662_v3 }
 0x235   : > { %vm655_vm5 = vcmp.ge.f32.partialorder %v651_v4, 0.0  ;;  %v659_v6 = vmul.f32 0.2, %v651_v4 }
 0x236   : > { %683 = vst.msk [vmem:[%s170_s20 + $0x8] sm:$0xf] %vm680_vm2, %v799_v5 }
 0x237   : > { %v663_v7 = vsel %vm655_vm5, %v651_v4, %v659_v6 }
 0x238   : > { %v800_v8 = vpack.c.bf16 %v663_v7, %v663_v7 }
 0x23a   : > { %684 = vst.msk [vmem:[%s170_s20 + $0xc] sm:$0xf] %vm680_vm2, %v800_v8 }
 0x23b PF: > { %s13_s12 = sadd.s32 1, %s926_s12  }
 0x23c   : > { %p10_p4 = scmp.ge.s32.totalorder %s13_s12, 4  }
 0x23e   :  { %12 = sbr.rel (!%p10_p4) target bundleno = 1 (0x1), region = 62 }

// kernel: patch_discriminator.10
= control target key start
LH: loop header
LB: loop body
LE: loop exit
PB: predicated region body
PF: predicated region fallthrough
CT: control target
= control target key end

     0   :  { %s949_s12 = smov 0   ;;  %s1052_s0 = inlined_call_operand.vmem [shape: bf16[2,512,16], index: 0, kind: input, shape index: {}]   ;;  %s1053_s1 = inlined_call_operand.vmem [shape: bf16[32,512], index: 1, kind: input, shape index: {}]   ;;  %s1054_s2 = inlined_call_operand.vmem [shape: f32[32,1], index: 2, kind: input, shape index: {}]   ;;  %s1055_s3 = inlined_call_operand.vmem [shape: bf16[2,32,16], index: 3, kind: output, shape index: {}]  }
   0x1 LB: > { %s740_s13 = sadd.s32 4294967295, %s926_s12   ;;  %p744_p0 = scmp.ge.s32.totalorder %s926_s12, 1  ;;  %s926_s12 = sphi %s949_s12, %s13_s12  }
   0x2   : > { %p137_p1 = scmp.lt.s32.totalorder %s926_s12, 3 }
   0x4   : > { %p138_p2 = pnand %p744_p0, %p137_p1 }
   0x5   : > { %p161_p3 = scmp.lt.s32.totalorder (!%p138_p2), %s740_s13, 1 }
   0x6   : > { %141 = sbr.rel (%p138_p2) target bundleno = 571 (0x23b), region = 32 }
   0xb   : > { %v902_v0 = vld [vmem:[%s1053_s1 + $0x4] ss:$16 sps:$4 sm:$0xff]   ;;  %v928_v1 = vmov 0   ;;  %s1057_s13 = smov (!%p161_p3, %s740_s13), 1  ;;  %v905_v2 = vld [vmem:[%s1053_s1 + $0xc] ss:$16 sps:$4 sm:$0xff]  }
   0xc   : > { %866 = vset.pattern.permute.xlu0 %v928_v1  ;;  %867 = vset.pattern.permute.xlu1 %v928_v1  ;;  %s795_s18 = sshll.u32 %s1057_s13, 8  ;;  %v244_v3 = vld [vmem:[%s1054_s2] sm:$0xff]  ;;  %v246_v4 = vld [vmem:[%s1054_s2 + $0x10] sm:$0xff]  ;;  %v903_v37 = vld [vmem:[%s1053_s1 + $0x8] ss:$16 sps:$4 sm:$0xff]   ;;  %vm598_vm0 = vcmask 130048  }
   0xd   : > { %532 = vmatprep.mubr.bf16.mxu0 %v902_v0  ;;  %581 = vmatprep.mubr.bf16.mxu1 %v905_v2  ;;  %s969_s21 = scalar_lea.vmem %s1052_s0, %s795_s18  ;;  %v900_v35 = vld [vmem:[%s1053_s1] ss:$16 sps:$4 sm:$0xff]   ;;  %v906_v39 = vld [vmem:[%s1053_s1 + $0x24] ss:$16 sps:$4 sm:$0xff]   ;;  %v245_v40 = vld [vmem:[%s1054_s2 + $0x8] sm:$0xff]  ;;  %s796_s17 = sshll.u32 %s1057_s13, 4 }
   0xe   : > { %v868_v5 = vld [vmem:[%s969_s21 + $0x78] sm:$0xff]   ;;  %250 = vperm.xlu0 %866, %v244_v3   ;;  %260 = vperm.xlu1 %867, %v246_v4   ;;  %v872_v9 = vld [vmem:[%s969_s21 + $0x70] sm:$0xff]   ;;  %v876_v13 = vld [vmem:[%s969_s21 + $0x68] sm:$0xff]   ;;  %s170_s20 = scalar_lea.vmem %s1055_s3, %s796_s17  ;;  %vm680_vm2 = vcmask 125952  }
   0xf   : > { %v869_v6 = vld [vmem:[%s969_s21 + $0xf8] sm:$0xff]   ;;  %801 = vmatprep.subr.bf16.mxu0 %v868_v5  ;;  %v873_v10 = vld [vmem:[%s969_s21 + $0xf0] sm:$0xff]   ;;  %v877_v14 = vld [vmem:[%s969_s21 + $0xe8] sm:$0xff]  }
  0x10   : > { %v870_v7 = vld [vmem:[%s969_s21 + $0x38] sm:$0xff]   ;;  %829 = vmatprep.subr.bf16.mxu1 %v869_v6  ;;  %v874_v11 = vld [vmem:[%s969_s21 + $0x30] sm:$0xff]   ;;  %v878_v15 = vld [vmem:[%s969_s21 + $0x28] sm:$0xff]  }
  0x11   : > { %v871_v8 = vld [vmem:[%s969_s21 + $0xb8] sm:$0xff]   ;;  %802 = vmatpush3.bf16.msra.mxu0 %v870_v7  ;;  %v875_v12 = vld [vmem:[%s969_s21 + $0xb0] sm:$0xff]   ;;  %v879_v16 = vld [vmem:[%s969_s21 + $0xa8] sm:$0xff]  }
  0x12   : > { %830 = vmatpush3.bf16.msra.mxu1 %v871_v8  ;;  %803 = vmatprep.subr.bf16.mxu0 %v872_v9  ;;  %v880_v17 = vld [vmem:[%s969_s21 + $0x60] sm:$0xff]   ;;  %v884_v21 = vld [vmem:[%s969_s21 + $0x58] sm:$0xff]   ;;  %v888_v25 = vld [vmem:[%s969_s21 + $0x50] sm:$0xff]  }
  0x13   : > { %831 = vmatprep.subr.bf16.mxu1 %v873_v10  ;;  %v881_v18 = vld [vmem:[%s969_s21 + $0xe0] sm:$0xff]   ;;  %v885_v22 = vld [vmem:[%s969_s21 + $0xd8] sm:$0xff]   ;;  %v889_v26 = vld [vmem:[%s969_s21 + $0xd0] sm:$0xff]   ;;  %255 = vperm.xlu0 %866, %v245_v40  }
  0x14   : > { %v882_v19 = vld [vmem:[%s969_s21 + $0x20] sm:$0xff]   ;;  %v886_v23 = vld [vmem:[%s969_s21 + $0x18] sm:$0xff]   ;;  %v890_v27 = vld [vmem:[%s969_s21 + $0x10] sm:$0xff]  }
  0x15   : > { %804 = vmatpush3.bf16.msra.mxu0 %v874_v11  ;;  %v883_v20 = vld [vmem:[%s969_s21 + $0xa0] sm:$0xff]   ;;  %v887_v24 = vld [vmem:[%s969_s21 + $0x98] sm:$0xff]   ;;  %v891_v28 = vld [vmem:[%s969_s21 + $0x90] sm:$0xff]  }
  0x16   : > { %832 = vmatpush3.bf16.msra.mxu1 %v875_v12  ;;  %805 = vmatprep.subr.bf16.mxu0 %v876_v13  ;;  %v892_v29 = vld [vmem:[%s969_s21 + $0x48] sm:$0xff]   ;;  %v896_v33 = vld [vmem:[%s969_s21 + $0x40] sm:$0xff]   ;;  %v247_v41 = vld [vmem:[%s1054_s2 + $0x18] sm:$0xff] }
  0x17   : > { %833 = vmatprep.subr.bf16.mxu1 %v877_v14  ;;  %v893_v30 = vld [vmem:[%s969_s21 + $0xc8] sm:$0xff]   ;;  %v897_v34 = vld [vmem:[%s969_s21 + $0xc0] sm:$0xff]   ;;  %265 = vperm.xlu1 %867, %v247_v41  }
  0x18   : > { %v894_v31 = vld [vmem:[%s969_s21 + $0x8] sm:$0xff]   ;;  %v898_v36 = vld [vmem:[%s969_s21] sm:$0xff]  }
  0x19   : > { %806 = vmatpush3.bf16.msra.mxu0 %v878_v15  ;;  %v895_v32 = vld [vmem:[%s969_s21 + $0x88] sm:$0xff]   ;;  %v899_v38 = vld [vmem:[%s969_s21 + $0x80] sm:$0xff]  }
  0x1a   : > { %834 = vmatpush3.bf16.msra.mxu1 %v879_v16  ;;  %807 = vmatprep.subr.bf16.mxu0 %v880_v17  ;;  %v908_v42 = vld [vmem:[%s1053_s1 + $0x2c] ss:$16 sps:$4 sm:$0xff]   ;;  %v910_v43 = vld [vmem:[%s1053_s1 + $0x20] ss:$16 sps:$4 sm:$0xff]   ;;  %v911_v44 = vld [vmem:[%s1053_s1 + $0x28] ss:$16 sps:$4 sm:$0xff]  }
  0x1b   : > { %835 = vmatprep.subr.bf16.mxu1 %v881_v18 }
  0x1d   : > { %808 = vmatpush3.bf16.msra.mxu0 %v882_v19 }
  0x1e   : > { %836 = vmatpush3.bf16.msra.mxu1 %v883_v20  ;;  %809 = vmatprep.subr.bf16.mxu0 %v884_v21 }
  0x1f   : > { %837 = vmatprep.subr.bf16.mxu1 %v885_v22 }
  0x21   : > { %810 = vmatpush3.bf16.msra.mxu0 %v886_v23 }
  0x22   : > { %838 = vmatpush3.bf16.msra.mxu1 %v887_v24  ;;  %811 = vmatprep.subr.bf16.mxu0 %v888_v25 }
  0x23   : > { %839 = vmatprep.subr.bf16.mxu1 %v889_v26 }
  0x25   : > { %812 = vmatpush3.bf16.msra.mxu0 %v890_v27 }
  0x26   : > { %840 = vmatpush3.bf16.msra.mxu1 %v891_v28  ;;  %813 = vmatprep.subr.bf16.mxu0 %v892_v29 }
  0x27   : > { %841 = vmatprep.subr.bf16.mxu1 %v893_v30 }
  0x29   : > { %814 = vmatpush3.bf16.msra.mxu0 %v894_v31 }
  0x2a   : > { %842 = vmatpush3.bf16.msra.mxu1 %v895_v32  ;;  %815 = vmatprep.subr.bf16.mxu0 %v896_v33 }
  0x2b   : > { %843 = vmatprep.subr.bf16.mxu1 %v897_v34 }
  0x2d   : > { %816 = vmatpush3.bf16.msra.mxu0 %v898_v36 }
  0x2e   : > { %844 = vmatpush3.bf16.msra.mxu1 %v899_v38 }
  0x30   : > { %533 = vmatmul.mubr.bf16.vlgmr.msra.gmra.mxu0 %v900_v35 }
  0x31   : > { %582 = vmatmul.mubr.bf16.vlgmr.msra.gmra.mxu1 %v903_v37  ;;  %540 = vmatprep.mubr.bf16.mxu0 %v906_v39 }
  0x32   : > { %589 = vmatprep.mubr.bf16.mxu1 %v908_v42 }
  0x38   : > { %541 = vmatmul.mubr.bf16.gmra.mxu0 %v910_v43 }
  0x39   : > { %590 = vmatmul.mubr.bf16.gmra.mxu1 %v911_v44 }
  0x89   : > { %v251_v46 = vpop.permute.xlu0 %250  ;;  %v261_v1 = vpop.permute.xlu1 %260 }
  0x8e   : > { %v256_v56 = vpop.permute.xlu0 %255 }
  0x92   : > { %v266_v15 = vpop.permute.xlu1 %265 }
  0xf0   : > { %v817_v45 = vpop.f32.mrf.mxu0 }
  0xf1   : > { %v845_v47 = vpop.f32.mrf.mxu1 }
  0xf2   : > { %v818_v48 = vpop.f32.mrf.mxu0 }
  0xf3   : > { %v819_v49 = vadd.f32 %v818_v48, %v817_v45  ;;  %v846_v50 = vpop.f32.mrf.mxu1 }
  0xf4   : > { %v820_v51 = vpop.f32.mrf.mxu0  ;;  %v847_v52 = vadd.f32 %v846_v50, %v845_v47 }
  0xf5   : > { %v535_v53 = vadd.f32 %v819_v49, %v251_v46  ;;  %v848_v54 = vpop.f32.mrf.mxu1 }
  0xf6   : > { %v821_v55 = vpop.f32.mrf.mxu0 }
  0xf7   : > { %v822_v57 = vadd.f32 %v821_v55, %v820_v51  ;;  %v849_v58 = vpop.f32.mrf.mxu1  ;;  %v584_v59 = vadd.f32 %v847_v52, %v535_v53 }
  0xf8   : > { %v823_v60 = vpop.f32.mrf.mxu0  ;;  %v850_v61 = vadd.f32 %v849_v58, %v848_v54 }
  0xf9   : > { %v538_v62 = vadd.f32 %v822_v57, %v256_v56  ;;  %v851_v63 = vpop.f32.mrf.mxu1  ;;  %v599_v0 = vsel %vm598_vm0, %v584_v59, 0.0 }
  0xfa   : > { %v824_v2 = vpop.f32.mrf.mxu0  ;;  %600 = vadd.xlane.f32.xlu0 %v599_v0 }
  0xfb   : > { %v825_v3 = vadd.f32 %v824_v2, %v823_v60  ;;  %v852_v4 = vpop.f32.mrf.mxu1  ;;  %v587_v5 = vadd.f32 %v850_v61, %v538_v62 }
  0xfc   : > { %v826_v6 = vpop.f32.mrf.mxu0  ;;  %v853_v8 = vadd.f32 %v852_v4, %v851_v63 }
  0xfd   : > { %v543_v7 = vadd.f32 %v825_v3, %v261_v1  ;;  %v854_v9 = vpop.f32.mrf.mxu1  ;;  %v602_v10 = vsel %vm598_vm0, %v587_v5, 0.0 }
  0xfe   : > { %v827_v11 = vpop.f32.mrf.mxu0  ;;  %603 = vadd.xlane.f32.xlu1 %v602_v10 }
  0xff   : > { %v828_v12 = vadd.f32 %v827_v11, %v826_v6  ;;  %v855_v13 = vpop.f32.mrf.mxu1  ;;  %v592_v14 = vadd.f32 %v853_v8, %v543_v7 }
 0x100   : > { %v856_v17 = vadd.f32 %v855_v13, %v854_v9 }
 0x101   : > { %v546_v16 = vadd.f32 %v828_v12, %v266_v15  ;;  %v605_v18 = vsel %vm598_vm0, %v592_v14, 0.0 }
 0x102   : > { %606 = vadd.xlane.f32.xlu0 %v605_v18 }
 0x103   : > { %v595_v19 = vadd.f32 %v856_v17, %v546_v16 }
 0x105   : > { %v608_v20 = vsel %vm598_vm0, %v595_v19, 0.0 }
 0x106   : > { %609 = vadd.xlane.f32.xlu0 %v608_v20 }
 0x183   : > { %v601_v21 = vpop.xlane.xlu0 %600 }
 0x184   : > { %v612_v22 = vmul.f32 0.0625, %v601_v21 }
 0x186   : > { %v616_v23 = vsub.f32 %v584_v59, %v612_v22 }
 0x187   : > { %v604_v24 = vpop.xlane.xlu1 %603 }
 0x188   : > { %v613_v25 = vmul.f32 0.0625, %v604_v24  ;;  %v620_v26 = vmul.f32 %v616_v23, %v616_v23 }
 0x18a   : > { %v617_v27 = vsub.f32 %v587_v5, %v613_v25  ;;  %v624_v28 = vsel %vm598_vm0, %v620_v26, 0.0 }
 0x18b   : > { %625 = vadd.xlane.f32.xlu1 %v624_v28  ;;  %v607_v29 = vpop.xlane.xlu0 %606 }
 0x18c   : > { %v614_v30 = vmul.f32 0.0625, %v607_v29  ;;  %v621_v31 = vmul.f32 %v617_v27, %v617_v27 }
 0x18e   : > { %v618_v32 = vsub.f32 %v592_v14, %v614_v30  ;;  %v627_v33 = vsel %vm598_vm0, %v621_v31, 0.0 }
 0x18f   : > { %628 = vadd.xlane.f32.xlu0 %v627_v33  ;;  %v610_v34 = vpop.xlane.xlu0 %609 }
 0x190   : > { %v615_v35 = vmul.f32 0.0625, %v610_v34  ;;  %v622_v36 = vmul.f32 %v618_v32, %v618_v32 }
 0x192   : > { %v619_v37 = vsub.f32 %v595_v19, %v615_v35  ;;  %v630_v38 = vsel %vm598_vm0, %v622_v36, 0.0 }
 0x193   : > { %631 = vadd.xlane.f32.xlu1 %v630_v38 }
 0x194   : > { %v623_v39 = vmul.f32 %v619_v37, %v619_v37 }
 0x196   : > { %v633_v40 = vsel %vm598_vm0, %v623_v39, 0.0 }
 0x197   : > { %634 = vadd.xlane.f32.xlu0 %v633_v40 }
 0x214   : > { %v626_v41 = vpop.xlane.xlu1 %625 }
 0x215   : > { %v636_v42 = vmul.f32 0.0625, %v626_v41 }
 0x217   : > { %v640_v43 = vadd.f32 1e-05, %v636_v42 }
 0x218   : > { %v629_v44 = vpop.xlane.xlu0 %628 }
 0x219   : > { %912 = vrsqrt.f32 %v640_v43  ;;  %v637_v45 = vmul.f32 0.0625, %v629_v44 }
 0x21b   : > { %v641_v46 = vadd.f32 1e-05, %v637_v45 }
 0x21c   : > { %v632_v47 = vpop.xlane.xlu1 %631 }
 0x21d   : > { %914 = vrsqrt.f32 %v641_v46  ;;  %v638_v48 = vmul.f32 0.0625, %v632_v47 }
 0x21f   : > { %v642_v49 = vadd.f32 1e-05, %v638_v48 }
 0x220   : > { %v635_v50 = vpop.xlane.xlu0 %634 }
 0x221   : > { %916 = vrsqrt.f32 %v642_v49  ;;  %v639_v51 = vmul.f32 0.0625, %v635_v50 }
 0x223   : > { %v643_v52 = vadd.f32 1e-05, %v639_v51 }
 0x225   : > { %918 = vrsqrt.f32 %v643_v52 }
 0x226   : > { %v913_v53 = vpop.eup %912 }
 0x227   : > { %v648_v54 = vmul.f32 %v913_v53, %v616_v23 }
 0x229   : > { %vm652_vm1 = vcmp.ge.f32.partialorder %v648_v54, 0.0  ;;  %v656_v55 = vmul.f32 0.2, %v648_v54 }
 0x22a   : > { %v915_v56 = vpop.eup %914 }
 0x22b   : > { %v660_v57 = vsel %vm652_vm1, %v648_v54, %v656_v55  ;;  %v649_v58 = vmul.f32 %v915_v56, %v617_v27 }
 0x22c   : > { %v797_v59 = vpack.c.bf16 %v660_v57, %v660_v57 }
 0x22d   : > { %vm653_vm3 = vcmp.ge.f32.partialorder %v649_v58, 0.0  ;;  %v657_v60 = vmul.f32 0.2, %v649_v58 }
 0x22e   : > { %v917_v61 = vpop.eup %916  ;;  %681 = vst.msk [vmem:[%s170_s20] sm:$0xf] %vm680_vm2, %v797_v59 }
 0x22f   : > { %v661_v62 = vsel %vm653_vm3, %v649_v58, %v657_v60  ;;  %v650_v63 = vmul.f32 %v917_v61, %v618_v32 }
 0x230   : > { %v798_v0 = vpack.c.bf16 %v661_v62, %v661_v62 }
 0x231   : > { %vm654_vm4 = vcmp.ge.f32.partialorder %v650_v63, 0.0  ;;  %v658_v1 = vmul.f32 0.2, %v650_v63 }
 0x232   : > { %v919_v2 = vpop.eup %918  ;;  %682 = vst.msk [vmem:[%s170_s20 + $0x4] sm:$0xf] %vm680_vm2, %v798_v0 }
 0x233   : > { %v662_v3 = vsel %vm654_vm4, %v650_v63, %v658_v1  ;;  %v651_v4 = vmul.f32 %v919_v2, %v619_v37 }
 0x234   : > { %v799_v5 = vpack.c.bf16 %v662_v3, %v662_v3 }
 0x235   : > { %vm655_vm5 = vcmp.ge.f32.partialorder %v651_v4, 0.0  ;;  %v659_v6 = vmul.f32 0.2, %v651_v4 }
 0x236   : > { %683 = vst.msk [vmem:[%s170_s20 + $0x8] sm:$0xf] %vm680_vm2, %v799_v5 }
 0x237   : > { %v663_v7 = vsel %vm655_vm5, %v651_v4, %v659_v6 }
 0x238   : > { %v800_v8 = vpack.c.bf16 %v663_v7, %v663_v7 }
 0x23a   : > { %684 = vst.msk [vmem:[%s170_s20 + $0xc] sm:$0xf] %vm680_vm2, %v800_v8 }
 0x23b PF: > { %s13_s12 = sadd.s32 1, %s926_s12  }
 0x23c   : > { %p10_p4 = scmp.ge.s32.totalorder %s13_s12, 4  }
 0x23e   :  { %12 = sbr.rel (!%p10_p4) target bundleno = 1 (0x1), region = 62 }

// kernel: patch_discriminator.11
= control target key start
LH: loop header
LB: loop body
LE: loop exit
PB: predicated region body
PF: predicated region fallthrough
CT: control target
= control target key end

     0   :  { %s758_s14 = smov 0   ;;  %s825_s0 = inlined_call_operand.vmem [shape: bf16[2,512,4], index: 0, kind: input, shape index: {}]   ;;  %s826_s1 = inlined_call_operand.vmem [shape: bf16[1,512], index: 1, kind: input, shape index: {}]   ;;  %s827_s2 = inlined_call_operand.<no memory space> [shape: f32[1,1], index: 2, kind: input, shape index: {}]   ;;  %s828_s3 = inlined_call_operand.vmem [shape: f32[2,1,4], index: 3, kind: output, shape index: {}]  }
   0x1   :  { %v8_v0 = vstv %s827_s2 }
   0x2   :  { %9 = vst [vmem:[#allocation2] sm:$0x1] %v8_v0 }
   0x3 LB: > { %s595_s15 = sadd.s32 4294967295, %s731_s14   ;;  %p599_p0 = scmp.ge.s32.totalorder %s731_s14, 1  ;;  %s731_s14 = sphi %s758_s14, %s15_s14  }
   0x4   : > { %p139_p1 = scmp.lt.s32.totalorder %s731_s14, 3 }
   0x6   : > { %p140_p2 = pnand %p599_p0, %p139_p1 }
   0x7   : > { %p161_p3 = scmp.lt.s32.totalorder (!%p140_p2), %s595_s15, 1 }
   0x8   : > { %143 = sbr.rel (%p140_p2) target bundleno = 252 (0xfc), region = 32 }
   0xd   : > { %v769_v1 = vld.sshfl [vmem:[%s826_s1] sm:$0x33 pattern:$0x75316420]  ;;  %v241_v2 = vlaneseq  ;;  %v733_v3 = vmov 0   ;;  %s830_s15 = smov (!%p161_p3, %s595_s15), 1 }
   0xe   : > { %692 = vset.pattern.permute.xlu0 %v733_v3  ;;  %v235_v4 = vld [vmem:[#allocation2] sm:$0x1]  ;;  %v734_v6 = vmov 1966171168   ;;  %s637_s2 = sshll.u32 %s830_s15, 8  ;;  %v253_v8 = vcombine.high %v769_v1, %v769_v1  ;;  %s168_s23 = scalar_lea.vmem %s828_s3, %s830_s15  ;;  %vm546_vm0 = vcmask 24576  }
   0xf   : > { %v773_v5 = vshrl.u32 %v241_v2, 7  ;;  %v255_v7 = vunpack.c.l.s4 %v734_v6  ;;  %238 = vperm.xlu0 %692, %v235_v4   ;;  %s781_s20 = scalar_lea.vmem %s825_s0, %s637_s2 }
  0x10   : > { %v693_v10 = vld [vmem:[%s781_s20 + $0x78] sm:$0xff]   ;;  %v697_v16 = vld [vmem:[%s781_s20 + $0x70] sm:$0xff]   ;;  %v701_v21 = vld [vmem:[%s781_s20 + $0x68] sm:$0xff]  }
  0x11   : > { %v256_v9 = vunpack.c.0.s8 %v255_v7  ;;  %v694_v12 = vld [vmem:[%s781_s20 + $0xf8] sm:$0xff]   ;;  %638 = vmatprep.subr.bf16.mxu0 %v693_v10  ;;  %v698_v18 = vld [vmem:[%s781_s20 + $0xf0] sm:$0xff]   ;;  %v702_v22 = vld [vmem:[%s781_s20 + $0xe8] sm:$0xff]   ;;  %v243_v47 = vsub.s32 0, %v773_v5 }
  0x12   : > { %v695_v13 = vld [vmem:[%s781_s20 + $0x38] sm:$0xff]   ;;  %660 = vmatprep.subr.bf16.mxu1 %v694_v12  ;;  %v699_v19 = vld [vmem:[%s781_s20 + $0x30] sm:$0xff]   ;;  %v703_v23 = vld [vmem:[%s781_s20 + $0x28] sm:$0xff]  }
  0x13   : > { %v259_v11 = vsub.s32 %v256_v9, %v773_v5  ;;  %v696_v15 = vld [vmem:[%s781_s20 + $0xb8] sm:$0xff]   ;;  %639 = vmatpush3.bf16.msra.mxu0 %v695_v13  ;;  %v700_v20 = vld [vmem:[%s781_s20 + $0xb0] sm:$0xff]   ;;  %v704_v24 = vld [vmem:[%s781_s20 + $0xa8] sm:$0xff]  }
  0x14   : > { %661 = vmatpush3.bf16.msra.mxu1 %v696_v15  ;;  %640 = vmatprep.subr.bf16.mxu0 %v697_v16  ;;  %v705_v25 = vld [vmem:[%s781_s20 + $0x60] sm:$0xff]   ;;  %v709_v29 = vld [vmem:[%s781_s20 + $0x58] sm:$0xff]   ;;  %v713_v33 = vld [vmem:[%s781_s20 + $0x50] sm:$0xff]  }
  0x15   : > { %v267_v14 = vrot.slane %v253_v8, %v259_v11  ;;  %662 = vmatprep.subr.bf16.mxu1 %v698_v18  ;;  %v706_v26 = vld [vmem:[%s781_s20 + $0xe0] sm:$0xff]   ;;  %v710_v30 = vld [vmem:[%s781_s20 + $0xd8] sm:$0xff]   ;;  %v714_v34 = vld [vmem:[%s781_s20 + $0xd0] sm:$0xff]   ;;  %v260_v42 = vrot.slane %v769_v1, %v259_v11 }
  0x16   : > { %v707_v27 = vld [vmem:[%s781_s20 + $0x20] sm:$0xff]   ;;  %v711_v31 = vld [vmem:[%s781_s20 + $0x18] sm:$0xff]   ;;  %v715_v35 = vld [vmem:[%s781_s20 + $0x10] sm:$0xff]  }
  0x17   : > { %498 = vmatprep.mubr.bf16.mxu0 %v267_v14  ;;  %v269_v17 = vcombine.high %v267_v14, %v267_v14  ;;  %641 = vmatpush3.bf16.msra.mxu0 %v699_v19  ;;  %v708_v28 = vld [vmem:[%s781_s20 + $0xa0] sm:$0xff]   ;;  %v712_v32 = vld [vmem:[%s781_s20 + $0x98] sm:$0xff]   ;;  %v716_v36 = vld [vmem:[%s781_s20 + $0x90] sm:$0xff]   ;;  %v268_v46 = vcombine.high %v260_v42, %v260_v42 }
  0x18   : > { %663 = vmatpush3.bf16.msra.mxu1 %v700_v20  ;;  %642 = vmatprep.subr.bf16.mxu0 %v701_v21  ;;  %v717_v37 = vld [vmem:[%s781_s20 + $0x48] sm:$0xff]   ;;  %v721_v41 = vld [vmem:[%s781_s20 + $0x40] sm:$0xff]  }
  0x19   : > { %538 = vmatprep.mubr.bf16.mxu1 %v269_v17  ;;  %664 = vmatprep.subr.bf16.mxu1 %v702_v22  ;;  %v718_v38 = vld [vmem:[%s781_s20 + $0xc8] sm:$0xff]   ;;  %v722_v43 = vld [vmem:[%s781_s20 + $0xc0] sm:$0xff]  }
  0x1a   : > { %v719_v39 = vld [vmem:[%s781_s20 + $0x8] sm:$0xff]   ;;  %v723_v44 = vld [vmem:[%s781_s20] sm:$0xff]  }
  0x1b   : > { %643 = vmatpush3.bf16.msra.mxu0 %v703_v23  ;;  %v720_v40 = vld [vmem:[%s781_s20 + $0x88] sm:$0xff]   ;;  %v724_v45 = vld [vmem:[%s781_s20 + $0x80] sm:$0xff]  }
  0x1c   : > { %665 = vmatpush3.bf16.msra.mxu1 %v704_v24  ;;  %644 = vmatprep.subr.bf16.mxu0 %v705_v25 }
  0x1d   : > { %666 = vmatprep.subr.bf16.mxu1 %v706_v26 }
  0x1f   : > { %645 = vmatpush3.bf16.msra.mxu0 %v707_v27 }
  0x20   : > { %667 = vmatpush3.bf16.msra.mxu1 %v708_v28  ;;  %646 = vmatprep.subr.bf16.mxu0 %v709_v29 }
  0x21   : > { %668 = vmatprep.subr.bf16.mxu1 %v710_v30 }
  0x23   : > { %647 = vmatpush3.bf16.msra.mxu0 %v711_v31 }
  0x24   : > { %669 = vmatpush3.bf16.msra.mxu1 %v712_v32  ;;  %648 = vmatprep.subr.bf16.mxu0 %v713_v33 }
  0x25   : > { %670 = vmatprep.subr.bf16.mxu1 %v714_v34 }
  0x27   : > { %649 = vmatpush3.bf16.msra.mxu0 %v715_v35 }
  0x28   : > { %671 = vmatpush3.bf16.msra.mxu1 %v716_v36  ;;  %650 = vmatprep.subr.bf16.mxu0 %v717_v37 }
  0x29   : > { %672 = vmatprep.subr.bf16.mxu1 %v718_v38 }
  0x2b   : > { %651 = vmatpush3.bf16.msra.mxu0 %v719_v39 }
  0x2c   : > { %673 = vmatpush3.bf16.msra.mxu1 %v720_v40  ;;  %652 = vmatprep.subr.bf16.mxu0 %v721_v41 }
  0x2d   : > { %674 = vmatprep.subr.bf16.mxu1 %v722_v43 }
  0x2f   : > { %653 = vmatpush3.bf16.msra.mxu0 %v723_v44 }
  0x30   : > { %675 = vmatpush3.bf16.msra.mxu1 %v724_v45 }
  0x32   : > { %499 = vmatmul.mubr.bf16.vlgmr.msra.gmra.mxu0 %v260_v42 }
  0x33   : > { %539 = vmatmul.mubr.bf16.vlgmr.msra.gmra.mxu1 %v268_v46 }
  0x8a   : > { %v239_v48 = vpop.permute.xlu0 %238 }
  0x8b   : > { %v244_v51 = vrot.slane %v239_v48, %v243_v47 }
  0xf2   : > { %v654_v49 = vpop.f32.mrf.mxu0 }
  0xf3   : > { %v676_v50 = vpop.f32.mrf.mxu1 }
  0xf4   : > { %v655_v52 = vpop.f32.mrf.mxu0 }
  0xf5   : > { %v656_v53 = vadd.f32 %v655_v52, %v654_v49  ;;  %v677_v54 = vpop.f32.mrf.mxu1 }
  0xf6   : > { %v657_v55 = vpop.f32.mrf.mxu0  ;;  %v678_v57 = vadd.f32 %v677_v54, %v676_v50 }
  0xf7   : > { %v501_v56 = vadd.f32 %v656_v53, %v244_v51  ;;  %v679_v58 = vpop.f32.mrf.mxu1 }
  0xf8   : > { %v658_v59 = vpop.f32.mrf.mxu0 }
  0xf9   : > { %v541_v60 = vadd.f32 %v678_v57, %v501_v56  ;;  %v680_v61 = vpop.f32.mrf.mxu1 }
  0xfb   : > { %547 = vst.msk [vmem:[%s168_s23] sm:$0x1] %vm546_vm0, %v541_v60 }
  0xfc PF: > { %s15_s14 = sadd.s32 1, %s731_s14  }
  0xfd   : > { %p12_p4 = scmp.ge.s32.totalorder %s15_s14, 4  }
  0xff   :  { %14 = sbr.rel (!%p12_p4) target bundleno = 3 (0x3), region = 62 }

</bundles_post_ra>
